<compile_context>
chip_gen: v6e
topology: v6e:2x2x1
jax: 0.10.0
libtpu: 0.0.40
codegen_flags: <defaults>
</compile_context>

<pallas_src>
import functools

import jax
import jax.numpy as jnp
from jax import lax
from jax.experimental import pallas as pl
from jax.experimental.pallas import tpu as pltpu

LANE = 128


def _round_up(x, m):
    return (x + m - 1) // m * m


# ---------------------------------------------------------------------------
# Fused kernel: one grid step = one batch element, one band of TH output rows.
# ---------------------------------------------------------------------------
def _double_conv_kernel(x_hbm, w1_ref, s1_ref, w2_ref, s2_ref, o_ref,
                        xband_ref, mid_ref, acc2_ref, dma_sem,
                        *, K, P, TH, H, W, Wm, l1_taps):
    # x_hbm    : full input in HBM (ANY).  im2col path: (N, Hpad+2P, W, Cr)
    #                                      tap path   : (N, Hpad+4P, W+2P, Cin_p)
    # w1_ref   : (1,1,Cr,C1_p) or (K,K,Cin_p,C1_p)   bf16 (BN scale folded in)
    # s1_ref   : (1, C1_p) f32    w2_ref: (K,K,C1_p,C2_p) bf16   s2_ref: (1, C2_p) f32
    # o_ref    : (TH, W, C2_p) bf16 output row band
    # xband_ref: VMEM band of x (DMA target)
    # mid_ref  : (BR, Wm, C1_p) bf16 layer-1 activation band (width-padded)
    # acc2_ref : (TH*W, C2_p) f32 layer-2 accumulator
    n = pl.program_id(0)
    b = pl.program_id(1)
    BR = TH + 2 * P
    C1_p = w1_ref.shape[-1]
    C2_p = w2_ref.shape[-1]
    Cx = xband_ref.shape[-1]
    r0 = pl.multiple_of(b * TH, 8)          # TH is always a multiple of 8

    # ---- fetch this step's input row band (HBM -> VMEM) -------------------------------
    cp = pltpu.make_async_copy(x_hbm.at[n, pl.ds(r0, xband_ref.shape[0])],
                               xband_ref, dma_sem)
    cp.start()

    # Zero the layer-2 zero-padding border columns of the (uninitialized, persistent)
    # mid scratch while the DMA is in flight.  The interior is fully rewritten below.
    if P > 0:
        mid_ref[:, :P, :] = jnp.zeros((BR, P, C1_p), mid_ref.dtype)
    if Wm - (P + W) > 0:
        mid_ref[:, P + W:, :] = jnp.zeros((BR, Wm - (P + W), C1_p), mid_ref.dtype)

    cp.wait()

    # ---- layer 1: conv (+ folded BN) + shift + ReLU over the band (with row halo) -----
    if l1_taps:
        # Generic tap loop for large Cin (not exercised by the small-Cin test below).
        # TODO(synk): switch this value chain to an f32 accumulator ref if the
        #             large-Cin configuration ever becomes hot.
        acc1 = None
        for kh in range(K):
            for kw in range(K):
                xs = xband_ref[pl.ds(kh, BR), pl.ds(kw, W), :]
                d = jnp.dot(xs.reshape(BR * W, Cx), w1_ref[kh, kw],
                            preferred_element_type=jnp.float32)
                acc1 = d if acc1 is None else acc1 + d
    else:
        # im2col: the K*K*Cin taps are already folded into the lane dim -> one matmul.
        acc1 = jnp.dot(xband_ref[...].reshape(BR * W, Cx), w1_ref[0, 0],
                       preferred_element_type=jnp.float32)

    l1 = jnp.maximum(acc1 + s1_ref[...], 0.0).reshape(BR, W, C1_p)

    # Band rows outside the image are layer-2 spatial zero padding -> force exact zeros.
    row = b * TH - P + lax.broadcasted_iota(jnp.int32, (BR, 1, 1), 0)
    valid = jnp.logical_and(row >= 0, row < H)
    l1 = jnp.where(valid, l1, 0.0)

    mid_ref[:, P:P + W, :] = l1.astype(mid_ref.dtype)

    # ---- layer 2: conv + shift + ReLU -> output band -----------------------------------
    t = 0
    for kh in range(K):
        for kw in range(K):
            ms = mid_ref[pl.ds(kh, TH), pl.ds(kw, W), :]             # (TH, W, C1_p)
            d = jnp.dot(ms.reshape(TH * W, C1_p), w2_ref[kh, kw],
                        preferred_element_type=jnp.float32)
            if t == 0:
                acc2_ref[...] = d
            else:
                acc2_ref[...] += d
            t += 1
    out = jnp.maximum(acc2_ref[...] + s2_ref[...], 0.0)
    o_ref[...] = out.reshape(TH, W, C2_p).astype(o_ref.dtype)


# ---------------------------------------------------------------------------
# Wrapper: layout / padding glue + pallas_call.  NCHW in / NCHW out (bf16).
# ---------------------------------------------------------------------------
def double_conv_forward(x_nchw, params, *, kernel_size=3, padding=1, block_rows=32,
                        compute_dtype=jnp.bfloat16, out_dtype=jnp.bfloat16):
    """DoubleConv forward.  BatchNorm uses inference (running-stats) semantics,
    folded into the conv weights / per-channel shift.  Output is bf16 by default."""
    K, P = kernel_size, padding
    assert 2 * P == K - 1, "fused kernel assumes 'same' convs (2*padding == kernel_size-1)"

    N, Cin, H, W = x_nchw.shape
    w1, s1 = params[0]["w"], params[0]["shift"]
    w2, s2 = params[1]["w"], params[1]["shift"]
    C1, C2 = w1.shape[-1], w2.shape[-1]
    C1_p, C2_p = _round_up(C1, LANE), _round_up(C2, LANE)

    TH = min(_round_up(block_rows, 8), _round_up(H, 8))   # band of output rows
    Hpad = _round_up(H, TH)
    nb = Hpad // TH
    BR = TH + 2 * P                                        # layer-1 rows per band (halo)
    Wm = _round_up(W + 2 * P, 8)                           # sublane-aligned mid width

    x = jnp.transpose(x_nchw, (0, 2, 3, 1)).astype(compute_dtype)       # NCHW -> NHWC
    # TODO(synk): keep activations NHWC across chained DoubleConv blocks (UNet) so both
    #             wrapper transposes (and the extra HBM passes they cost) disappear.

    l1_taps = Cin > 32
    if l1_taps:
        Cin_p = _round_up(Cin, LANE)
        xk = jnp.pad(x, ((0, 0), (2 * P, (Hpad - H) + 2 * P), (P, P), (0, Cin_p - Cin)))
        w1_k = jnp.pad(w1, ((0, 0), (0, 0), (0, Cin_p - Cin), (0, C1_p - C1)))
        band_shape = (TH + 4 * P, W + 2 * P, Cin_p)
    else:
        # im2col for layer 1: fold (kh, kw, cin) into the contraction (lane) dim.
        Cr = _round_up(K * K * Cin, LANE)
        xp = jnp.pad(x, ((0, 0), (P, P), (P, P), (0, 0)))
        cols = [xp[:, kh:kh + H, kw:kw + W, :] for kh in range(K) for kw in range(K)]
        xk = jnp.concatenate(cols, axis=-1)                              # (N, H, W, K*K*Cin)
        xk = jnp.pad(xk, ((0, 0), (P, (Hpad - H) + P), (0, 0), (0, Cr - K * K * Cin)))
        w1_k = jnp.pad(w1.reshape(K * K * Cin, C1),
                       ((0, Cr - K * K * Cin), (0, C1_p - C1))).reshape(1, 1, Cr, C1_p)
        band_shape = (BR, W, Cr)

    xk = xk.astype(compute_dtype)
    w1_k = w1_k.astype(compute_dtype)
    w2_k = jnp.pad(w2, ((0, 0), (0, 0), (0, C1_p - C1), (0, C2_p - C2))).astype(compute_dtype)
    s1_k = jnp.pad(s1, (0, C1_p - C1)).reshape(1, C1_p).astype(jnp.float32)
    s2_k = jnp.pad(s2, (0, C2_p - C2)).reshape(1, C2_p).astype(jnp.float32)

    kernel = functools.partial(_double_conv_kernel, K=K, P=P, TH=TH, H=H, W=W, Wm=Wm,
                               l1_taps=l1_taps)

    # Generation-aware VMEM budget: ~75% of the reported capacity, capped at 100 MiB.
    try:
        vmem_cap = pltpu.get_tpu_info().vmem_capacity_bytes
    except Exception:
        vmem_cap = 64 << 20
    vmem_limit = int(max(32 << 20, min(vmem_cap * 3 // 4, 100 << 20)))

    kh1, kw1 = (K, K) if l1_taps else (1, 1)
    out = pl.pallas_call(
        kernel,
        out_shape=jax.ShapeDtypeStruct((N, Hpad, W, C2_p), out_dtype),
        grid=(N, nb),
        in_specs=[
            pl.BlockSpec(memory_space=pl.ANY),                         # x stays in HBM
            pl.BlockSpec((kh1, kw1) + tuple(w1_k.shape[2:]), lambda n, b: (0, 0, 0, 0)),
            pl.BlockSpec((1, C1_p), lambda n, b: (0, 0)),
            pl.BlockSpec((K, K, C1_p, C2_p), lambda n, b: (0, 0, 0, 0)),
            pl.BlockSpec((1, C2_p), lambda n, b: (0, 0)),
        ],
        out_specs=pl.BlockSpec((None, TH, W, C2_p), lambda n, b: (n, b, 0, 0)),
        scratch_shapes=[
            pltpu.VMEM(band_shape, compute_dtype),        # input row band (DMA target)
            pltpu.VMEM((BR, Wm, C1_p), compute_dtype),    # layer-1 activation band
            pltpu.VMEM((TH * W, C2_p), jnp.float32),      # layer-2 accumulator
            pltpu.SemaphoreType.DMA,
        ],
        compiler_params=pltpu.CompilerParams(
            dimension_semantics=("parallel", "parallel"),
            vmem_limit_bytes=vmem_limit),
        # TODO(synk): on v7x consider CORE_PARALLEL on the batch axis (or pl.core_map)
        #             so both TensorCores each take half the (n, b) bands.
    )(xk, w1_k, s1_k, w2_k, s2_k)

    out = out[:, :H, :, :C2]                               # drop row/channel padding
    return jnp.transpose(out, (0, 3, 1, 2))                # NHWC -> NCHW


# ---------------------------------------------------------------------------
# Parameter construction (mirrors nn.Conv2d + nn.BatchNorm2d in inference mode,
# with the BN scale folded into the conv weights at build time).
# ---------------------------------------------------------------------------
def make_layer_params(key, in_channels, out_channels, kernel_size, eps=1e-5):
    kw_, kb, kg, kbeta = jax.random.split(key, 4)
    w = 0.1 * jax.random.normal(kw_, (kernel_size, kernel_size, in_channels, out_channels),
                                jnp.float32)                          # HWIO
    b = 0.1 * jax.random.normal(kb, (out_channels,), jnp.float32)
    gamma = 1.0 + 0.1 * jax.random.normal(kg, (out_channels,), jnp.float32)
    beta = 0.1 * jax.random.normal(kbeta, (out_channels,), jnp.float32)
    running_mean = jnp.zeros((out_channels,), jnp.float32)            # BatchNorm2d defaults
    running_var = jnp.ones((out_channels,), jnp.float32)
    scale = gamma / jnp.sqrt(running_var + eps)
    return {"w": w * scale[None, None, None, :],                      # BN scale folded in
            "shift": beta + (b - running_mean) * scale}


# ---------------------------------------------------------------------------
# Pure-JAX reference with matching bf16-input / f32-accumulate quantization,
# used only to verify the Pallas kernel.
# ---------------------------------------------------------------------------
def _ref_layer(x_nhwc, w, shift, *, padding, compute_dtype):
    y = lax.conv_general_dilated(
        x_nhwc.astype(compute_dtype), w.astype(compute_dtype),
        window_strides=(1, 1),
        padding=((padding, padding), (padding, padding)),
        dimension_numbers=("NHWC", "HWIO", "NHWC"),
        preferred_element_type=jnp.float32)
    return jnp.maximum(y + shift, 0.0)


def _ref_double_conv(x_nchw, params, *, padding=1, compute_dtype=jnp.bfloat16):
    x = jnp.transpose(x_nchw, (0, 2, 3, 1))
    x = _ref_layer(x, params[0]["w"], params[0]["shift"],
                   padding=padding, compute_dtype=compute_dtype)
    x = x.astype(compute_dtype)            # kernel keeps the intermediate band in bf16
    x = _ref_layer(x, params[1]["w"], params[1]["shift"],
                   padding=padding, compute_dtype=compute_dtype)
    return jnp.transpose(x, (0, 3, 1, 2))


if __name__ == "__main__":
    in_channels, out_channels, kernel_size, padding = 4, 8, 3, 1
    N, H, W = 2, 16, 16

    key = jax.random.PRNGKey(0)
    kx, k1, k2 = jax.random.split(key, 3)

    x = jax.random.normal(kx, (N, in_channels, H, W), jnp.float32)    # NCHW like PyTorch
    params = [
        make_layer_params(k1, in_channels, out_channels, kernel_size),
        make_layer_params(k2, out_channels, out_channels, kernel_size),
    ]

    fwd = jax.jit(functools.partial(double_conv_forward,
                                    kernel_size=kernel_size, padding=padding))
    out = jax.block_until_ready(fwd(x, params))

    ref = _ref_double_conv(x, params, padding=padding)
    assert out.shape == (N, out_channels, H, W)
    assert jnp.allclose(out.astype(jnp.float32), ref, atol=2e-2, rtol=2e-2), \
        "Pallas output mismatch vs reference"

    print("KERNEL_OK")
</pallas_src>

<mosaic_0001>
module attributes {stable_mosaic.version = 11 : i64} {
  func.func @_double_conv_kernel(%arg0: i32, %arg1: i32, %arg2: memref<2x18x16x128xbf16, #tpu.memory_space<any>>, %arg3: memref<1x1x128x128xbf16, #tpu.memory_space<vmem>>, %arg4: memref<1x128xf32, #tpu.memory_space<vmem>>, %arg5: memref<3x3x128x128xbf16, #tpu.memory_space<vmem>>, %arg6: memref<1x128xf32, #tpu.memory_space<vmem>>, %arg7: memref<1x16x16x128xbf16, #tpu.memory_space<vmem>>, %arg8: memref<18x16x128xbf16, #tpu.memory_space<vmem>>, %arg9: memref<18x24x128xbf16, #tpu.memory_space<vmem>>, %arg10: memref<256x128xf32, #tpu.memory_space<vmem>>, %arg11: memref<!tpu.dma_semaphore, #tpu.memory_space<semaphore_mem>>) attributes {dimension_semantics = [#tpu.dimension_semantics<parallel>, #tpu.dimension_semantics<parallel>], iteration_bounds = array<i64: 2, 1>, scalar_prefetch = 0 : i64, scratch_operands = 4 : i64, tpu.core_type = #tpu.core_type<tc>, window_params = [{}, {pipeline_mode = #tpu.pipeline_mode<synchronous>, transform_indices = @transform_1, window_bounds = array<i64: 1, 1, 128, 128>}, {pipeline_mode = #tpu.pipeline_mode<synchronous>, transform_indices = @transform_2, window_bounds = array<i64: 1, 128>}, {pipeline_mode = #tpu.pipeline_mode<synchronous>, transform_indices = @transform_3, window_bounds = array<i64: 3, 3, 128, 128>}, {pipeline_mode = #tpu.pipeline_mode<synchronous>, transform_indices = @transform_4, window_bounds = array<i64: 1, 128>}, {transform_indices = @transform_5, window_bounds = array<i64: 1, 16, 16, 128>}]} {
    %c16_i32 = arith.constant 16 : i32
    %0 = arith.muli %arg1, %c16_i32 : i32
    %1 = tpu.assume_multiple %0, 8 : i32
    %c0_i32 = arith.constant 0 : i32
    %c0_i32_0 = arith.constant 0 : i32
    %2 = tpu.memref_slice %arg2[%arg0, %1, %c0_i32, %c0_i32_0] : memref<2x18x16x128xbf16, #tpu.memory_space<any>> -> memref<1x18x16x128xbf16, #tpu.memory_space<any>>
    %3 = tpu.memref_squeeze %2 : memref<1x18x16x128xbf16, #tpu.memory_space<any>> -> memref<18x16x128xbf16, #tpu.memory_space<any>>
    tpu.enqueue_dma source(%3 : memref<18x16x128xbf16, #tpu.memory_space<any>>) target(%arg8 : memref<18x16x128xbf16, #tpu.memory_space<vmem>>) target_semaphore(%arg11 : memref<!tpu.dma_semaphore, #tpu.memory_space<semaphore_mem>>)
    %cst = arith.constant 0.000000e+00 : bf16
    %4 = vector.broadcast %cst : bf16 to vector<18x1x128xbf16>
    %c0 = arith.constant 0 : index
    %c0_1 = arith.constant 0 : index
    %c0_2 = arith.constant 0 : index
    %5 = vector.load %arg9[%c0, %c0_1, %c0_2] : memref<18x24x128xbf16, #tpu.memory_space<vmem>>, vector<18x1x128xbf16>
    tpu.vector_store %arg9[%c0, %c0_1, %c0_2], %4 {strides = array<i32>} : memref<18x24x128xbf16, #tpu.memory_space<vmem>>, vector<18x1x128xbf16>,
    %cst_3 = arith.constant 0.000000e+00 : bf16
    %6 = vector.broadcast %cst_3 : bf16 to vector<18x7x128xbf16>
    %c0_4 = arith.constant 0 : index
    %c17 = arith.constant 17 : index
    %c0_5 = arith.constant 0 : index
    %7 = vector.load %arg9[%c0_4, %c17, %c0_5] : memref<18x24x128xbf16, #tpu.memory_space<vmem>>, vector<18x7x128xbf16>
    tpu.vector_store %arg9[%c0_4, %c17, %c0_5], %6 {strides = array<i32>} : memref<18x24x128xbf16, #tpu.memory_space<vmem>>, vector<18x7x128xbf16>,
    %c0_i32_6 = arith.constant 0 : i32
    %c0_i32_7 = arith.constant 0 : i32
    %8 = tpu.memref_slice %arg2[%arg0, %1, %c0_i32_6, %c0_i32_7] : memref<2x18x16x128xbf16, #tpu.memory_space<any>> -> memref<1x18x16x128xbf16, #tpu.memory_space<any>>
    %9 = tpu.memref_squeeze %8 : memref<1x18x16x128xbf16, #tpu.memory_space<any>> -> memref<18x16x128xbf16, #tpu.memory_space<any>>
    tpu.wait_dma2 semaphore(%arg11 : memref<!tpu.dma_semaphore, #tpu.memory_space<semaphore_mem>>) src(%9 : memref<18x16x128xbf16, #tpu.memory_space<any>>) dst(%arg8 : memref<18x16x128xbf16, #tpu.memory_space<vmem>>)
    %c0_8 = arith.constant 0 : index
    %c0_9 = arith.constant 0 : index
    %c0_10 = arith.constant 0 : index
    %10 = vector.load %arg8[%c0_8, %c0_9, %c0_10] : memref<18x16x128xbf16, #tpu.memory_space<vmem>>, vector<18x16x128xbf16>
    %11 = vector.shape_cast %10 : vector<18x16x128xbf16> to vector<288x128xbf16>
    %c0_11 = arith.constant 0 : index
    %c0_12 = arith.constant 0 : index
    %c0_13 = arith.constant 0 : index
    %c0_14 = arith.constant 0 : index
    %12 = vector.load %arg3[%c0_11, %c0_12, %c0_13, %c0_14] : memref<1x1x128x128xbf16, #tpu.memory_space<vmem>>, vector<1x1x128x128xbf16>
    %13 = vector.shape_cast %12 : vector<1x1x128x128xbf16> to vector<128x128xbf16>
    %cst_15 = arith.constant dense<0.000000e+00> : vector<288x128xf32>
    %14 = tpu.matmul %11, %13, %cst_15 {dimension_numbers = #tpu.dot_dimension_numbers<[1], [0], [0], [1], [0, 0, 1, 1], [], []>} : vector<288x128xbf16>, vector<128x128xbf16>, vector<288x128xf32> -> vector<288x128xf32>
    %c0_16 = arith.constant 0 : index
    %c0_17 = arith.constant 0 : index
    %15 = vector.load %arg4[%c0_16, %c0_17] : memref<1x128xf32, #tpu.memory_space<vmem>>, vector<1x128xf32>
    %16 = vector.broadcast %15 : vector<1x128xf32> to vector<288x128xf32>
    %17 = arith.addf %14, %16 : vector<288x128xf32>
    %cst_18 = arith.constant 0.000000e+00 : f32
    %18 = vector.broadcast %cst_18 : f32 to vector<288x128xf32>
    %19 = arith.maximumf %17, %18 : vector<288x128xf32>
    %20 = vector.shape_cast %19 : vector<288x128xf32> to vector<18x16x128xf32>
    %c16_i32_19 = arith.constant 16 : i32
    %21 = arith.muli %arg1, %c16_i32_19 : i32
    %c1_i32 = arith.constant 1 : i32
    %22 = arith.subi %21, %c1_i32 : i32
    %23 = tpu.iota {dimensions = array<i32: 0>} : vector<18x1x1xi32>
    %24 = vector.broadcast %22 : i32 to vector<18x1x1xi32>
    %25 = arith.addi %24, %23 : vector<18x1x1xi32>
    %c0_i32_20 = arith.constant 0 : i32
    %26 = vector.broadcast %c0_i32_20 : i32 to vector<18x1x1xi32>
    %27 = arith.cmpi sge, %25, %26 : vector<18x1x1xi32>
    %c16_i32_21 = arith.constant 16 : i32
    %28 = vector.broadcast %c16_i32_21 : i32 to vector<18x1x1xi32>
    %29 = arith.cmpi slt, %25, %28 : vector<18x1x1xi32>
    %30 = arith.andi %27, %29 : vector<18x1x1xi1>
    %cst_22 = arith.constant 0.000000e+00 : f32
    %31 = vector.shape_cast %30 : vector<18x1x1xi1> to vector<18x1x1xi1>
    %32 = vector.broadcast %31 : vector<18x1x1xi1> to vector<18x16x128xi1>
    %33 = vector.broadcast %cst_22 : f32 to vector<18x16x128xf32>
    %34 = arith.select %32, %20, %33 : vector<18x16x128xi1>, vector<18x16x128xf32>
    %35 = arith.truncf %34 : vector<18x16x128xf32> to vector<18x16x128xbf16>
    %c0_23 = arith.constant 0 : index
    %c1 = arith.constant 1 : index
    %c0_24 = arith.constant 0 : index
    %36 = vector.load %arg9[%c0_23, %c1, %c0_24] : memref<18x24x128xbf16, #tpu.memory_space<vmem>>, vector<18x16x128xbf16>
    tpu.vector_store %arg9[%c0_23, %c1, %c0_24], %35 {strides = array<i32>} : memref<18x24x128xbf16, #tpu.memory_space<vmem>>, vector<18x16x128xbf16>,
    %c0_25 = arith.constant 0 : index
    %c0_26 = arith.constant 0 : index
    %c0_27 = arith.constant 0 : index
    %37 = vector.load %arg9[%c0_25, %c0_26, %c0_27] : memref<18x24x128xbf16, #tpu.memory_space<vmem>>, vector<16x16x128xbf16>
    %38 = vector.shape_cast %37 : vector<16x16x128xbf16> to vector<256x128xbf16>
    %c0_28 = arith.constant 0 : index
    %c0_29 = arith.constant 0 : index
    %c0_30 = arith.constant 0 : index
    %c0_31 = arith.constant 0 : index
    %39 = vector.load %arg5[%c0_28, %c0_29, %c0_30, %c0_31] : memref<3x3x128x128xbf16, #tpu.memory_space<vmem>>, vector<1x1x128x128xbf16>
    %40 = vector.shape_cast %39 : vector<1x1x128x128xbf16> to vector<128x128xbf16>
    %cst_32 = arith.constant dense<0.000000e+00> : vector<256x128xf32>
    %41 = tpu.matmul %38, %40, %cst_32 {dimension_numbers = #tpu.dot_dimension_numbers<[1], [0], [0], [1], [0, 0, 1, 1], [], []>} : vector<256x128xbf16>, vector<128x128xbf16>, vector<256x128xf32> -> vector<256x128xf32>
    %c0_33 = arith.constant 0 : index
    %c0_34 = arith.constant 0 : index
    %42 = vector.load %arg10[%c0_33, %c0_34] : memref<256x128xf32, #tpu.memory_space<vmem>>, vector<256x128xf32>
    tpu.vector_store %arg10[%c0_33, %c0_34], %41 {strides = array<i32>} : memref<256x128xf32, #tpu.memory_space<vmem>>, vector<256x128xf32>,
    %c0_35 = arith.constant 0 : index
    %c1_36 = arith.constant 1 : index
    %c0_37 = arith.constant 0 : index
    %43 = vector.load %arg9[%c0_35, %c1_36, %c0_37] : memref<18x24x128xbf16, #tpu.memory_space<vmem>>, vector<16x16x128xbf16>
    %44 = vector.shape_cast %43 : vector<16x16x128xbf16> to vector<256x128xbf16>
    %c0_38 = arith.constant 0 : index
    %c1_39 = arith.constant 1 : index
    %c0_40 = arith.constant 0 : index
    %c0_41 = arith.constant 0 : index
    %45 = vector.load %arg5[%c0_38, %c1_39, %c0_40, %c0_41] : memref<3x3x128x128xbf16, #tpu.memory_space<vmem>>, vector<1x1x128x128xbf16>
    %46 = vector.shape_cast %45 : vector<1x1x128x128xbf16> to vector<128x128xbf16>
    %cst_42 = arith.constant dense<0.000000e+00> : vector<256x128xf32>
    %47 = tpu.matmul %44, %46, %cst_42 {dimension_numbers = #tpu.dot_dimension_numbers<[1], [0], [0], [1], [0, 0, 1, 1], [], []>} : vector<256x128xbf16>, vector<128x128xbf16>, vector<256x128xf32> -> vector<256x128xf32>
    %c0_43 = arith.constant 0 : index
    %c0_44 = arith.constant 0 : index
    %48 = vector.load %arg10[%c0_43, %c0_44] : memref<256x128xf32, #tpu.memory_space<vmem>>, vector<256x128xf32>
    %49 = arith.addf %48, %47 : vector<256x128xf32>
    %c0_45 = arith.constant 0 : index
    %c0_46 = arith.constant 0 : index
    %50 = vector.load %arg10[%c0_45, %c0_46] : memref<256x128xf32, #tpu.memory_space<vmem>>, vector<256x128xf32>
    tpu.vector_store %arg10[%c0_45, %c0_46], %49 {strides = array<i32>} : memref<256x128xf32, #tpu.memory_space<vmem>>, vector<256x128xf32>,
    %c0_47 = arith.constant 0 : index
    %c2 = arith.constant 2 : index
    %c0_48 = arith.constant 0 : index
    %51 = vector.load %arg9[%c0_47, %c2, %c0_48] : memref<18x24x128xbf16, #tpu.memory_space<vmem>>, vector<16x16x128xbf16>
    %52 = vector.shape_cast %51 : vector<16x16x128xbf16> to vector<256x128xbf16>
    %c0_49 = arith.constant 0 : index
    %c2_50 = arith.constant 2 : index
    %c0_51 = arith.constant 0 : index
    %c0_52 = arith.constant 0 : index
    %53 = vector.load %arg5[%c0_49, %c2_50, %c0_51, %c0_52] : memref<3x3x128x128xbf16, #tpu.memory_space<vmem>>, vector<1x1x128x128xbf16>
    %54 = vector.shape_cast %53 : vector<1x1x128x128xbf16> to vector<128x128xbf16>
    %cst_53 = arith.constant dense<0.000000e+00> : vector<256x128xf32>
    %55 = tpu.matmul %52, %54, %cst_53 {dimension_numbers = #tpu.dot_dimension_numbers<[1], [0], [0], [1], [0, 0, 1, 1], [], []>} : vector<256x128xbf16>, vector<128x128xbf16>, vector<256x128xf32> -> vector<256x128xf32>
    %c0_54 = arith.constant 0 : index
    %c0_55 = arith.constant 0 : index
    %56 = vector.load %arg10[%c0_54, %c0_55] : memref<256x128xf32, #tpu.memory_space<vmem>>, vector<256x128xf32>
    %57 = arith.addf %56, %55 : vector<256x128xf32>
    %c0_56 = arith.constant 0 : index
    %c0_57 = arith.constant 0 : index
    %58 = vector.load %arg10[%c0_56, %c0_57] : memref<256x128xf32, #tpu.memory_space<vmem>>, vector<256x128xf32>
    tpu.vector_store %arg10[%c0_56, %c0_57], %57 {strides = array<i32>} : memref<256x128xf32, #tpu.memory_space<vmem>>, vector<256x128xf32>,
    %c1_58 = arith.constant 1 : index
    %c0_59 = arith.constant 0 : index
    %c0_60 = arith.constant 0 : index
    %59 = vector.load %arg9[%c1_58, %c0_59, %c0_60] : memref<18x24x128xbf16, #tpu.memory_space<vmem>>, vector<16x16x128xbf16>
    %60 = vector.shape_cast %59 : vector<16x16x128xbf16> to vector<256x128xbf16>
    %c1_61 = arith.constant 1 : index
    %c0_62 = arith.constant 0 : index
    %c0_63 = arith.constant 0 : index
    %c0_64 = arith.constant 0 : index
    %61 = vector.load %arg5[%c1_61, %c0_62, %c0_63, %c0_64] : memref<3x3x128x128xbf16, #tpu.memory_space<vmem>>, vector<1x1x128x128xbf16>
    %62 = vector.shape_cast %61 : vector<1x1x128x128xbf16> to vector<128x128xbf16>
    %cst_65 = arith.constant dense<0.000000e+00> : vector<256x128xf32>
    %63 = tpu.matmul %60, %62, %cst_65 {dimension_numbers = #tpu.dot_dimension_numbers<[1], [0], [0], [1], [0, 0, 1, 1], [], []>} : vector<256x128xbf16>, vector<128x128xbf16>, vector<256x128xf32> -> vector<256x128xf32>
    %c0_66 = arith.constant 0 : index
    %c0_67 = arith.constant 0 : index
    %64 = vector.load %arg10[%c0_66, %c0_67] : memref<256x128xf32, #tpu.memory_space<vmem>>, vector<256x128xf32>
    %65 = arith.addf %64, %63 : vector<256x128xf32>
    %c0_68 = arith.constant 0 : index
    %c0_69 = arith.constant 0 : index
    %66 = vector.load %arg10[%c0_68, %c0_69] : memref<256x128xf32, #tpu.memory_space<vmem>>, vector<256x128xf32>
    tpu.vector_store %arg10[%c0_68, %c0_69], %65 {strides = array<i32>} : memref<256x128xf32, #tpu.memory_space<vmem>>, vector<256x128xf32>,
    %c1_70 = arith.constant 1 : index
    %c1_71 = arith.constant 1 : index
    %c0_72 = arith.constant 0 : index
    %67 = vector.load %arg9[%c1_70, %c1_71, %c0_72] : memref<18x24x128xbf16, #tpu.memory_space<vmem>>, vector<16x16x128xbf16>
    %68 = vector.shape_cast %67 : vector<16x16x128xbf16> to vector<256x128xbf16>
    %c1_73 = arith.constant 1 : index
    %c1_74 = arith.constant 1 : index
    %c0_75 = arith.constant 0 : index
    %c0_76 = arith.constant 0 : index
    %69 = vector.load %arg5[%c1_73, %c1_74, %c0_75, %c0_76] : memref<3x3x128x128xbf16, #tpu.memory_space<vmem>>, vector<1x1x128x128xbf16>
    %70 = vector.shape_cast %69 : vector<1x1x128x128xbf16> to vector<128x128xbf16>
    %cst_77 = arith.constant dense<0.000000e+00> : vector<256x128xf32>
    %71 = tpu.matmul %68, %70, %cst_77 {dimension_numbers = #tpu.dot_dimension_numbers<[1], [0], [0], [1], [0, 0, 1, 1], [], []>} : vector<256x128xbf16>, vector<128x128xbf16>, vector<256x128xf32> -> vector<256x128xf32>
    %c0_78 = arith.constant 0 : index
    %c0_79 = arith.constant 0 : index
    %72 = vector.load %arg10[%c0_78, %c0_79] : memref<256x128xf32, #tpu.memory_space<vmem>>, vector<256x128xf32>
    %73 = arith.addf %72, %71 : vector<256x128xf32>
    %c0_80 = arith.constant 0 : index
    %c0_81 = arith.constant 0 : index
    %74 = vector.load %arg10[%c0_80, %c0_81] : memref<256x128xf32, #tpu.memory_space<vmem>>, vector<256x128xf32>
    tpu.vector_store %arg10[%c0_80, %c0_81], %73 {strides = array<i32>} : memref<256x128xf32, #tpu.memory_space<vmem>>, vector<256x128xf32>,
    %c1_82 = arith.constant 1 : index
    %c2_83 = arith.constant 2 : index
    %c0_84 = arith.constant 0 : index
    %75 = vector.load %arg9[%c1_82, %c2_83, %c0_84] : memref<18x24x128xbf16, #tpu.memory_space<vmem>>, vector<16x16x128xbf16>
    %76 = vector.shape_cast %75 : vector<16x16x128xbf16> to vector<256x128xbf16>
    %c1_85 = arith.constant 1 : index
    %c2_86 = arith.constant 2 : index
    %c0_87 = arith.constant 0 : index
    %c0_88 = arith.constant 0 : index
    %77 = vector.load %arg5[%c1_85, %c2_86, %c0_87, %c0_88] : memref<3x3x128x128xbf16, #tpu.memory_space<vmem>>, vector<1x1x128x128xbf16>
    %78 = vector.shape_cast %77 : vector<1x1x128x128xbf16> to vector<128x128xbf16>
    %cst_89 = arith.constant dense<0.000000e+00> : vector<256x128xf32>
    %79 = tpu.matmul %76, %78, %cst_89 {dimension_numbers = #tpu.dot_dimension_numbers<[1], [0], [0], [1], [0, 0, 1, 1], [], []>} : vector<256x128xbf16>, vector<128x128xbf16>, vector<256x128xf32> -> vector<256x128xf32>
    %c0_90 = arith.constant 0 : index
    %c0_91 = arith.constant 0 : index
    %80 = vector.load %arg10[%c0_90, %c0_91] : memref<256x128xf32, #tpu.memory_space<vmem>>, vector<256x128xf32>
    %81 = arith.addf %80, %79 : vector<256x128xf32>
    %c0_92 = arith.constant 0 : index
    %c0_93 = arith.constant 0 : index
    %82 = vector.load %arg10[%c0_92, %c0_93] : memref<256x128xf32, #tpu.memory_space<vmem>>, vector<256x128xf32>
    tpu.vector_store %arg10[%c0_92, %c0_93], %81 {strides = array<i32>} : memref<256x128xf32, #tpu.memory_space<vmem>>, vector<256x128xf32>,
    %c2_94 = arith.constant 2 : index
    %c0_95 = arith.constant 0 : index
    %c0_96 = arith.constant 0 : index
    %83 = vector.load %arg9[%c2_94, %c0_95, %c0_96] : memref<18x24x128xbf16, #tpu.memory_space<vmem>>, vector<16x16x128xbf16>
    %84 = vector.shape_cast %83 : vector<16x16x128xbf16> to vector<256x128xbf16>
    %c2_97 = arith.constant 2 : index
    %c0_98 = arith.constant 0 : index
    %c0_99 = arith.constant 0 : index
    %c0_100 = arith.constant 0 : index
    %85 = vector.load %arg5[%c2_97, %c0_98, %c0_99, %c0_100] : memref<3x3x128x128xbf16, #tpu.memory_space<vmem>>, vector<1x1x128x128xbf16>
    %86 = vector.shape_cast %85 : vector<1x1x128x128xbf16> to vector<128x128xbf16>
    %cst_101 = arith.constant dense<0.000000e+00> : vector<256x128xf32>
    %87 = tpu.matmul %84, %86, %cst_101 {dimension_numbers = #tpu.dot_dimension_numbers<[1], [0], [0], [1], [0, 0, 1, 1], [], []>} : vector<256x128xbf16>, vector<128x128xbf16>, vector<256x128xf32> -> vector<256x128xf32>
    %c0_102 = arith.constant 0 : index
    %c0_103 = arith.constant 0 : index
    %88 = vector.load %arg10[%c0_102, %c0_103] : memref<256x128xf32, #tpu.memory_space<vmem>>, vector<256x128xf32>
    %89 = arith.addf %88, %87 : vector<256x128xf32>
    %c0_104 = arith.constant 0 : index
    %c0_105 = arith.constant 0 : index
    %90 = vector.load %arg10[%c0_104, %c0_105] : memref<256x128xf32, #tpu.memory_space<vmem>>, vector<256x128xf32>
    tpu.vector_store %arg10[%c0_104, %c0_105], %89 {strides = array<i32>} : memref<256x128xf32, #tpu.memory_space<vmem>>, vector<256x128xf32>,
    %c2_106 = arith.constant 2 : index
    %c1_107 = arith.constant 1 : index
    %c0_108 = arith.constant 0 : index
    %91 = vector.load %arg9[%c2_106, %c1_107, %c0_108] : memref<18x24x128xbf16, #tpu.memory_space<vmem>>, vector<16x16x128xbf16>
    %92 = vector.shape_cast %91 : vector<16x16x128xbf16> to vector<256x128xbf16>
    %c2_109 = arith.constant 2 : index
    %c1_110 = arith.constant 1 : index
    %c0_111 = arith.constant 0 : index
    %c0_112 = arith.constant 0 : index
    %93 = vector.load %arg5[%c2_109, %c1_110, %c0_111, %c0_112] : memref<3x3x128x128xbf16, #tpu.memory_space<vmem>>, vector<1x1x128x128xbf16>
    %94 = vector.shape_cast %93 : vector<1x1x128x128xbf16> to vector<128x128xbf16>
    %cst_113 = arith.constant dense<0.000000e+00> : vector<256x128xf32>
    %95 = tpu.matmul %92, %94, %cst_113 {dimension_numbers = #tpu.dot_dimension_numbers<[1], [0], [0], [1], [0, 0, 1, 1], [], []>} : vector<256x128xbf16>, vector<128x128xbf16>, vector<256x128xf32> -> vector<256x128xf32>
    %c0_114 = arith.constant 0 : index
    %c0_115 = arith.constant 0 : index
    %96 = vector.load %arg10[%c0_114, %c0_115] : memref<256x128xf32, #tpu.memory_space<vmem>>, vector<256x128xf32>
    %97 = arith.addf %96, %95 : vector<256x128xf32>
    %c0_116 = arith.constant 0 : index
    %c0_117 = arith.constant 0 : index
    %98 = vector.load %arg10[%c0_116, %c0_117] : memref<256x128xf32, #tpu.memory_space<vmem>>, vector<256x128xf32>
    tpu.vector_store %arg10[%c0_116, %c0_117], %97 {strides = array<i32>} : memref<256x128xf32, #tpu.memory_space<vmem>>, vector<256x128xf32>,
    %c2_118 = arith.constant 2 : index
    %c2_119 = arith.constant 2 : index
    %c0_120 = arith.constant 0 : index
    %99 = vector.load %arg9[%c2_118, %c2_119, %c0_120] : memref<18x24x128xbf16, #tpu.memory_space<vmem>>, vector<16x16x128xbf16>
    %100 = vector.shape_cast %99 : vector<16x16x128xbf16> to vector<256x128xbf16>
    %c2_121 = arith.constant 2 : index
    %c2_122 = arith.constant 2 : index
    %c0_123 = arith.constant 0 : index
    %c0_124 = arith.constant 0 : index
    %101 = vector.load %arg5[%c2_121, %c2_122, %c0_123, %c0_124] : memref<3x3x128x128xbf16, #tpu.memory_space<vmem>>, vector<1x1x128x128xbf16>
    %102 = vector.shape_cast %101 : vector<1x1x128x128xbf16> to vector<128x128xbf16>
    %cst_125 = arith.constant dense<0.000000e+00> : vector<256x128xf32>
    %103 = tpu.matmul %100, %102, %cst_125 {dimension_numbers = #tpu.dot_dimension_numbers<[1], [0], [0], [1], [0, 0, 1, 1], [], []>} : vector<256x128xbf16>, vector<128x128xbf16>, vector<256x128xf32> -> vector<256x128xf32>
    %c0_126 = arith.constant 0 : index
    %c0_127 = arith.constant 0 : index
    %104 = vector.load %arg10[%c0_126, %c0_127] : memref<256x128xf32, #tpu.memory_space<vmem>>, vector<256x128xf32>
    %105 = arith.addf %104, %103 : vector<256x128xf32>
    %c0_128 = arith.constant 0 : index
    %c0_129 = arith.constant 0 : index
    %106 = vector.load %arg10[%c0_128, %c0_129] : memref<256x128xf32, #tpu.memory_space<vmem>>, vector<256x128xf32>
    tpu.vector_store %arg10[%c0_128, %c0_129], %105 {strides = array<i32>} : memref<256x128xf32, #tpu.memory_space<vmem>>, vector<256x128xf32>,
    %c0_130 = arith.constant 0 : index
    %c0_131 = arith.constant 0 : index
    %107 = vector.load %arg10[%c0_130, %c0_131] : memref<256x128xf32, #tpu.memory_space<vmem>>, vector<256x128xf32>
    %c0_132 = arith.constant 0 : index
    %c0_133 = arith.constant 0 : index
    %108 = vector.load %arg6[%c0_132, %c0_133] : memref<1x128xf32, #tpu.memory_space<vmem>>, vector<1x128xf32>
    %109 = vector.broadcast %108 : vector<1x128xf32> to vector<256x128xf32>
    %110 = arith.addf %107, %109 : vector<256x128xf32>
    %cst_134 = arith.constant 0.000000e+00 : f32
    %111 = vector.broadcast %cst_134 : f32 to vector<256x128xf32>
    %112 = arith.maximumf %110, %111 : vector<256x128xf32>
    %113 = vector.shape_cast %112 : vector<256x128xf32> to vector<16x16x128xf32>
    %114 = arith.truncf %113 : vector<16x16x128xf32> to vector<16x16x128xbf16>
    %c0_135 = arith.constant 0 : index
    %c0_136 = arith.constant 0 : index
    %c0_137 = arith.constant 0 : index
    %c0_138 = arith.constant 0 : index
    %115 = vector.load %arg7[%c0_135, %c0_136, %c0_137, %c0_138] : memref<1x16x16x128xbf16, #tpu.memory_space<vmem>>, vector<1x16x16x128xbf16>
    %116 = vector.shape_cast %115 : vector<1x16x16x128xbf16> to vector<16x16x128xbf16>
    %117 = vector.shape_cast %114 : vector<16x16x128xbf16> to vector<1x16x16x128xbf16>
    tpu.vector_store %arg7[%c0_135, %c0_136, %c0_137, %c0_138], %117 {strides = array<i32>} : memref<1x16x16x128xbf16, #tpu.memory_space<vmem>>, vector<1x16x16x128xbf16>,
    return
  }
  func.func @transform_1(%arg0: i32, %arg1: i32) -> (i32, i32, i32, i32) {
    %c0_i32 = arith.constant 0 : i32
    %c0_i32_0 = arith.constant 0 : i32
    %c0_i32_1 = arith.constant 0 : i32
    %c0_i32_2 = arith.constant 0 : i32
    %c0_i32_3 = arith.constant 0 : i32
    return %c0_i32, %c0_i32_0, %c0_i32_1, %c0_i32_2 : i32, i32, i32, i32
  }
  func.func @transform_2(%arg0: i32, %arg1: i32) -> (i32, i32) {
    %c0_i32 = arith.constant 0 : i32
    %c0_i32_0 = arith.constant 0 : i32
    %c0_i32_1 = arith.constant 0 : i32
    return %c0_i32, %c0_i32_0 : i32, i32
  }
  func.func @transform_3(%arg0: i32, %arg1: i32) -> (i32, i32, i32, i32) {
    %c0_i32 = arith.constant 0 : i32
    %c0_i32_0 = arith.constant 0 : i32
    %c0_i32_1 = arith.constant 0 : i32
    %c0_i32_2 = arith.constant 0 : i32
    %c0_i32_3 = arith.constant 0 : i32
    return %c0_i32, %c0_i32_0, %c0_i32_1, %c0_i32_2 : i32, i32, i32, i32
  }
  func.func @transform_4(%arg0: i32, %arg1: i32) -> (i32, i32) {
    %c0_i32 = arith.constant 0 : i32
    %c0_i32_0 = arith.constant 0 : i32
    %c0_i32_1 = arith.constant 0 : i32
    return %c0_i32, %c0_i32_0 : i32, i32
  }
  func.func @transform_5(%arg0: i32, %arg1: i32) -> (i32, i32, i32, i32) {
    %c0_i32 = arith.constant 0 : i32
    %c0_i32_0 = arith.constant 0 : i32
    %c0_i32_1 = arith.constant 0 : i32
    return %arg0, %arg1, %c0_i32, %c0_i32_0 : i32, i32, i32, i32
  }
}

</mosaic_0001>

<bundles_post_ra>
// kernel: double_conv_forward.1
= control target key start
LH: loop header
LB: loop body
LE: loop exit
PB: predicated region body
PF: predicated region fallthrough
CT: control target
= control target key end

     0   :  { %s9078_s18 = smov 0   ;;  %s9080_s19 = smov 0   ;;  %s11422_s0 = inlined_call_operand.vmem [shape: bf16[2,18,16,128], index: 0, kind: input, shape index: {}]   ;;  %s11423_s1 = inlined_call_operand.vmem [shape: bf16[1,1,128,128], index: 1, kind: input, shape index: {}]   ;;  %s11424_s2 = inlined_call_operand.vmem [shape: f32[1,128], index: 2, kind: input, shape index: {}]   ;;  %s11425_s3 = inlined_call_operand.vmem [shape: bf16[3,3,128,128], index: 3, kind: input, shape index: {}]   ;;  %s11426_s4 = inlined_call_operand.vmem [shape: f32[1,128], index: 4, kind: input, shape index: {}]   ;;  %s11427_s5 = inlined_call_operand.vmem [shape: bf16[2,16,16,128], index: 5, kind: output, shape index: {}]  }
   0x1   :  { %s9082_s20 = smov 0  }
   0x2 LB: > { %s27_s21 = sadd.s32 1, %s9041_s19  ;;  %p7465_p0 = scmp.ge.s32.totalorder %s9045_s20, 1  ;;  %s9045_s20 = sphi %s9082_s20, %s15_s20   ;;  %s9041_s19 = sphi %s9080_s19, %s11713_s19   ;;  %s9037_s18 = sphi %s9078_s18, %s11712_s18  }
   0x3   : > { %p29_p1 = scmp.ge.s32.totalorder %s27_s21, 2  ;;  %p167_p2 = scmp.lt.s32.totalorder %s9045_s20, 3 }
   0x5   : > { %s11715_s21 = smov (%p29_p1, %s27_s21), 0  ;;  %p168_p3 = pnand %p7465_p0, %p167_p2 }
   0x7   : > { %171 = sbr.rel (%p168_p3) target bundleno = 935 (0x3a7), region = 36 }
   0xc   : > { %p194_p4 = scmp.lt.s32.totalorder %s9037_s18, 1  ;;  %s7961_s22 = smul.u32 144, %s9037_s18 }
   0xe   : > { %s11717_s18 = smov (!%p194_p4, %s9037_s18), 1  ;;  %s9099_s25 = scalar_lea.vmem %s11422_s0, %s7961_s22 }
   0xf   : > { %s7960_s26 = sshll.u32 %s11717_s18, 7  ;;  %v244_v0 = vld [vmem:[%s9099_s25] sm:$0xff]  ;;  %v246_v1 = vld [vmem:[%s9099_s25 + $0x8] sm:$0xff]  ;;  %v248_v2 = vld [vmem:[%s9099_s25 + $0x10] sm:$0xff] }
  0x10   : > { %s9107_s29 = scalar_lea.vmem %s11427_s5, %s7960_s26  ;;  %245 = vst [vmem:[#allocation2] sm:$0xff] %v244_v0  ;;  %247 = vst [vmem:[#allocation2 + $0x8] sm:$0xff] %v246_v1  ;;  %v250_v3 = vld [vmem:[%s9099_s25 + $0x18] sm:$0xff]  ;;  %v252_v4 = vld [vmem:[%s9099_s25 + $0x20] sm:$0xff] }
  0x11   : > { %249 = vst [vmem:[#allocation2 + $0x10] sm:$0xff] %v248_v2  ;;  %v254_v5 = vld [vmem:[%s9099_s25 + $0x28] sm:$0xff]  ;;  %251 = vst [vmem:[#allocation2 + $0x18] sm:$0xff] %v250_v3  ;;  %v256_v6 = vld [vmem:[%s9099_s25 + $0x30] sm:$0xff] }
  0x12   : > { %253 = vst [vmem:[#allocation2 + $0x20] sm:$0xff] %v252_v4  ;;  %255 = vst [vmem:[#allocation2 + $0x28] sm:$0xff] %v254_v5  ;;  %v258_v7 = vld [vmem:[%s9099_s25 + $0x38] sm:$0xff]  ;;  %v260_v8 = vld [vmem:[%s9099_s25 + $0x40] sm:$0xff] }
  0x13   : > { %257 = vst [vmem:[#allocation2 + $0x30] sm:$0xff] %v256_v6  ;;  %259 = vst [vmem:[#allocation2 + $0x38] sm:$0xff] %v258_v7  ;;  %v262_v9 = vld [vmem:[%s9099_s25 + $0x48] sm:$0xff]  ;;  %v264_v10 = vld [vmem:[%s9099_s25 + $0x50] sm:$0xff] }
  0x14   : > { %261 = vst [vmem:[#allocation2 + $0x40] sm:$0xff] %v260_v8  ;;  %v266_v11 = vld [vmem:[%s9099_s25 + $0x58] sm:$0xff]  ;;  %263 = vst [vmem:[#allocation2 + $0x48] sm:$0xff] %v262_v9  ;;  %v268_v12 = vld [vmem:[%s9099_s25 + $0x60] sm:$0xff] }
  0x15   : > { %265 = vst [vmem:[#allocation2 + $0x50] sm:$0xff] %v264_v10  ;;  %267 = vst [vmem:[#allocation2 + $0x58] sm:$0xff] %v266_v11  ;;  %v270_v13 = vld [vmem:[%s9099_s25 + $0x68] sm:$0xff]  ;;  %v272_v14 = vld [vmem:[%s9099_s25 + $0x70] sm:$0xff] }
  0x16   : > { %269 = vst [vmem:[#allocation2 + $0x60] sm:$0xff] %v268_v12  ;;  %271 = vst [vmem:[#allocation2 + $0x68] sm:$0xff] %v270_v13  ;;  %v274_v15 = vld [vmem:[%s9099_s25 + $0x78] sm:$0xff]  ;;  %v276_v16 = vld [vmem:[%s9099_s25 + $0x80] sm:$0xff] }
  0x17   : > { %273 = vst [vmem:[#allocation2 + $0x70] sm:$0xff] %v272_v14  ;;  %v278_v17 = vld [vmem:[%s9099_s25 + $0x88] sm:$0xff]  ;;  %275 = vst [vmem:[#allocation2 + $0x78] sm:$0xff] %v274_v15 }
  0x18   : > { %277 = vst [vmem:[#allocation2 + $0x80] sm:$0xff] %v276_v16  ;;  %279 = vst [vmem:[#allocation2 + $0x88] sm:$0xff] %v278_v17 }
  0x19   : > { %287 = vsyncadd [#allocation5], 2304  ;;  %vm288_vm0 = vcmask 1040384   ;;  %vm289_vm1 = vsmask.f32 256  ;;  %vm345_vm2 = vcmask 1043456  }
  0x1a   : > { %vm9125_vm3 = vmand %vm288_vm0, %vm289_vm1  ;;  %v291_v19 = vld [vmem:[#allocation3] sm:$0x1]  ;;  %v294_v20 = vld [vmem:[#allocation3 + $0xc] sm:$0x1]  ;;  %vm346_vm4 = vsmask.f32 7938 }
  0x1b   : > { %v292_v21 = vsel %vm9125_vm3, 0, %v291_v19  ;;  %v295_v22 = vsel %vm9125_vm3, 0, %v294_v20  ;;  %v297_v23 = vld [vmem:[#allocation3 + $0x18] sm:$0x1]  ;;  %v300_v24 = vld [vmem:[#allocation3 + $0x24] sm:$0x1]  ;;  %vm9159_vm5 = vmand %vm345_vm2, %vm346_vm4 }
  0x1c   : > { %293 = vst [vmem:[#allocation3] sm:$0x1] %v292_v21  ;;  %296 = vst [vmem:[#allocation3 + $0xc] sm:$0x1] %v295_v22  ;;  %v298_v25 = vsel %vm9125_vm3, 0, %v297_v23  ;;  %v301_v26 = vsel %vm9125_vm3, 0, %v300_v24 }
  0x1d   : > { %v303_v27 = vld [vmem:[#allocation3 + $0x30] sm:$0x1]  ;;  %v306_v28 = vld [vmem:[#allocation3 + $0x3c] sm:$0x1]  ;;  %299 = vst [vmem:[#allocation3 + $0x18] sm:$0x1] %v298_v25 }
  0x1e   : > { %302 = vst [vmem:[#allocation3 + $0x24] sm:$0x1] %v301_v26  ;;  %v304_v29 = vsel %vm9125_vm3, 0, %v303_v27  ;;  %v307_v30 = vsel %vm9125_vm3, 0, %v306_v28  ;;  %v309_v31 = vld [vmem:[#allocation3 + $0x48] sm:$0x1] }
  0x1f   : > { %v312_v32 = vld [vmem:[#allocation3 + $0x54] sm:$0x1]  ;;  %305 = vst [vmem:[#allocation3 + $0x30] sm:$0x1] %v304_v29  ;;  %308 = vst [vmem:[#allocation3 + $0x3c] sm:$0x1] %v307_v30 }
  0x20   : > { %v310_v33 = vsel %vm9125_vm3, 0, %v309_v31  ;;  %v313_v34 = vsel %vm9125_vm3, 0, %v312_v32  ;;  %v315_v35 = vld [vmem:[#allocation3 + $0x60] sm:$0x1]  ;;  %v318_v36 = vld [vmem:[#allocation3 + $0x6c] sm:$0x1] }
  0x21   : > { %311 = vst [vmem:[#allocation3 + $0x48] sm:$0x1] %v310_v33  ;;  %314 = vst [vmem:[#allocation3 + $0x54] sm:$0x1] %v313_v34  ;;  %v316_v37 = vsel %vm9125_vm3, 0, %v315_v35  ;;  %v319_v38 = vsel %vm9125_vm3, 0, %v318_v36 }
  0x22   : > { %v321_v39 = vld [vmem:[#allocation3 + $0x78] sm:$0x1]  ;;  %v324_v40 = vld [vmem:[#allocation3 + $0x84] sm:$0x1]  ;;  %317 = vst [vmem:[#allocation3 + $0x60] sm:$0x1] %v316_v37 }
  0x23   : > { %320 = vst [vmem:[#allocation3 + $0x6c] sm:$0x1] %v319_v38  ;;  %v322_v41 = vsel %vm9125_vm3, 0, %v321_v39  ;;  %v325_v42 = vsel %vm9125_vm3, 0, %v324_v40  ;;  %v327_v43 = vld [vmem:[#allocation3 + $0x90] sm:$0x1] }
  0x24   : > { %v330_v44 = vld [vmem:[#allocation3 + $0x9c] sm:$0x1]  ;;  %323 = vst [vmem:[#allocation3 + $0x78] sm:$0x1] %v322_v41  ;;  %326 = vst [vmem:[#allocation3 + $0x84] sm:$0x1] %v325_v42 }
  0x25   : > { %v328_v45 = vsel %vm9125_vm3, 0, %v327_v43  ;;  %v331_v46 = vsel %vm9125_vm3, 0, %v330_v44  ;;  %v333_v47 = vld [vmem:[#allocation3 + $0xa8] sm:$0x1]  ;;  %v336_v48 = vld [vmem:[#allocation3 + $0xb4] sm:$0x1] }
  0x26   : > { %329 = vst [vmem:[#allocation3 + $0x90] sm:$0x1] %v328_v45  ;;  %332 = vst [vmem:[#allocation3 + $0x9c] sm:$0x1] %v331_v46  ;;  %v334_v50 = vsel %vm9125_vm3, 0, %v333_v47  ;;  %v337_v51 = vsel %vm9125_vm3, 0, %v336_v48 }
  0x27   : > { %v339_v52 = vld [vmem:[#allocation3 + $0xc0] sm:$0x1]  ;;  %v342_v53 = vld [vmem:[#allocation3 + $0xcc] sm:$0x1]  ;;  %335 = vst [vmem:[#allocation3 + $0xa8] sm:$0x1] %v334_v50 }
  0x28   : > { %338 = vst [vmem:[#allocation3 + $0xb4] sm:$0x1] %v337_v51  ;;  %v340_v54 = vsel %vm9125_vm3, 0, %v339_v52  ;;  %v343_v55 = vsel %vm9125_vm3, 0, %v342_v53  ;;  %v348_v56 = vld [vmem:[#allocation3 + $0x8] sm:$0xf] }
  0x29   : > { %v351_v57 = vld [vmem:[#allocation3 + $0x14] sm:$0xf]  ;;  %341 = vst [vmem:[#allocation3 + $0xc0] sm:$0x1] %v340_v54  ;;  %344 = vst [vmem:[#allocation3 + $0xcc] sm:$0x1] %v343_v55 }
  0x2a   : > { %v349_v58 = vsel %vm9159_vm5, 0, %v348_v56  ;;  %v352_v59 = vsel %vm9159_vm5, 0, %v351_v57  ;;  %v354_v60 = vld [vmem:[#allocation3 + $0x20] sm:$0xf]  ;;  %v357_v61 = vld [vmem:[#allocation3 + $0x2c] sm:$0xf] }
  0x2b   : > { %350 = vst [vmem:[#allocation3 + $0x8] sm:$0xf] %v349_v58  ;;  %353 = vst [vmem:[#allocation3 + $0x14] sm:$0xf] %v352_v59  ;;  %v355_v62 = vsel %vm9159_vm5, 0, %v354_v60  ;;  %v358_v63 = vsel %vm9159_vm5, 0, %v357_v61 }
  0x2c   : > { %v360_v0 = vld [vmem:[#allocation3 + $0x38] sm:$0xf]  ;;  %v363_v1 = vld [vmem:[#allocation3 + $0x44] sm:$0xf]  ;;  %356 = vst [vmem:[#allocation3 + $0x20] sm:$0xf] %v355_v62 }
  0x2d   : > { %359 = vst [vmem:[#allocation3 + $0x2c] sm:$0xf] %v358_v63  ;;  %v361_v2 = vsel %vm9159_vm5, 0, %v360_v0  ;;  %v364_v3 = vsel %vm9159_vm5, 0, %v363_v1  ;;  %v366_v4 = vld [vmem:[#allocation3 + $0x50] sm:$0xf] }
  0x2e   : > { %v369_v5 = vld [vmem:[#allocation3 + $0x5c] sm:$0xf]  ;;  %362 = vst [vmem:[#allocation3 + $0x38] sm:$0xf] %v361_v2  ;;  %365 = vst [vmem:[#allocation3 + $0x44] sm:$0xf] %v364_v3 }
  0x2f   : > { %v367_v6 = vsel %vm9159_vm5, 0, %v366_v4  ;;  %v370_v7 = vsel %vm9159_vm5, 0, %v369_v5  ;;  %v372_v8 = vld [vmem:[#allocation3 + $0x68] sm:$0xf]  ;;  %v375_v9 = vld [vmem:[#allocation3 + $0x74] sm:$0xf] }
  0x30   : > { %368 = vst [vmem:[#allocation3 + $0x50] sm:$0xf] %v367_v6  ;;  %371 = vst [vmem:[#allocation3 + $0x5c] sm:$0xf] %v370_v7  ;;  %v373_v10 = vsel %vm9159_vm5, 0, %v372_v8  ;;  %v376_v11 = vsel %vm9159_vm5, 0, %v375_v9 }
  0x31   : > { %v378_v12 = vld [vmem:[#allocation3 + $0x80] sm:$0xf]  ;;  %v381_v13 = vld [vmem:[#allocation3 + $0x8c] sm:$0xf]  ;;  %374 = vst [vmem:[#allocation3 + $0x68] sm:$0xf] %v373_v10 }
  0x32   : > { %377 = vst [vmem:[#allocation3 + $0x74] sm:$0xf] %v376_v11  ;;  %v379_v14 = vsel %vm9159_vm5, 0, %v378_v12  ;;  %v382_v15 = vsel %vm9159_vm5, 0, %v381_v13  ;;  %v384_v16 = vld [vmem:[#allocation3 + $0x98] sm:$0xf] }
  0x33   : > { %v387_v17 = vld [vmem:[#allocation3 + $0xa4] sm:$0xf]  ;;  %380 = vst [vmem:[#allocation3 + $0x80] sm:$0xf] %v379_v14  ;;  %383 = vst [vmem:[#allocation3 + $0x8c] sm:$0xf] %v382_v15 }
  0x34   : > { %v385_v19 = vsel %vm9159_vm5, 0, %v384_v16  ;;  %v388_v20 = vsel %vm9159_vm5, 0, %v387_v17  ;;  %v390_v21 = vld [vmem:[#allocation3 + $0xb0] sm:$0xf]  ;;  %v393_v22 = vld [vmem:[#allocation3 + $0xbc] sm:$0xf] }
  0x35   : > { %386 = vst [vmem:[#allocation3 + $0x98] sm:$0xf] %v385_v19  ;;  %389 = vst [vmem:[#allocation3 + $0xa4] sm:$0xf] %v388_v20  ;;  %v391_v23 = vsel %vm9159_vm5, 0, %v390_v21  ;;  %v394_v24 = vsel %vm9159_vm5, 0, %v393_v22 }
  0x36   : > { %v396_v25 = vld [vmem:[#allocation3 + $0xc8] sm:$0xf]  ;;  %v399_v26 = vld [vmem:[#allocation3 + $0xd4] sm:$0xf]  ;;  %392 = vst [vmem:[#allocation3 + $0xb0] sm:$0xf] %v391_v23 }
  0x37   : > { %395 = vst [vmem:[#allocation3 + $0xbc] sm:$0xf] %v394_v24  ;;  %v397_v27 = vsel %vm9159_vm5, 0, %v396_v25  ;;  %v400_v28 = vsel %vm9159_vm5, 0, %v399_v26 }
  0x38   : > { %398 = vst [vmem:[#allocation3 + $0xc8] sm:$0xf] %v397_v27  ;;  %401 = vst [vmem:[#allocation3 + $0xd4] sm:$0xf] %v400_v28 }
  0x39   : > { %9033 = dma.done.wait [#allocation5], 2304 }
  0x3a   : > { %9034 = vsyncadd [#allocation5], 4294964992  ;;  %v8872_v29 = vld [vmem:[%s11423_s1 + $0x38] sm:$0xff]   ;;  %v8873_v30 = vld [vmem:[%s11423_s1 + $0x30] sm:$0xff]   ;;  %v9047_v1 = vmov 0.0|0.0   ;;  %vm2878_vm8 = vcmask 1042432  }
  0x3b   : > { %8363 = vmatprep.subr.bf16.mxu0 %v8872_v29  ;;  %v8874_v31 = vld [vmem:[%s11423_s1 + $0x28] sm:$0xff]   ;;  %v8875_v32 = vld [vmem:[%s11423_s1 + $0x20] sm:$0xff]   ;;  %v8876_v34 = vld [vmem:[%s11423_s1 + $0x18] sm:$0xff]   ;;  %v7496_v2 = vcombine.low %v9047_v1, %v9047_v1  ;;  %v7497_v3 = vcombine.high %v9047_v1, %v9047_v1  ;;  %vm1088_vm6 = vsmask.f32 4368  ;;  %vm2879_vm9 = vcmask 1046532  }
  0x3c   : > { %8364 = vmatpush3.bf16.msra.mxu0 %v8872_v29  ;;  %v8880_v33 = vld [vmem:[#allocation2] sm:$0xff]   ;;  %v8877_v35 = vld [vmem:[%s11423_s1 + $0x10] sm:$0xff]   ;;  %v8878_v36 = vld [vmem:[%s11423_s1 + $0x8] sm:$0xff]   ;;  %vm2009_vm11 = vsmask.f32 3328 }
  0x3d   : > { %8365 = vmatprep.subr.bf16.mxu0 %v8873_v30  ;;  %8379 = vmatprep.mubr.bf16.mxu0 %v8880_v33  ;;  %v8879_v37 = vld [vmem:[%s11423_s1] sm:$0xff]   ;;  %v8898_v38 = vld [vmem:[%s11425_s3 + $0x38] sm:$0xff]   ;;  %v8881_v39 = vld [vmem:[#allocation2 + $0x8] sm:$0xff]   ;;  %v1091_v5 = vshrl.u32 %v7496_v2, 16  ;;  %v1099_v6 = vshrl.u32 %v7497_v3, 16  ;;  %v1094_v9 = vshll.u32 %v7496_v2, 16 }
  0x3e   : > { %8415 = vmatprep.subr.bf16.mxu1 %v8898_v38  ;;  %v8882_v40 = vld [vmem:[#allocation2 + $0x10] sm:$0xff]   ;;  %v8883_v41 = vld [vmem:[#allocation2 + $0x18] sm:$0xff]   ;;  %v8884_v42 = vld [vmem:[#allocation2 + $0x20] sm:$0xff]   ;;  %v1102_v11 = vshll.u32 %v7497_v3, 16  ;;  %vm2010_vm12 = vsmask.f32 7440 }
  0x3f   : > { %8416 = vmatpush3.bf16.msra.mxu1 %v8898_v38  ;;  %v8885_v43 = vld [vmem:[#allocation2 + $0x28] sm:$0xff]   ;;  %v8886_v44 = vld [vmem:[#allocation2 + $0x30] sm:$0xff]   ;;  %v8887_v45 = vld [vmem:[#allocation2 + $0x38] sm:$0xff]   ;;  %v1093_v8 = vrot.slane %v1091_v5, 7  ;;  %v1101_v10 = vrot.slane %v1099_v6, 7 }
  0x40   : > { %8366 = vmatpush3.bf16.msra.mxu0 %v8873_v30  ;;  %v8888_v46 = vld [vmem:[#allocation2 + $0x40] sm:$0xff]   ;;  %v8889_v47 = vld [vmem:[#allocation2 + $0x48] sm:$0xff]   ;;  %v8890_v48 = vld [vmem:[#allocation2 + $0x50] sm:$0xff]  }
  0x41   : > { %8367 = vmatprep.subr.bf16.mxu0 %v8874_v31  ;;  %v8891_v50 = vld [vmem:[#allocation2 + $0x58] sm:$0xff]   ;;  %v8892_v51 = vld [vmem:[#allocation2 + $0x60] sm:$0xff]   ;;  %v8893_v52 = vld [vmem:[#allocation2 + $0x68] sm:$0xff]   ;;  %v1096_v13 = vor.u32 %v1094_v9, %v1093_v8  ;;  %v1097_v14 = vrot.slane %v1093_v8, 4  ;;  %v1104_v15 = vor.u32 %v1102_v11, %v1101_v10  ;;  %v1106_v17 = vrot.slane %v1101_v10, 4 }
  0x42   : > { %v8894_v53 = vld [vmem:[#allocation2 + $0x70] sm:$0xff]   ;;  %v8895_v54 = vld [vmem:[#allocation2 + $0x78] sm:$0xff]   ;;  %v8896_v55 = vld [vmem:[#allocation2 + $0x80] sm:$0xff]  }
  0x43   : > { %v8897_v56 = vld [vmem:[#allocation2 + $0x88] sm:$0xff]   ;;  %v8899_v57 = vld [vmem:[%s11425_s3 + $0x30] sm:$0xff]   ;;  %v8900_v58 = vld [vmem:[%s11425_s3 + $0xb8] sm:$0xff]  }
  0x44   : > { %8368 = vmatpush3.bf16.msra.mxu0 %v8874_v31  ;;  %8417 = vmatprep.subr.bf16.mxu1 %v8899_v57  ;;  %v8901_v59 = vld [vmem:[%s11425_s3 + $0x28] sm:$0xff]   ;;  %v8902_v60 = vld [vmem:[%s11425_s3 + $0xb0] sm:$0xff]   ;;  %v8903_v61 = vld [vmem:[%s11425_s3 + $0x20] sm:$0xff]  }
  0x45   : > { %8369 = vmatprep.subr.bf16.mxu0 %v8875_v32  ;;  %8418 = vmatpush3.bf16.msra.mxu1 %v8899_v57  ;;  %v8904_v62 = vld [vmem:[%s11425_s3 + $0xa8] sm:$0xff]   ;;  %v8905_v63 = vld [vmem:[%s11425_s3 + $0x18] sm:$0xff]   ;;  %v8906_v0 = vld [vmem:[%s11425_s3 + $0xa0] sm:$0xff]  }
  0x46   : > { %8419 = vmatprep.subr.bf16.mxu1 %v8901_v59  ;;  %v8907_v4 = vld [vmem:[%s11425_s3 + $0x10] sm:$0xff]   ;;  %v8908_v7 = vld [vmem:[%s11425_s3 + $0x98] sm:$0xff]   ;;  %vm9265_vm7 = vmor %vm289_vm1, %vm1088_vm6 }
  0x47   : > { %v1450_v16 = vld [vmem:[#allocation3] sm:$0xf]  ;;  %v8909_v20 = vld [vmem:[%s11425_s3 + $0x8] sm:$0xff]   ;;  %v1105_v21 = vsel %vm9265_vm7, %v1097_v14, %v1104_v15  ;;  %v1454_v22 = vld [vmem:[#allocation3 + $0x8] sm:$0x1] }
  0x48   : > { %8370 = vmatpush3.bf16.msra.mxu0 %v8875_v32  ;;  %v1451_v19 = vsel %vm9159_vm5, %v1096_v13, %v1450_v16  ;;  %1453 = vst [vmem:[#allocation3 + $0x4] sm:$0xf] %v1105_v21  ;;  %1572 = vst [vmem:[#allocation3 + $0xd0] sm:$0xf] %v1105_v21  ;;  %v1455_v23 = vsel %vm9125_vm3, %v1106_v17, %v1454_v22  ;;  %v8910_v24 = vld [vmem:[%s11425_s3 + $0x90] sm:$0xff]   ;;  %v8911_v25 = vld [vmem:[%s11425_s3] sm:$0xff]  }
  0x49   : > { %8371 = vmatprep.subr.bf16.mxu0 %v8876_v34  ;;  %8420 = vmatpush3.bf16.msra.mxu1 %v8901_v59  ;;  %1452 = vst [vmem:[#allocation3] sm:$0xf] %v1451_v19  ;;  %1456 = vst [vmem:[#allocation3 + $0x8] sm:$0x1] %v1455_v23  ;;  %v8912_v26 = vld [vmem:[%s11425_s3 + $0x88] sm:$0xff]   ;;  %v8915_v31 = vld [vmem:[%s11425_s3 + $0x80] sm:$0xff]  }
  0x4a   : > { %8421 = vmatprep.subr.bf16.mxu1 %v8903_v61  ;;  %vm9290_vm10 = vmor %vm2878_vm8, %vm2879_vm9 }
  0x4b   : > { %vm9322_vm13 = vmor %vm2009_vm11, %vm2010_vm12 }
  0x4c   : > { %8372 = vmatpush3.bf16.msra.mxu0 %v8876_v34 }
  0x4d   : > { %8373 = vmatprep.subr.bf16.mxu0 %v8877_v35  ;;  %8422 = vmatpush3.bf16.msra.mxu1 %v8903_v61 }
  0x4e   : > { %8423 = vmatprep.subr.bf16.mxu1 %v8905_v63 }
  0x4f   : > { %v2783_v28 = vld [vmem:[#allocation3 + $0x4] sm:$0xf] }
  0x50   : > { %8374 = vmatpush3.bf16.msra.mxu0 %v8877_v35  ;;  %v8913_v27 = vld [vmem:[#allocation3] sm:$0xff]   ;;  %v2784_v30 = vld [vmem:[#allocation3 + $0x8] sm:$0x1]  ;;  %v2883_v34 = vrot.slane %v2783_v28, 5 }
  0x51   : > { %8375 = vmatprep.subr.bf16.mxu0 %v8878_v36  ;;  %8424 = vmatpush3.bf16.msra.mxu1 %v8905_v63  ;;  %v2782_v29 = vld [vmem:[#allocation3] sm:$0xe]  ;;  %v2886_v35 = vrot.slane %v2784_v30, 5 }
  0x52   : > { %8425 = vmatprep.subr.bf16.mxu1 %v8907_v4  ;;  %8431 = vmatprep.mubr.bf16.mxu1 %v8913_v27  ;;  %v7596_v33 = vrot.slane %v2782_v29, 9 }
  0x54   : > { %8376 = vmatpush3.bf16.msra.mxu0 %v8878_v36  ;;  %v2884_v36 = vsel %vm9290_vm10, %v7596_v33, %v2883_v34 }
  0x55   : > { %8377 = vmatprep.subr.bf16.mxu0 %v8879_v37  ;;  %8426 = vmatpush3.bf16.msra.mxu1 %v8907_v4 }
  0x56   : > { %8427 = vmatprep.subr.bf16.mxu1 %v8909_v20 }
  0x58   : > { %8378 = vmatpush3.bf16.msra.mxu0 %v8879_v37  ;;  %v2885_v37 = vrot.slane %v2883_v34, 4  ;;  %v1461_v34 = vld [vmem:[#allocation3 + $0x14] sm:$0x1] }
  0x59   : > { %8511 = vmatprep.subr.bf16.mxu0 %v8900_v58  ;;  %8428 = vmatpush3.bf16.msra.mxu1 %v8909_v20 }
  0x5a   : > { %8429 = vmatprep.subr.bf16.mxu1 %v8911_v25  ;;  %v2887_v38 = vsel %vm9290_vm10, %v2885_v37, %v2886_v35 }
  0x5b   : > { %8380 = vmatmul.mubr.bf16.vlgmr.msra.gmra.mxu0 %v8881_v39  ;;  %v7628_v39 = vcombine.low %v2884_v36, %v2887_v38 }
  0x5c   : > { %8383 = vmatprep.mubr.bf16.mxu0 %v8882_v40  ;;  %8512 = vmatpush3.bf16.msra.mxu0 %v8900_v58  ;;  %v1569_v40 = vld [vmem:[#allocation3 + $0xcc] sm:$0xf] }
  0x5d   : > { %8513 = vmatprep.subr.bf16.mxu0 %v8902_v60  ;;  %8430 = vmatpush3.bf16.msra.mxu1 %v8911_v25 }
  0x60   : > { %8514 = vmatpush3.bf16.msra.mxu0 %v8902_v60 }
  0x61   : > { %8515 = vmatprep.subr.bf16.mxu0 %v8904_v62 }
  0x63   : > { %8384 = vmatmul.mubr.bf16.gmra.mxu0 %v8883_v41  ;;  %v1573_v41 = vld [vmem:[#allocation3 + $0xd4] sm:$0x1] }
  0x64   : > { %8387 = vmatprep.mubr.bf16.mxu0 %v8884_v42  ;;  %8516 = vmatpush3.bf16.msra.mxu0 %v8904_v62  ;;  %v1570_v42 = vsel %vm9159_vm5, %v1096_v13, %v1569_v40 }
  0x65   : > { %8517 = vmatprep.subr.bf16.mxu0 %v8906_v0  ;;  %1571 = vst [vmem:[#allocation3 + $0xcc] sm:$0xf] %v1570_v42 }
  0x68   : > { %8518 = vmatpush3.bf16.msra.mxu0 %v8906_v0 }
  0x69   : > { %8519 = vmatprep.subr.bf16.mxu0 %v8908_v7 }
  0x6b   : > { %8388 = vmatmul.mubr.bf16.gmra.mxu0 %v8885_v43  ;;  %v1574_v43 = vsel %vm9125_vm3, %v1106_v17, %v1573_v41  ;;  %v1457_v17 = vld [vmem:[#allocation3 + $0xc] sm:$0xf] }
  0x6c   : > { %8391 = vmatprep.mubr.bf16.mxu0 %v8886_v44  ;;  %8520 = vmatpush3.bf16.msra.mxu0 %v8908_v7  ;;  %1575 = vst [vmem:[#allocation3 + $0xd4] sm:$0x1] %v1574_v43  ;;  %v9305_v44 = vld [vmem:[%s11425_s3 + $0x78] sm:$0xff]  }
  0x6d   : > { %8521 = vmatprep.subr.bf16.mxu0 %v8910_v24  ;;  %8463 = vmatprep.subr.bf16.mxu1 %v9305_v44 }
  0x70   : > { %8522 = vmatpush3.bf16.msra.mxu0 %v8910_v24 }
  0x71   : > { %8523 = vmatprep.subr.bf16.mxu0 %v8912_v26 }
  0x73   : > { %8392 = vmatmul.mubr.bf16.gmra.mxu0 %v8887_v45  ;;  %v9311_v45 = vld [vmem:[%s11425_s3 + $0x138] sm:$0xff]  }
  0x74   : > { %8395 = vmatprep.mubr.bf16.mxu0 %v8888_v46  ;;  %8524 = vmatpush3.bf16.msra.mxu0 %v8912_v26  ;;  %v9317_v46 = vld [vmem:[%s11424_s2] ss:$0 sm:$0xff] }
  0x75   : > { %8525 = vmatprep.subr.bf16.mxu0 %v8915_v31 }
  0x78   : > { %8526 = vmatpush3.bf16.msra.mxu0 %v8915_v31 }
  0x79   : > { %8607 = vmatprep.subr.bf16.mxu0 %v9311_v45 }
  0x7b   : > { %8396 = vmatmul.mubr.bf16.gmra.mxu0 %v8889_v47  ;;  %v1961_v47 = vld [vmem:[#allocation3] sm:$0xf] }
  0x7c   : > { %8399 = vmatprep.mubr.bf16.mxu0 %v8890_v48  ;;  %v1962_v48 = vld [vmem:[#allocation3 + $0x4] sm:$0xf] }
  0x83   : > { %8400 = vmatmul.mubr.bf16.gmra.mxu0 %v8891_v50 }
  0x84   : > { %8403 = vmatprep.mubr.bf16.mxu0 %v8892_v51  ;;  %v2013_v51 = vshrl.u32 %v1961_v47, 16 }
  0x86   : > { %v2015_v58 = vrot.slane %v2013_v51, 4 }
  0x8b   : > { %8404 = vmatmul.mubr.bf16.gmra.mxu0 %v8893_v52  ;;  %v2016_v52 = vshll.u32 %v1961_v47, 16 }
  0x8c   : > { %8407 = vmatprep.mubr.bf16.mxu0 %v8894_v53  ;;  %v2022_v53 = vshll.u32 %v1962_v48, 16 }
  0x8d   : > { %v2018_v59 = vrot.slane %v2016_v52, 5 }
  0x8e   : > { %v2024_v60 = vrot.slane %v2022_v53, 5 }
  0x8f   : > { %v2019_v0 = vor.u32 %v2018_v59, %v2015_v58 }
  0x91   : > { %v2020_v9 = vrot.slane %v2019_v0, 4 }
  0x93   : > { %8408 = vmatmul.mubr.bf16.gmra.mxu0 %v8895_v54  ;;  %v2026_v54 = vshrl.u32 %v1962_v48, 16  ;;  %v2025_v26 = vsel %vm9322_vm13, %v2020_v9, %v2024_v60 }
  0x94   : > { %8411 = vmatprep.mubr.bf16.mxu0 %v8896_v55 }
  0x95   : > { %v2028_v61 = vrot.slane %v2026_v54, 4 }
  0x97   : > { %v2029_v1 = vor.u32 %v2028_v61, %v2024_v60  ;;  %v1471_v60 = vld [vmem:[#allocation3 + $0x24] sm:$0xf] }
  0x99   : > { %v2030_v10 = vrot.slane %v2029_v1, 4 }
  0x9b   : > { %8412 = vmatmul.mubr.bf16.gmra.mxu0 %v8897_v56  ;;  %v1963_v56 = vld [vmem:[#allocation3 + $0x8] sm:$0x1] }
  0x9c   : > { %8527 = vmatprep.mubr.bf16.mxu0 %v7628_v39  ;;  %v2032_v2 = vshll.u32 %v1963_v56, 16 }
  0x9e   : > { %v2034_v11 = vrot.slane %v2032_v2, 5 }
  0xa0   : > { %v2035_v27 = vsel %vm9322_vm13, %v2030_v10, %v2034_v11 }
 0x11b   : > { %v8381_v50 = vpop.f32.mrf.mxu0 }
 0x11c   : > { %v665_v55 = vadd.f32 %v8381_v50, %v9317_v46  ;;  %v9335_v50 = vcombine.low %v2025_v26, %v2035_v27 }
 0x11d   : > { %v656_v57 = vpop.f32.mrf.mxu0 }
 0x11e   : > { %v801_v62 = vmax.f32 %v665_v55, 0.0 }
 0x11f   : > { %v8382_v63 = vpop.f32.mrf.mxu0 }
 0x120   : > { %v7962_v3 = vpack.c.bf16 %v801_v62, %v801_v62  ;;  %v668_v4 = vadd.f32 %v8382_v63, %v9317_v46 }
 0x121   : > { %v659_v5 = vpop.f32.mrf.mxu0 }
 0x122   : > { %v1108_v6 = vshrl.u32 %v7962_v3, 16  ;;  %v802_v7 = vmax.f32 %v668_v4, 0.0  ;;  %v1111_v14 = vshll.u32 %v7962_v3, 16  ;;  %v1464_v4 = vld [vmem:[#allocation3 + $0x18] sm:$0xf] }
 0x123   : > { %v8385_v8 = vpop.f32.mrf.mxu0 }
 0x124   : > { %v1110_v13 = vrot.slane %v1108_v6, 7  ;;  %v7963_v15 = vpack.c.bf16 %v802_v7, %v802_v7  ;;  %v681_v16 = vadd.f32 %v8385_v8, %v9317_v46 }
 0x125   : > { %v672_v19 = vpop.f32.mrf.mxu0 }
 0x126   : > { %v1113_v20 = vor.u32 %v1111_v14, %v1110_v13  ;;  %v1116_v21 = vshrl.u32 %v7963_v15, 16  ;;  %v805_v23 = vmax.f32 %v681_v16, 0.0  ;;  %v673_v24 = vadd.f32 %v9317_v46, %v672_v19 }
 0x127   : > { %v8386_v25 = vpop.f32.mrf.mxu0  ;;  %v1119_v30 = vshll.u32 %v7963_v15, 16  ;;  %v1114_v33 = vrot.slane %v1110_v13, 4  ;;  %v1475_v15 = vld [vmem:[#allocation3 + $0x2c] sm:$0x1] }
 0x128   : > { %v1458_v28 = vsel %vm9159_vm5, %v1113_v20, %v1457_v17  ;;  %v1118_v29 = vrot.slane %v1116_v21, 7  ;;  %v684_v31 = vadd.f32 %v8386_v25, %v9317_v46  ;;  %v7966_v35 = vpack.c.bf16 %v805_v23, %v805_v23  ;;  %v1468_v25 = vld [vmem:[#allocation3 + $0x20] sm:$0x1] }
 0x129   : > { %1459 = vst [vmem:[#allocation3 + $0xc] sm:$0xf] %v1458_v28  ;;  %v803_v36 = vmax.f32 %v673_v24, 0.0  ;;  %v675_v37 = vpop.f32.mrf.mxu0 }
 0x12a   : > { %v1121_v38 = vor.u32 %v1119_v30, %v1118_v29  ;;  %v1123_v39 = vrot.slane %v1118_v29, 4  ;;  %v806_v40 = vmax.f32 %v684_v31, 0.0  ;;  %v676_v41 = vadd.f32 %v9317_v46, %v675_v37 }
 0x12b   : > { %v1142_v42 = vshrl.u32 %v7966_v35, 16  ;;  %v1145_v43 = vshll.u32 %v7966_v35, 16  ;;  %v7964_v47 = vpack.c.bf16 %v803_v36, %v803_v36  ;;  %v8389_v48 = vpop.f32.mrf.mxu0  ;;  %v8918_v36 = vld [vmem:[%s11425_s3 + $0x70] sm:$0xff]  }
 0x12c   : > { %v1122_v51 = vsel %vm9265_vm7, %v1114_v33, %v1121_v38  ;;  %v1462_v52 = vsel %vm9125_vm3, %v1123_v39, %v1461_v34  ;;  %v7967_v53 = vpack.c.bf16 %v806_v40, %v806_v40  ;;  %v804_v54 = vmax.f32 %v676_v41, 0.0 }
 0x12d   : > { %1460 = vst [vmem:[#allocation3 + $0x10] sm:$0xf] %v1122_v51  ;;  %1463 = vst [vmem:[#allocation3 + $0x14] sm:$0x1] %v1462_v52  ;;  %v1144_v55 = vrot.slane %v1142_v42, 7  ;;  %v1125_v56 = vshrl.u32 %v7964_v47, 16  ;;  %v697_v58 = vadd.f32 %v8389_v48, %v9317_v46  ;;  %v688_v59 = vpop.f32.mrf.mxu0 }
 0x12e   : > { %v1128_v57 = vshll.u32 %v7964_v47, 16  ;;  %v1150_v61 = vshrl.u32 %v7967_v53, 16  ;;  %v1153_v62 = vshll.u32 %v7967_v53, 16  ;;  %v7965_v63 = vpack.c.bf16 %v804_v54, %v804_v54  ;;  %v1485_v47 = vld [vmem:[#allocation3 + $0x3c] sm:$0xf] }
 0x12f   : > { %v689_v0 = vadd.f32 %v9317_v46, %v688_v59  ;;  %v1147_v1 = vor.u32 %v1145_v43, %v1144_v55  ;;  %v1148_v2 = vrot.slane %v1144_v55, 4  ;;  %v1127_v3 = vrot.slane %v1125_v56, 7  ;;  %v8390_v6 = vpop.f32.mrf.mxu0 }
 0x130   : > { %v809_v5 = vmax.f32 %v697_v58, 0.0  ;;  %v1152_v7 = vrot.slane %v1150_v61, 7  ;;  %v1133_v8 = vshrl.u32 %v7965_v63, 16  ;;  %v1136_v9 = vshll.u32 %v7965_v63, 16 }
 0x131   : > { %v807_v10 = vmax.f32 %v689_v0, 0.0  ;;  %v1472_v11 = vsel %vm9159_vm5, %v1147_v1, %v1471_v60  ;;  %v1130_v13 = vor.u32 %v1128_v57, %v1127_v3  ;;  %v1131_v14 = vrot.slane %v1127_v3, 4  ;;  %v691_v17 = vpop.f32.mrf.mxu0  ;;  %v1478_v57 = vld [vmem:[#allocation3 + $0x30] sm:$0xf] }
 0x132   : > { %v7970_v16 = vpack.c.bf16 %v809_v5, %v809_v5  ;;  %1473 = vst [vmem:[#allocation3 + $0x24] sm:$0xf] %v1472_v11  ;;  %v1155_v19 = vor.u32 %v1153_v62, %v1152_v7  ;;  %v1157_v20 = vrot.slane %v1152_v7, 4  ;;  %v1135_v21 = vrot.slane %v1133_v8, 7  ;;  %v8921_v62 = vld [vmem:[%s11425_s3 + $0x68] sm:$0xff]  }
 0x133   : > { %v7968_v23 = vpack.c.bf16 %v807_v10, %v807_v10  ;;  %v1465_v24 = vsel %vm9159_vm5, %v1130_v13, %v1464_v4  ;;  %v700_v28 = vadd.f32 %v8390_v6, %v9317_v46  ;;  %v8393_v29 = vpop.f32.mrf.mxu0  ;;  %v692_v48 = vadd.f32 %v9317_v46, %v691_v17  ;;  %v1489_v4 = vld [vmem:[#allocation3 + $0x44] sm:$0x1] }
 0x134   : > { %v1176_v26 = vshrl.u32 %v7970_v16, 16  ;;  %v1179_v27 = vshll.u32 %v7970_v16, 16  ;;  %1466 = vst [vmem:[#allocation3 + $0x18] sm:$0xf] %v1465_v24  ;;  %v1156_v30 = vsel %vm9265_vm7, %v1148_v2, %v1155_v19  ;;  %v1476_v31 = vsel %vm9125_vm3, %v1157_v20, %v1475_v15  ;;  %v8914_v35 = vld [vmem:[#allocation3 + $0xc] sm:$0xff]  }
 0x135   : > { %v1138_v33 = vor.u32 %v1136_v9, %v1135_v21  ;;  %v1140_v34 = vrot.slane %v1135_v21, 4  ;;  %1474 = vst [vmem:[#allocation3 + $0x28] sm:$0xf] %v1156_v30  ;;  %1477 = vst [vmem:[#allocation3 + $0x2c] sm:$0x1] %v1476_v31  ;;  %v1159_v38 = vshrl.u32 %v7968_v23, 16  ;;  %v704_v41 = vpop.f32.mrf.mxu0  ;;  %v713_v51 = vadd.f32 %v8393_v29, %v9317_v46  ;;  %8432 = vmatmul.mubr.bf16.vlgmr.msra.gmra.mxu1 %v8914_v35 }
 0x136   : > { %v9355_v37 = vrot.slane %v1176_v26, 7  ;;  %v1162_v39 = vshll.u32 %v7968_v23, 16  ;;  %v810_v40 = vmax.f32 %v700_v28, 0.0  ;;  %8464 = vmatpush3.bf16.msra.mxu1 %v9305_v44  ;;  %v808_v58 = vmax.f32 %v692_v48, 0.0  ;;  %v1482_v23 = vld [vmem:[#allocation3 + $0x38] sm:$0x1] }
 0x137   : > { %v1139_v42 = vsel %vm9265_vm7, %v1131_v14, %v1138_v33  ;;  %v1469_v43 = vsel %vm9125_vm3, %v1140_v34, %v1468_v25  ;;  %v9365_v54 = vrot.slane %v1159_v38, 7  ;;  %v8394_v56 = vpop.f32.mrf.mxu0  ;;  %v813_v59 = vmax.f32 %v713_v51, 0.0  ;;  %8465 = vmatprep.subr.bf16.mxu1 %v8918_v36  ;;  %v8924_v14 = vld [vmem:[%s11425_s3 + $0x60] sm:$0xff]   ;;  %v2785_v48 = vld [vmem:[#allocation3 + $0xc] sm:$0xe] }
 0x138   : > { %1467 = vst [vmem:[#allocation3 + $0x1c] sm:$0xf] %v1139_v42  ;;  %1470 = vst [vmem:[#allocation3 + $0x20] sm:$0x1] %v1469_v43  ;;  %v1181_v52 = vor.u32 %v1179_v27, %v9355_v37  ;;  %v1182_v53 = vrot.slane %v9355_v37, 4  ;;  %v7971_v55 = vpack.c.bf16 %v810_v40, %v810_v40  ;;  %v705_v60 = vadd.f32 %v9317_v46, %v704_v41  ;;  %v8927_v40 = vld [vmem:[%s11425_s3 + $0x58] sm:$0xff]  }
 0x139   : > { %v716_v61 = vadd.f32 %v8394_v56, %v9317_v46  ;;  %v1164_v0 = vor.u32 %v1162_v39, %v9365_v54  ;;  %v1165_v1 = vrot.slane %v9365_v54, 4  ;;  %v707_v2 = vpop.f32.mrf.mxu0  ;;  %v7969_v5 = vpack.c.bf16 %v808_v58, %v808_v58  ;;  %v1499_v35 = vld [vmem:[#allocation3 + $0x54] sm:$0xf]  ;;  %v2786_v51 = vld [vmem:[#allocation3 + $0x10] sm:$0xf] }
 0x13a   : > { %v1486_v63 = vsel %vm9159_vm5, %v1181_v52, %v1485_v47  ;;  %v1184_v44 = vshrl.u32 %v7971_v55, 16  ;;  %v1187_v3 = vshll.u32 %v7971_v55, 16  ;;  %v7974_v6 = vpack.c.bf16 %v813_v59, %v813_v59  ;;  %8466 = vmatpush3.bf16.msra.mxu1 %v8918_v36 }
 0x13b   : > { %1487 = vst [vmem:[#allocation3 + $0x3c] sm:$0xf] %v1486_v63  ;;  %v811_v7 = vmax.f32 %v705_v60, 0.0  ;;  %v1479_v8 = vsel %vm9159_vm5, %v1164_v0, %v1478_v57  ;;  %v814_v10 = vmax.f32 %v716_v61, 0.0  ;;  %v708_v11 = vadd.f32 %v9317_v46, %v707_v2  ;;  %v8397_v13 = vpop.f32.mrf.mxu0  ;;  %8467 = vmatprep.subr.bf16.mxu1 %v8921_v62  ;;  %v1492_v60 = vld [vmem:[#allocation3 + $0x48] sm:$0xf] }
 0x13c   : > { %v1186_v9 = vrot.slane %v1184_v44, 7  ;;  %1480 = vst [vmem:[#allocation3 + $0x30] sm:$0xf] %v1479_v8  ;;  %v1167_v15 = vshrl.u32 %v7969_v5, 16  ;;  %v1170_v16 = vshll.u32 %v7969_v5, 16  ;;  %v1210_v17 = vshrl.u32 %v7974_v6, 16 }
 0x13d   : > { %v1213_v19 = vshll.u32 %v7974_v6, 16  ;;  %v7972_v24 = vpack.c.bf16 %v811_v7, %v811_v7  ;;  %v7975_v25 = vpack.c.bf16 %v814_v10, %v814_v10  ;;  %v9383_v26 = vpop.f32.mrf.mxu0  ;;  %v812_v29 = vmax.f32 %v708_v11, 0.0  ;;  %v8919_v39 = vld [vmem:[#allocation3 + $0x24] sm:$0xff]  }
 0x13e   : > { %v1189_v20 = vor.u32 %v1187_v3, %v1186_v9  ;;  %v1191_v21 = vrot.slane %v1186_v9, 4  ;;  %v1169_v27 = vrot.slane %v1167_v15, 7  ;;  %v9385_v28 = vrot.slane %v1210_v17, 7  ;;  %8468 = vmatpush3.bf16.msra.mxu1 %v8921_v62  ;;  %v1503_v3 = vld [vmem:[#allocation3 + $0x5c] sm:$0x1]  ;;  %v8931_v7 = vld [vmem:[%s11425_s3 + $0x50] sm:$0xff]  }
 0x13f   : > { %v729_v30 = vadd.f32 %v8397_v13, %v9317_v46  ;;  %v8917_v31 = vld [vmem:[#allocation3 + $0x18] sm:$0xff]   ;;  %v1193_v36 = vshrl.u32 %v7972_v24, 16  ;;  %v1196_v37 = vshll.u32 %v7972_v24, 16  ;;  %v9392_v38 = vpop.f32.mrf.mxu0  ;;  %8469 = vmatprep.subr.bf16.mxu1 %v8924_v14  ;;  %v1221_v54 = vshll.u32 %v7975_v25, 16  ;;  %v2787_v13 = vld [vmem:[#allocation3 + $0x14] sm:$0x1] }
 0x140   : > { %v1190_v33 = vsel %vm9265_vm7, %v1182_v53, %v1189_v20  ;;  %v1490_v34 = vsel %vm9125_vm3, %v1191_v21, %v1489_v4  ;;  %v1172_v41 = vor.u32 %v1170_v16, %v1169_v27  ;;  %v1174_v42 = vrot.slane %v1169_v27, 4  ;;  %8435 = vmatprep.mubr.bf16.mxu1 %v8917_v31 }
 0x141   : > { %1488 = vst [vmem:[#allocation3 + $0x40] sm:$0xf] %v1190_v33  ;;  %1491 = vst [vmem:[#allocation3 + $0x44] sm:$0x1] %v1490_v34  ;;  %v1215_v43 = vor.u32 %v1213_v19, %v9385_v28  ;;  %v1216_v47 = vrot.slane %v9385_v28, 4  ;;  %v1195_v52 = vrot.slane %v1193_v36, 7  ;;  %v7973_v55 = vpack.c.bf16 %v812_v29, %v812_v29  ;;  %v723_v56 = vpop.f32.mrf.mxu0  ;;  %8436 = vmatmul.mubr.bf16.gmra.mxu1 %v8919_v39 }
 0x142   : > { %v1218_v53 = vshrl.u32 %v7975_v25, 16  ;;  %v1173_v57 = vsel %vm9265_vm7, %v1165_v1, %v1172_v41  ;;  %v1483_v58 = vsel %vm9125_vm3, %v1174_v42, %v1482_v23  ;;  %v817_v61 = vmax.f32 %v729_v30, 0.0  ;;  %8470 = vmatpush3.bf16.msra.mxu1 %v8924_v14  ;;  %v1496_v14 = vld [vmem:[#allocation3 + $0x50] sm:$0x1]  ;;  %v8936_v33 = vld [vmem:[%s11425_s3 + $0x48] sm:$0xff]  }
 0x143   : > { %v1500_v59 = vsel %vm9159_vm5, %v1215_v43, %v1499_v35  ;;  %1481 = vst [vmem:[#allocation3 + $0x34] sm:$0xf] %v1173_v57  ;;  %1484 = vst [vmem:[#allocation3 + $0x38] sm:$0x1] %v1483_v58  ;;  %v1198_v62 = vor.u32 %v1196_v37, %v1195_v52  ;;  %v1199_v63 = vrot.slane %v1195_v52, 4  ;;  %v1201_v44 = vshrl.u32 %v7973_v55, 16  ;;  %v8401_v2 = vpop.f32.mrf.mxu0  ;;  %8471 = vmatprep.subr.bf16.mxu1 %v8927_v40 }
 0x144   : > { %1501 = vst [vmem:[#allocation3 + $0x54] sm:$0xf] %v1500_v59  ;;  %v1220_v0 = vrot.slane %v1218_v53, 7  ;;  %v1204_v4 = vshll.u32 %v7973_v55, 16  ;;  %v7978_v1 = vpack.c.bf16 %v817_v61, %v817_v61  ;;  %v7597_v5 = vrot.slane %v2785_v48, 9 }
 0x145   : > { %v2890_v6 = vrot.slane %v2786_v51, 5  ;;  %v1493_v8 = vsel %vm9159_vm5, %v1198_v62, %v1492_v60  ;;  %v1203_v11 = vrot.slane %v1201_v44, 7  ;;  %v736_v15 = vpop.f32.mrf.mxu0  ;;  %v2893_v29 = vrot.slane %v2787_v13, 5  ;;  %v1513_v36 = vld [vmem:[#allocation3 + $0x6c] sm:$0xf]  ;;  %v8933_v51 = vld [vmem:[%s11425_s3 + $0x130] sm:$0xff]  }
 0x146   : > { %v1223_v9 = vor.u32 %v1221_v54, %v1220_v0  ;;  %v1225_v10 = vrot.slane %v1220_v0, 4  ;;  %1494 = vst [vmem:[#allocation3 + $0x48] sm:$0xf] %v1493_v8  ;;  %v1244_v16 = vshrl.u32 %v7978_v1, 16  ;;  %v1247_v17 = vshll.u32 %v7978_v1, 16  ;;  %8472 = vmatpush3.bf16.msra.mxu1 %v8927_v40  ;;  %v9459_v8 = vld [vmem:[%s11425_s3 + $0x128] sm:$0xff]  }
 0x147   : > { %v2891_v19 = vsel %vm9290_vm10, %v7597_v5, %v2890_v6  ;;  %v2892_v20 = vrot.slane %v2890_v6, 4  ;;  %v1206_v24 = vor.u32 %v1204_v4, %v1203_v11  ;;  %v1208_v25 = vrot.slane %v1203_v11, 4  ;;  %v9416_v27 = vpop.f32.mrf.mxu0  ;;  %8473 = vmatprep.subr.bf16.mxu1 %v8931_v7  ;;  %v2789_v40 = vld [vmem:[#allocation3 + $0x1c] sm:$0xf] }
 0x148   : > { %v1224_v21 = vsel %vm9265_vm7, %v1216_v47, %v1223_v9  ;;  %v1504_v23 = vsel %vm9125_vm3, %v1225_v10, %v1503_v3  ;;  %v9418_v28 = vrot.slane %v1244_v16, 7  ;;  %v721_v30 = vadd.f32 %v9317_v46, %v9383_v26  ;;  %v2788_v26 = vld [vmem:[#allocation3 + $0x18] sm:$0xe]  ;;  %v8922_v57 = vld [vmem:[#allocation3 + $0x3c] sm:$0xff]  }
 0x149   : > { %1502 = vst [vmem:[#allocation3 + $0x58] sm:$0xf] %v1224_v21  ;;  %1505 = vst [vmem:[#allocation3 + $0x5c] sm:$0x1] %v1504_v23  ;;  %v732_v31 = vadd.f32 %v9392_v38, %v9317_v46  ;;  %v1207_v34 = vsel %vm9265_vm7, %v1199_v63, %v1206_v24  ;;  %v1497_v35 = vsel %vm9125_vm3, %v1208_v25, %v1496_v14  ;;  %v9433_v41 = vpop.f32.mrf.mxu0  ;;  %v7598_v62 = vrot.slane %v2788_v26, 9  ;;  %v8941_v63 = vld [vmem:[%s11425_s3 + $0x40] sm:$0xff]  }
 0x14a   : > { %v724_v37 = vadd.f32 %v9317_v46, %v723_v56  ;;  %v745_v39 = vadd.f32 %v8401_v2, %v9317_v46  ;;  %1495 = vst [vmem:[#allocation3 + $0x4c] sm:$0xf] %v1207_v34  ;;  %1498 = vst [vmem:[#allocation3 + $0x50] sm:$0x1] %v1497_v35  ;;  %v1249_v38 = vor.u32 %v1247_v17, %v9418_v28  ;;  %v1250_v42 = vrot.slane %v9418_v28, 4  ;;  %v8920_v48 = vld [vmem:[#allocation3 + $0x30] sm:$0xff]  }
 0x14b   : > { %v2894_v43 = vsel %vm9290_vm10, %v2892_v20, %v2893_v29  ;;  %v815_v47 = vmax.f32 %v721_v30, 0.0  ;;  %v818_v53 = vmax.f32 %v732_v31, 0.0  ;;  %v9442_v56 = vld [vmem:[#allocation3 + $0x20] sm:$0x1]  ;;  %v9444_v58 = vpop.f32.mrf.mxu0  ;;  %8474 = vmatpush3.bf16.msra.mxu1 %v8931_v7  ;;  %v737_v61 = vadd.f32 %v9317_v46, %v736_v15  ;;  %8439 = vmatprep.mubr.bf16.mxu1 %v8920_v48  ;;  %v1517_v17 = vld [vmem:[#allocation3 + $0x74] sm:$0x1] }
 0x14c   : > { %v7629_v52 = vcombine.low %v2891_v19, %v2894_v43  ;;  %v816_v54 = vmax.f32 %v724_v37, 0.0  ;;  %v821_v55 = vmax.f32 %v745_v39, 0.0  ;;  %v1514_v59 = vsel %vm9159_vm5, %v1249_v38, %v1513_v36  ;;  %8475 = vmatprep.subr.bf16.mxu1 %v8936_v33  ;;  %8440 = vmatmul.mubr.bf16.gmra.mxu1 %v8922_v57  ;;  %v1506_v9 = vld [vmem:[#allocation3 + $0x60] sm:$0xf]  ;;  %v1510_v19 = vld [vmem:[#allocation3 + $0x68] sm:$0x1] }
 0x14d   : > { %v7976_v60 = vpack.c.bf16 %v815_v47, %v815_v47  ;;  %1515 = vst [vmem:[#allocation3 + $0x6c] sm:$0xf] %v1514_v59  ;;  %v7979_v0 = vpack.c.bf16 %v818_v53, %v818_v53  ;;  %v2897_v3 = vrot.slane %v2789_v40, 5  ;;  %v9452_v4 = vpop.f32.mrf.mxu0  ;;  %v819_v6 = vmax.f32 %v737_v61, 0.0  ;;  %v9472_v39 = vld [vmem:[%s11425_s3 + $0xf8] sm:$0xff]  }
 0x14e   : > { %8528 = vmatmul.mubr.bf16.vlgmr.msra.gmra.mxu0 %v7629_v52  ;;  %v7977_v44 = vpack.c.bf16 %v816_v54, %v816_v54  ;;  %v7982_v2 = vpack.c.bf16 %v821_v55, %v821_v55  ;;  %v2900_v7 = vrot.slane %v9442_v56, 5  ;;  %v2791_v47 = vld [vmem:[#allocation3 + $0x24] sm:$0xe]  ;;  %v2792_v59 = vld [vmem:[#allocation3 + $0x28] sm:$0xf] }
 0x14f   : > { %v1227_v1 = vshrl.u32 %v7976_v60, 16  ;;  %v1230_v5 = vshll.u32 %v7976_v60, 16  ;;  %8608 = vmatpush3.bf16.msra.mxu0 %v9311_v45  ;;  %v1252_v10 = vshrl.u32 %v7979_v0, 16  ;;  %v1255_v11 = vshll.u32 %v7979_v0, 16  ;;  %v9461_v14 = vpop.f32.mrf.mxu0  ;;  %8476 = vmatpush3.bf16.msra.mxu1 %v8936_v33  ;;  %v1527_v33 = vld [vmem:[#allocation3 + $0x84] sm:$0xf] }
 0x150   : > { %v1235_v13 = vshrl.u32 %v7977_v44, 16  ;;  %v1238_v15 = vshll.u32 %v7977_v44, 16  ;;  %8609 = vmatprep.subr.bf16.mxu0 %v8933_v51  ;;  %v1278_v20 = vshrl.u32 %v7982_v2, 16  ;;  %v1281_v21 = vshll.u32 %v7982_v2, 16  ;;  %8477 = vmatprep.subr.bf16.mxu1 %v8941_v63  ;;  %v8925_v48 = vld [vmem:[#allocation3 + $0x54] sm:$0xff]   ;;  %v8939_v56 = vld [vmem:[%s11425_s3 + $0x118] sm:$0xff]  }
 0x151   : > { %v1229_v16 = vrot.slane %v1227_v1, 7  ;;  %v7980_v45 = vpack.c.bf16 %v819_v6, %v819_v6  ;;  %v1254_v23 = vrot.slane %v1252_v10, 7  ;;  %v2898_v25 = vsel %vm9290_vm10, %v7598_v62, %v2897_v3  ;;  %v9465_v30 = vpop.f32.mrf.mxu0  ;;  %v8923_v31 = vld [vmem:[#allocation3 + $0x48] sm:$0xff]  }
 0x152   : > { %v1237_v24 = vrot.slane %v1235_v13, 7  ;;  %v2899_v29 = vrot.slane %v2897_v3, 4  ;;  %v9467_v36 = vrot.slane %v1278_v20, 7  ;;  %8443 = vmatprep.mubr.bf16.mxu1 %v8923_v31  ;;  %v2793_v44 = vld [vmem:[#allocation3 + $0x2c] sm:$0x1]  ;;  %v748_v6 = vadd.f32 %v9416_v27, %v9317_v46 }
 0x153   : > { %v1232_v34 = vor.u32 %v1230_v5, %v1229_v16  ;;  %v1233_v35 = vrot.slane %v1229_v16, 4  ;;  %v1261_v37 = vshrl.u32 %v7980_v45, 16  ;;  %8610 = vmatpush3.bf16.msra.mxu0 %v8933_v51  ;;  %v1257_v26 = vor.u32 %v1255_v11, %v1254_v23  ;;  %v9474_v52 = vpop.f32.mrf.mxu0  ;;  %v8938_v51 = vld [vmem:[%s11425_s3 + $0x120] sm:$0xff]   ;;  %8478 = vmatpush3.bf16.msra.mxu1 %v8941_v63  ;;  %v1520_v3 = vld [vmem:[#allocation3 + $0x78] sm:$0xf] }
 0x154   : > { %v1259_v40 = vrot.slane %v1254_v23, 4  ;;  %v1240_v38 = vor.u32 %v1238_v15, %v1237_v24  ;;  %v1242_v43 = vrot.slane %v1237_v24, 4  ;;  %8611 = vmatprep.subr.bf16.mxu0 %v9459_v8  ;;  %v1283_v54 = vor.u32 %v1281_v21, %v9467_v36  ;;  %8444 = vmatmul.mubr.bf16.gmra.mxu1 %v8925_v48  ;;  %v2794_v11 = vld [vmem:[#allocation3 + $0x30] sm:$0xe]  ;;  %v2795_v27 = vld [vmem:[#allocation3 + $0x34] sm:$0xf] }
 0x155   : > { %v1507_v53 = vsel %vm9159_vm5, %v1232_v34, %v1506_v9  ;;  %v1284_v55 = vrot.slane %v9467_v36, 4  ;;  %v9484_v57 = vrot.slane %v1261_v37, 7  ;;  %v1258_v60 = vsel %vm9265_vm7, %v1250_v42, %v1257_v26  ;;  %v9496_v2 = vpop.f32.mrf.mxu0  ;;  %8559 = vmatprep.subr.bf16.mxu1 %v9472_v39  ;;  %v3854_v49 = vld [vmem:[#allocation3 + $0x6c] sm:$0xf] }
 0x156   : > { %1508 = vst [vmem:[#allocation3 + $0x60] sm:$0xf] %v1507_v53  ;;  %v1518_v61 = vsel %vm9125_vm3, %v1259_v40, %v1517_v17  ;;  %v1241_v62 = vsel %vm9265_vm7, %v1233_v35, %v1240_v38  ;;  %v1511_v0 = vsel %vm9125_vm3, %v1242_v43, %v1510_v19  ;;  %1516 = vst [vmem:[#allocation3 + $0x70] sm:$0xf] %v1258_v60  ;;  %v1264_v42 = vshll.u32 %v7980_v45, 16  ;;  %v8943_v43 = vld [vmem:[%s11425_s3 + $0x110] sm:$0xff]  }
 0x157   : > { %1519 = vst [vmem:[#allocation3 + $0x74] sm:$0x1] %v1518_v61  ;;  %1509 = vst [vmem:[#allocation3 + $0x64] sm:$0xf] %v1241_v62  ;;  %v1528_v28 = vsel %vm9159_vm5, %v1283_v54, %v1527_v33  ;;  %v1267_v63 = vrot.slane %v9484_v57, 4  ;;  %v2901_v1 = vsel %vm9290_vm10, %v2899_v29, %v2900_v7  ;;  %8612 = vmatpush3.bf16.msra.mxu0 %v9459_v8  ;;  %v7599_v9 = vrot.slane %v2791_v47, 9  ;;  %v9509_v13 = vpop.f32.mrf.mxu0 }
 0x158   : > { %1512 = vst [vmem:[#allocation3 + $0x68] sm:$0x1] %v1511_v0  ;;  %1529 = vst [vmem:[#allocation3 + $0x84] sm:$0xf] %v1528_v28  ;;  %v7630_v5 = vcombine.low %v2898_v25, %v2901_v1  ;;  %v2904_v10 = vrot.slane %v2792_v59, 5  ;;  %8613 = vmatprep.subr.bf16.mxu0 %v8938_v51  ;;  %v1266_v7 = vor.u32 %v1264_v42, %v9484_v57  ;;  %v2907_v8 = vrot.slane %v2793_v44, 5 }
 0x159   : > { %v740_v15 = vadd.f32 %v9317_v46, %v9433_v41  ;;  %v761_v16 = vadd.f32 %v9444_v58, %v9317_v46  ;;  %v822_v17 = vmax.f32 %v748_v6, 0.0  ;;  %v753_v21 = vadd.f32 %v9317_v46, %v9452_v4  ;;  %v2796_v45 = vld [vmem:[#allocation3 + $0x38] sm:$0x1]  ;;  %v9523_v23 = vpop.f32.mrf.mxu0  ;;  %v9529_v38 = vld [vmem:[#allocation3 + $0x3c] sm:$0xe] }
 0x15a   : > { %8531 = vmatprep.mubr.bf16.mxu0 %v7630_v5  ;;  %v2905_v19 = vsel %vm9290_vm10, %v7599_v9, %v2904_v10  ;;  %v2906_v20 = vrot.slane %v2904_v10, 4  ;;  %v1521_v24 = vsel %vm9159_vm5, %v1266_v7, %v1520_v3  ;;  %v7600_v29 = vrot.slane %v2794_v11, 9  ;;  %v1531_v61 = vld [vmem:[#allocation3 + $0x8c] sm:$0x1]  ;;  %v1524_v3 = vld [vmem:[#allocation3 + $0x80] sm:$0x1] }
 0x15b   : > { %v820_v41 = vmax.f32 %v740_v15, 0.0  ;;  %v825_v25 = vmax.f32 %v761_v16, 0.0  ;;  %8614 = vmatpush3.bf16.msra.mxu0 %v8938_v51  ;;  %1522 = vst [vmem:[#allocation3 + $0x78] sm:$0xf] %v1521_v24  ;;  %v7983_v58 = vpack.c.bf16 %v822_v17, %v822_v17  ;;  %v823_v34 = vmax.f32 %v753_v21, 0.0  ;;  %v8413_v33 = vpop.f32.mrf.mxu0 }
 0x15c   : > { %v2908_v31 = vsel %vm9290_vm10, %v2906_v20, %v2907_v8  ;;  %v2911_v35 = vrot.slane %v2795_v27, 5  ;;  %8615 = vmatprep.subr.bf16.mxu0 %v8939_v56  ;;  %v2914_v40 = vrot.slane %v2796_v45, 5  ;;  %v1541_v1 = vld [vmem:[#allocation3 + $0x9c] sm:$0xf]  ;;  %v1534_v8 = vld [vmem:[#allocation3 + $0x90] sm:$0xf]  ;;  %v764_v15 = vadd.f32 %v9461_v14, %v9317_v46 }
 0x15d   : > { %v7631_v4 = vcombine.low %v2905_v19, %v2908_v31  ;;  %v7981_v37 = vpack.c.bf16 %v820_v41, %v820_v41  ;;  %v7986_v26 = vpack.c.bf16 %v825_v25, %v825_v25  ;;  %v1286_v47 = vshrl.u32 %v7983_v58, 16  ;;  %v8928_v59 = vld [vmem:[#allocation3 + $0x6c] sm:$0xff]   ;;  %v9536_v60 = vpop.f32.mrf.mxu0  ;;  %v8944_v27 = vld [vmem:[%s11425_s3 + $0x108] sm:$0xff]   ;;  %v2798_v21 = vld [vmem:[#allocation3 + $0x40] sm:$0xf] }
 0x15e   : > { %v1289_v48 = vshll.u32 %v7983_v58, 16  ;;  %v7984_v51 = vpack.c.bf16 %v823_v34, %v823_v34  ;;  %v2912_v53 = vsel %vm9290_vm10, %v7600_v29, %v2911_v35  ;;  %v8926_v54 = vld [vmem:[#allocation3 + $0x60] sm:$0xff]   ;;  %v2913_v9 = vrot.slane %v2911_v35, 4  ;;  %v2800_v35 = vld [vmem:[#allocation3 + $0x48] sm:$0xe] }
 0x15f   : > { %8532 = vmatmul.mubr.bf16.gmra.mxu0 %v7631_v4  ;;  %v1269_v62 = vshrl.u32 %v7981_v37, 16  ;;  %v1272_v0 = vshll.u32 %v7981_v37, 16  ;;  %v1312_v44 = vshrl.u32 %v7986_v26, 16  ;;  %v1315_v28 = vshll.u32 %v7986_v26, 16  ;;  %8447 = vmatprep.mubr.bf16.mxu1 %v8926_v54  ;;  %v8414_v10 = vpop.f32.mrf.mxu0  ;;  %v2799_v45 = vld [vmem:[#allocation3 + $0x44] sm:$0x1] }
 0x160   : > { %v1288_v42 = vrot.slane %v1286_v47, 7  ;;  %v1295_v5 = vshrl.u32 %v7984_v51, 16  ;;  %v1298_v6 = vshll.u32 %v7984_v51, 16  ;;  %8616 = vmatpush3.bf16.msra.mxu0 %v8939_v56  ;;  %v7601_v16 = vrot.slane %v9529_v38, 9  ;;  %8448 = vmatmul.mubr.bf16.gmra.mxu1 %v8928_v59  ;;  %v2801_v37 = vld [vmem:[#allocation3 + $0x4c] sm:$0xf] }
 0x161   : > { %v1271_v11 = vrot.slane %v1269_v62, 7  ;;  %v9538_v7 = vrot.slane %v1312_v44, 7  ;;  %8617 = vmatprep.subr.bf16.mxu0 %v8943_v43  ;;  %v2915_v56 = vsel %vm9290_vm10, %v2913_v9, %v2914_v40  ;;  %v8946_v26 = vld [vmem:[%s11425_s3 + $0x100] sm:$0xff]   ;;  %v2918_v40 = vrot.slane %v2798_v21, 5 }
 0x162   : > { %v1291_v17 = vor.u32 %v1289_v48, %v1288_v42  ;;  %v1293_v19 = vrot.slane %v1288_v42, 4  ;;  %v9546_v20 = vrot.slane %v1295_v5, 7  ;;  %v7632_v4 = vcombine.low %v2912_v53, %v2915_v56  ;;  %v1545_v5 = vld [vmem:[#allocation3 + $0xa4] sm:$0x1] }
 0x163   : > { %v1274_v24 = vor.u32 %v1272_v0, %v1271_v11  ;;  %v1276_v41 = vrot.slane %v1271_v11, 4  ;;  %v1317_v14 = vor.u32 %v1315_v28, %v9538_v7  ;;  %v1318_v25 = vrot.slane %v9538_v7, 4 }
 0x164   : > { %v1292_v29 = vsel %vm9265_vm7, %v1284_v55, %v1291_v17  ;;  %v1532_v58 = vsel %vm9125_vm3, %v1293_v19, %v1531_v61  ;;  %v1300_v31 = vor.u32 %v1298_v6, %v9546_v20  ;;  %v1301_v34 = vrot.slane %v9546_v20, 4  ;;  %8618 = vmatpush3.bf16.msra.mxu0 %v8943_v43  ;;  %v2802_v43 = vld [vmem:[#allocation3 + $0x50] sm:$0x1]  ;;  %8535 = vmatprep.mubr.bf16.mxu0 %v7632_v4  ;;  %v9597_v4 = vld [vmem:[%s11425_s3 + $0x1b8] sm:$0xff]  }
 0x165   : > { %1530 = vst [vmem:[#allocation3 + $0x88] sm:$0xf] %v1292_v29  ;;  %1533 = vst [vmem:[#allocation3 + $0x8c] sm:$0x1] %v1532_v58  ;;  %v1275_v33 = vsel %vm9265_vm7, %v1267_v63, %v1274_v24  ;;  %v1525_v36 = vsel %vm9125_vm3, %v1276_v41, %v1524_v3  ;;  %v1542_v55 = vsel %vm9159_vm5, %v1317_v14, %v1541_v1  ;;  %8619 = vmatprep.subr.bf16.mxu0 %v8944_v27  ;;  %v9581_v3 = vld [vmem:[#allocation3 + $0x54] sm:$0xe] }
 0x166   : > { %1523 = vst [vmem:[#allocation3 + $0x7c] sm:$0xf] %v1275_v33  ;;  %1526 = vst [vmem:[#allocation3 + $0x80] sm:$0x1] %v1525_v36  ;;  %v1535_v57 = vsel %vm9159_vm5, %v1300_v31, %v1534_v8  ;;  %v826_v63 = vmax.f32 %v764_v15, 0.0  ;;  %v2921_v38 = vrot.slane %v2799_v45, 5  ;;  %v756_v47 = vadd.f32 %v9317_v46, %v9465_v30 }
 0x167   : > { %1543 = vst [vmem:[#allocation3 + $0x9c] sm:$0xf] %v1542_v55  ;;  %1536 = vst [vmem:[#allocation3 + $0x90] sm:$0xf] %v1535_v57  ;;  %v777_v48 = vadd.f32 %v9474_v52, %v9317_v46  ;;  %v769_v51 = vadd.f32 %v9317_v46, %v9496_v2  ;;  %v7602_v53 = vrot.slane %v2800_v35, 9  ;;  %v2919_v59 = vsel %vm9290_vm10, %v7601_v16, %v2918_v40 }
 0x168   : > { %v7987_v54 = vpack.c.bf16 %v826_v63, %v826_v63  ;;  %v2920_v61 = vrot.slane %v2918_v40, 4  ;;  %v2925_v62 = vrot.slane %v2801_v37, 5  ;;  %8620 = vmatpush3.bf16.msra.mxu0 %v8944_v27  ;;  %v824_v0 = vmax.f32 %v756_v47, 0.0  ;;  %v1538_v41 = vld [vmem:[#allocation3 + $0x98] sm:$0x1] }
 0x169   : > { %v829_v44 = vmax.f32 %v777_v48, 0.0  ;;  %v827_v28 = vmax.f32 %v769_v51, 0.0  ;;  %v2928_v42 = vrot.slane %v2802_v43, 5  ;;  %8621 = vmatprep.subr.bf16.mxu0 %v8946_v26  ;;  %v780_v16 = vadd.f32 %v9509_v13, %v9317_v46  ;;  %v1555_v14 = vld [vmem:[#allocation3 + $0xb4] sm:$0xf] }
 0x16a   : > { %v1320_v30 = vshrl.u32 %v7987_v54, 16  ;;  %v1323_v52 = vshll.u32 %v7987_v54, 16  ;;  %v2922_v2 = vsel %vm9290_vm10, %v2920_v61, %v2921_v38  ;;  %v2926_v1 = vsel %vm9290_vm10, %v7602_v53, %v2925_v62  ;;  %v2804_v31 = vld [vmem:[#allocation3 + $0x58] sm:$0xf]  ;;  %v1548_v63 = vld [vmem:[#allocation3 + $0xa8] sm:$0xf] }
 0x16b   : > { %v7633_v6 = vcombine.low %v2919_v59, %v2922_v2  ;;  %v7985_v9 = vpack.c.bf16 %v824_v0, %v824_v0  ;;  %v7990_v10 = vpack.c.bf16 %v829_v44, %v829_v44  ;;  %v7988_v11 = vpack.c.bf16 %v827_v28, %v827_v28  ;;  %v2805_v38 = vld [vmem:[#allocation3 + $0x5c] sm:$0x1]  ;;  %v2809_v51 = vld [vmem:[#allocation3 + $0x6c] sm:$0xe]  ;;  %v2806_v61 = vld [vmem:[#allocation3 + $0x60] sm:$0xe] }
 0x16c   : > { %v1322_v8 = vrot.slane %v1320_v30, 7  ;;  %v2927_v15 = vrot.slane %v2925_v62, 4  ;;  %v7603_v27 = vrot.slane %v9581_v3, 9  ;;  %8622 = vmatpush3.bf16.msra.mxu0 %v8946_v26  ;;  %v830_v13 = vmax.f32 %v780_v16, 0.0  ;;  %v8932_v55 = vld [vmem:[#allocation3 + $0x84] sm:$0xff]  }
 0x16d   : > { %8536 = vmatmul.mubr.bf16.gmra.mxu0 %v7633_v6  ;;  %v1303_v17 = vshrl.u32 %v7985_v9, 16  ;;  %v1306_v19 = vshll.u32 %v7985_v9, 16  ;;  %v1346_v56 = vshrl.u32 %v7990_v10, 16  ;;  %v1349_v21 = vshll.u32 %v7990_v10, 16  ;;  %v8930_v35 = vld [vmem:[#allocation3 + $0x78] sm:$0xff]   ;;  %8703 = vmatprep.subr.bf16.mxu0 %v9597_v4 }
 0x16e   : > { %v1325_v45 = vor.u32 %v1323_v52, %v1322_v8  ;;  %v1327_v24 = vrot.slane %v1322_v8, 4  ;;  %v1329_v29 = vshrl.u32 %v7988_v11, 16  ;;  %v1332_v58 = vshll.u32 %v7988_v11, 16  ;;  %8451 = vmatprep.mubr.bf16.mxu1 %v8930_v35  ;;  %v2807_v62 = vld [vmem:[#allocation3 + $0x64] sm:$0xf] }
 0x16f   : > { %v1305_v33 = vrot.slane %v1303_v17, 7  ;;  %v9590_v36 = vrot.slane %v1346_v56, 7  ;;  %v2929_v46 = vsel %vm9290_vm10, %v2927_v15, %v2928_v42  ;;  %8452 = vmatmul.mubr.bf16.gmra.mxu1 %v8932_v55  ;;  %v7991_v54 = vpack.c.bf16 %v830_v13, %v830_v13  ;;  %v2808_v3 = vld [vmem:[#allocation3 + $0x68] sm:$0x1]  ;;  %v2810_v30 = vld [vmem:[#allocation3 + $0x70] sm:$0xf] }
 0x170   : > { %v1326_v37 = vsel %vm9265_vm7, %v1318_v25, %v1325_v45  ;;  %v1546_v26 = vsel %vm9125_vm3, %v1327_v24, %v1545_v5  ;;  %v9605_v57 = vrot.slane %v1329_v29, 7  ;;  %v7634_v40 = vcombine.low %v2926_v1, %v2929_v46  ;;  %v1559_v1 = vld [vmem:[#allocation3 + $0xbc] sm:$0x1]  ;;  %v9627_v6 = vld [vmem:[%s11424_s2] ss:$0 sm:$0xff] }
 0x171   : > { %1544 = vst [vmem:[#allocation3 + $0xa0] sm:$0xf] %v1326_v37  ;;  %1547 = vst [vmem:[#allocation3 + $0xa4] sm:$0x1] %v1546_v26  ;;  %v1308_v43 = vor.u32 %v1306_v19, %v1305_v33  ;;  %v1310_v47 = vrot.slane %v1305_v33, 4  ;;  %v1351_v48 = vor.u32 %v1349_v21, %v9590_v36  ;;  %v1352_v7 = vrot.slane %v9590_v36, 4 }
 0x172   : > { %v1334_v25 = vor.u32 %v1332_v58, %v9605_v57  ;;  %v1335_v53 = vrot.slane %v9605_v57, 4  ;;  %8539 = vmatprep.mubr.bf16.mxu0 %v7634_v40  ;;  %v2932_v59 = vrot.slane %v2804_v31, 5  ;;  %v2935_v42 = vrot.slane %v2805_v38, 5  ;;  %v2811_v16 = vld [vmem:[#allocation3 + $0x74] sm:$0x1] }
 0x173   : > { %v1309_v0 = vsel %vm9265_vm7, %v1301_v34, %v1308_v43  ;;  %v1539_v44 = vsel %vm9125_vm3, %v1310_v47, %v1538_v41  ;;  %v1556_v28 = vsel %vm9159_vm5, %v1351_v48, %v1555_v14  ;;  %v1354_v2 = vshrl.u32 %v7991_v54, 16  ;;  %v2812_v24 = vld [vmem:[#allocation3 + $0x78] sm:$0xe]  ;;  %v2815_v41 = vld [vmem:[#allocation3 + $0x84] sm:$0xe] }
 0x174   : > { %1537 = vst [vmem:[#allocation3 + $0x94] sm:$0xf] %v1309_v0  ;;  %1540 = vst [vmem:[#allocation3 + $0x98] sm:$0x1] %v1539_v44  ;;  %v1549_v52 = vsel %vm9159_vm5, %v1334_v25, %v1548_v63  ;;  %v1357_v20 = vshll.u32 %v7991_v54, 16  ;;  %v2933_v34 = vsel %vm9290_vm10, %v7603_v27, %v2932_v59  ;;  %v2934_v5 = vrot.slane %v2932_v59, 4 }
 0x175   : > { %1557 = vst [vmem:[#allocation3 + $0xb4] sm:$0xf] %v1556_v28  ;;  %1550 = vst [vmem:[#allocation3 + $0xa8] sm:$0xf] %v1549_v52  ;;  %v772_v9 = vadd.f32 %v9627_v6, %v9523_v23  ;;  %v7604_v10 = vrot.slane %v2806_v61, 9  ;;  %v2939_v11 = vrot.slane %v2807_v62, 5 }
 0x176   : > { %v1356_v8 = vrot.slane %v1354_v2, 7  ;;  %v2942_v15 = vrot.slane %v2808_v3, 5  ;;  %v7605_v17 = vrot.slane %v2809_v51, 9  ;;  %v2946_v19 = vrot.slane %v2810_v30, 5  ;;  %v2813_v31 = vld [vmem:[#allocation3 + $0x7c] sm:$0xf] }
 0x177   : > { %v2936_v27 = vsel %vm9290_vm10, %v2934_v5, %v2935_v42  ;;  %v828_v56 = vmax.f32 %v772_v9, 0.0  ;;  %v2940_v21 = vsel %vm9290_vm10, %v7604_v10, %v2939_v11  ;;  %v2941_v45 = vrot.slane %v2939_v11, 4  ;;  %v2814_v13 = vld [vmem:[#allocation3 + $0x80] sm:$0x1]  ;;  %v2816_v55 = vld [vmem:[#allocation3 + $0x88] sm:$0xf] }
 0x178   : > { %v1359_v14 = vor.u32 %v1357_v20, %v1356_v8  ;;  %v1361_v29 = vrot.slane %v1356_v8, 4  ;;  %v7635_v23 = vcombine.low %v2933_v34, %v2936_v27  ;;  %v9637_v58 = vsel %vm9290_vm10, %v7605_v17, %v2946_v19  ;;  %v2817_v38 = vld [vmem:[#allocation3 + $0x8c] sm:$0x1]  ;;  %v2818_v43 = vld [vmem:[#allocation3 + $0x90] sm:$0xe]  ;;  %v8937_v44 = vld [vmem:[#allocation3 + $0x9c] sm:$0xff]  }
 0x179   : > { %v7989_v35 = vpack.c.bf16 %v828_v56, %v828_v56  ;;  %v2943_v33 = vsel %vm9290_vm10, %v2941_v45, %v2942_v15  ;;  %v2948_v36 = vrot.slane %v2946_v19, 4  ;;  %v2949_v46 = vrot.slane %v2811_v16, 5  ;;  %v1552_v59 = vld [vmem:[#allocation3 + $0xb0] sm:$0x1]  ;;  %v2821_v42 = vld [vmem:[#allocation3 + $0x9c] sm:$0xe] }
 0x17a   : > { %v1360_v37 = vsel %vm9265_vm7, %v1352_v7, %v1359_v14  ;;  %v1560_v26 = vsel %vm9125_vm3, %v1361_v29, %v1559_v1  ;;  %8540 = vmatmul.mubr.bf16.gmra.mxu0 %v7635_v23  ;;  %v7636_v63 = vcombine.low %v2940_v21, %v2943_v33  ;;  %v7606_v40 = vrot.slane %v2812_v24, 9  ;;  %v2822_v34 = vld [vmem:[#allocation3 + $0xa0] sm:$0xf]  ;;  %v2823_v1 = vld [vmem:[#allocation3 + $0xa4] sm:$0x1] }
 0x17b   : > { %1558 = vst [vmem:[#allocation3 + $0xb8] sm:$0xf] %v1360_v37  ;;  %1561 = vst [vmem:[#allocation3 + $0xbc] sm:$0x1] %v1560_v26  ;;  %v1337_v47 = vshrl.u32 %v7989_v35, 16  ;;  %v1340_v48 = vshll.u32 %v7989_v35, 16  ;;  %v2950_v51 = vsel %vm9290_vm10, %v2948_v36, %v2949_v46 }
 0x17c   : > { %v2953_v25 = vrot.slane %v2813_v31, 5  ;;  %v8935_v54 = vld [vmem:[#allocation3 + $0x90] sm:$0xff]   ;;  %8543 = vmatprep.mubr.bf16.mxu0 %v7636_v63  ;;  %v7637_v7 = vcombine.low %v9637_v58, %v2950_v51  ;;  %v2956_v61 = vrot.slane %v2814_v13, 5  ;;  %v7607_v62 = vrot.slane %v2815_v41, 9  ;;  %v2820_v20 = vld [vmem:[#allocation3 + $0x98] sm:$0x1] }
 0x17d   : > { %v2960_v0 = vrot.slane %v2816_v55, 5  ;;  %v2819_v28 = vld [vmem:[#allocation3 + $0x94] sm:$0xf]  ;;  %v1339_v3 = vrot.slane %v1337_v47, 7  ;;  %v2963_v2 = vrot.slane %v2817_v38, 5  ;;  %8455 = vmatprep.mubr.bf16.mxu1 %v8935_v54  ;;  %v7608_v10 = vrot.slane %v2818_v43, 9 }
 0x17e   : > { %v2954_v30 = vsel %vm9290_vm10, %v7606_v40, %v2953_v25  ;;  %v2955_v52 = vrot.slane %v2953_v25, 4  ;;  %8456 = vmatmul.mubr.bf16.gmra.mxu1 %v8937_v44  ;;  %v2967_v11 = vrot.slane %v2819_v28, 5  ;;  %v2970_v17 = vrot.slane %v2820_v20, 5  ;;  %v9656_v19 = vld [vmem:[#allocation3 + $0xa8] sm:$0xe] }
 0x17f   : > { %v9652_v5 = vsel %vm9290_vm10, %v7607_v62, %v2960_v0  ;;  %v2962_v9 = vrot.slane %v2960_v0, 4  ;;  %v1342_v8 = vor.u32 %v1340_v48, %v1339_v3  ;;  %v1344_v15 = vrot.slane %v1339_v3, 4  ;;  %v2827_v24 = vld [vmem:[#allocation3 + $0xb4] sm:$0xe]  ;;  %v3830_v41 = vld [vmem:[#allocation3 + $0xc] sm:$0xf] }
 0x180   : > { %v2957_v16 = vsel %vm9290_vm10, %v2955_v52, %v2956_v61  ;;  %v2968_v21 = vsel %vm9290_vm10, %v7608_v10, %v2967_v11  ;;  %v2969_v45 = vrot.slane %v2967_v11, 4  ;;  %v7609_v58 = vrot.slane %v2821_v42, 9  ;;  %v3831_v31 = vld [vmem:[#allocation3 + $0x10] sm:$0xf]  ;;  %v3832_v35 = vld [vmem:[#allocation3 + $0x14] sm:$0x1] }
 0x181   : > { %v7638_v27 = vcombine.low %v2954_v30, %v2957_v16  ;;  %v2964_v56 = vsel %vm9290_vm10, %v2962_v9, %v2963_v2  ;;  %v1343_v14 = vsel %vm9265_vm7, %v1335_v53, %v1342_v8  ;;  %v1553_v29 = vsel %vm9125_vm3, %v1344_v15, %v1552_v59  ;;  %v1964_v59 = vld [vmem:[#allocation3 + $0xc] sm:$0xf]  ;;  %v1965_v62 = vld [vmem:[#allocation3 + $0x10] sm:$0xf]  ;;  %v1966_v2 = vld [vmem:[#allocation3 + $0x14] sm:$0x1] }
 0x182   : > { %v7639_v23 = vcombine.low %v9652_v5, %v2964_v56  ;;  %1551 = vst [vmem:[#allocation3 + $0xac] sm:$0xf] %v1343_v14  ;;  %1554 = vst [vmem:[#allocation3 + $0xb0] sm:$0x1] %v1553_v29  ;;  %8544 = vmatmul.mubr.bf16.gmra.mxu0 %v7637_v7  ;;  %v2971_v33 = vsel %vm9290_vm10, %v2969_v45, %v2970_v17  ;;  %v2974_v36 = vrot.slane %v2822_v34, 5  ;;  %v2977_v46 = vrot.slane %v2823_v1, 5 }
 0x183   : > { %v7610_v57 = vrot.slane %v9656_v19, 9  ;;  %8547 = vmatprep.mubr.bf16.mxu0 %v7638_v27  ;;  %v7640_v53 = vcombine.low %v2968_v21, %v2971_v33  ;;  %v2828_v13 = vld [vmem:[#allocation3 + $0xb8] sm:$0xf]  ;;  %v2829_v55 = vld [vmem:[#allocation3 + $0xbc] sm:$0x1]  ;;  %v7611_v37 = vrot.slane %v2827_v24, 9  ;;  %v9674_v63 = vadd.f32 %v9627_v6, %v9536_v60 }
 0x184   : > { %v3879_v26 = vshrl.u32 %v3830_v41, 16  ;;  %v9678_v40 = vsel %vm9290_vm10, %v7609_v58, %v2974_v36  ;;  %v2976_v38 = vrot.slane %v2974_v36, 4  ;;  %v2988_v43 = vrot.slane %v2828_v13, 5  ;;  %v8942_v3 = vld [vmem:[#allocation3 + $0xb4] sm:$0xff]   ;;  %v1968_v36 = vld [vmem:[#allocation3 + $0x1c] sm:$0xf] }
 0x185   : > { %v2991_v47 = vrot.slane %v2829_v55, 5  ;;  %v3882_v51 = vshll.u32 %v3830_v41, 16  ;;  %v3888_v25 = vshll.u32 %v3831_v31, 16  ;;  %v3892_v54 = vshrl.u32 %v3831_v31, 16  ;;  %v1967_v1 = vld [vmem:[#allocation3 + $0x18] sm:$0xf] }
 0x186   : > { %v3881_v48 = vrot.slane %v3879_v26, 4  ;;  %v9682_v7 = vsel %vm9290_vm10, %v2976_v38, %v2977_v46  ;;  %v9686_v60 = vsel %vm9290_vm10, %v7611_v37, %v2988_v43  ;;  %v2990_v6 = vrot.slane %v2988_v43, 4  ;;  %v1969_v37 = vld [vmem:[#allocation3 + $0x20] sm:$0x1]  ;;  %v3833_v26 = vld [vmem:[#allocation3 + $0x18] sm:$0xf] }
 0x187   : > { %v3898_v61 = vshll.u32 %v3832_v35, 16  ;;  %v7641_v0 = vcombine.low %v9678_v40, %v9682_v7  ;;  %v3884_v44 = vrot.slane %v3882_v51, 5  ;;  %v3890_v28 = vrot.slane %v3888_v25, 5  ;;  %v1992_v12 = vld [vmem:[#allocation3 + $0x7c] sm:$0xf] }
 0x188   : > { %v3894_v42 = vrot.slane %v3892_v54, 4  ;;  %v9692_v30 = vsel %vm9290_vm10, %v2990_v6, %v2991_v47  ;;  %v2037_v20 = vshrl.u32 %v1964_v59, 16  ;;  %v2040_v34 = vshll.u32 %v1964_v59, 16 }
 0x189   : > { %v3900_v52 = vrot.slane %v3898_v61, 5  ;;  %v8940_v5 = vld [vmem:[#allocation3 + $0xa8] sm:$0xff]   ;;  %v7643_v10 = vcombine.low %v9686_v60, %v9692_v30  ;;  %v3885_v11 = vor.u32 %v3884_v44, %v3881_v48  ;;  %v2046_v15 = vshll.u32 %v1965_v62, 16  ;;  %v2826_v16 = vld [vmem:[#allocation3 + $0xb0] sm:$0x1] }
 0x18a   : > { %v2825_v9 = vld [vmem:[#allocation3 + $0xac] sm:$0xf]  ;;  %v3895_v8 = vor.u32 %v3894_v42, %v3890_v28  ;;  %8548 = vmatmul.mubr.bf16.gmra.mxu0 %v7639_v23  ;;  %v2039_v19 = vrot.slane %v2037_v20, 4  ;;  %v2042_v27 = vrot.slane %v2040_v34, 5  ;;  %v2050_v56 = vshrl.u32 %v1965_v62, 16  ;;  %8459 = vmatprep.mubr.bf16.mxu1 %v8940_v5 }
 0x18b   : > { %v2981_v17 = vrot.slane %v2825_v9, 5  ;;  %8551 = vmatprep.mubr.bf16.mxu0 %v7640_v53  ;;  %v2984_v21 = vrot.slane %v2826_v16, 5  ;;  %v3886_v45 = vrot.slane %v3885_v11, 4  ;;  %v2048_v41 = vrot.slane %v2046_v15, 5  ;;  %8460 = vmatmul.mubr.bf16.gmra.mxu1 %v8942_v3  ;;  %v3834_v48 = vld [vmem:[#allocation3 + $0x1c] sm:$0xf] }
 0x18c   : > { %v3896_v24 = vrot.slane %v3895_v8, 4  ;;  %v2043_v58 = vor.u32 %v2042_v27, %v2039_v19  ;;  %v2052_v31 = vrot.slane %v2050_v56, 4  ;;  %8479 = vmatprep.mubr.bf16.mxu1 %v9335_v50  ;;  %v2056_v33 = vshll.u32 %v1966_v2, 16  ;;  %v3836_v62 = vld [vmem:[#allocation3 + $0x24] sm:$0xf] }
 0x18d   : > { %v2982_v14 = vsel %vm9290_vm10, %v7610_v57, %v2981_v17  ;;  %v2983_v29 = vrot.slane %v2981_v17, 4  ;;  %v3891_v23 = vsel %vm9322_vm13, %v3886_v45, %v3890_v28  ;;  %v2061_v46 = vshrl.u32 %v1967_v1, 16  ;;  %v3835_v3 = vld [vmem:[#allocation3 + $0x20] sm:$0x1]  ;;  %v3837_v5 = vld [vmem:[#allocation3 + $0x28] sm:$0xf] }
 0x18e   : > { %v3901_v35 = vsel %vm9322_vm13, %v3896_v24, %v3900_v52  ;;  %v2044_v57 = vrot.slane %v2043_v58, 4  ;;  %v2053_v55 = vor.u32 %v2052_v31, %v2048_v41  ;;  %v2058_v38 = vrot.slane %v2056_v33, 5  ;;  %v8947_v9 = vld [vmem:[%s11425_s3 + $0xf0] sm:$0xff]   ;;  %v3838_v24 = vld [vmem:[#allocation3 + $0x2c] sm:$0x1] }
 0x18f   : > { %v2985_v53 = vsel %vm9290_vm10, %v2983_v29, %v2984_v21  ;;  %v9705_v13 = vcombine.low %v3891_v23, %v3901_v35  ;;  %v2063_v43 = vrot.slane %v2061_v46, 4  ;;  %v2064_v47 = vshll.u32 %v1967_v1, 16  ;;  %v1970_v23 = vld [vmem:[#allocation3 + $0x24] sm:$0xf]  ;;  %v1973_v30 = vld [vmem:[#allocation3 + $0x30] sm:$0xf] }
 0x190   : > { %v7642_v40 = vcombine.low %v2982_v14, %v2985_v53  ;;  %v2049_v50 = vsel %vm9322_vm13, %v2044_v57, %v2048_v41  ;;  %v2054_v51 = vrot.slane %v2053_v55, 4  ;;  %v2070_v25 = vshll.u32 %v1968_v36, 16  ;;  %v8948_v53 = vld [vmem:[%s11425_s3 + $0xe8] sm:$0xff]  }
 0x191   : > { %v2074_v54 = vshrl.u32 %v1968_v36, 16  ;;  %v2066_v59 = vrot.slane %v2064_v47, 5  ;;  %v2080_v7 = vshll.u32 %v1969_v37, 16  ;;  %v3903_v6 = vshrl.u32 %v3833_v26, 16 }
 0x192   : > { %v3906_v61 = vshll.u32 %v3833_v26, 16  ;;  %8552 = vmatmul.mubr.bf16.gmra.mxu0 %v7641_v0  ;;  %v2059_v44 = vsel %vm9322_vm13, %v2054_v51, %v2058_v38  ;;  %v2072_v28 = vrot.slane %v2070_v25, 5  ;;  %v3912_v52 = vshll.u32 %v3834_v48, 16 }
 0x193   : > { %v2076_v42 = vrot.slane %v2074_v54, 4  ;;  %8555 = vmatprep.mubr.bf16.mxu0 %v7642_v40  ;;  %v7573_v2 = vcombine.low %v2049_v50, %v2059_v44  ;;  %v2067_v20 = vor.u32 %v2066_v59, %v2063_v43  ;;  %v2082_v34 = vrot.slane %v2080_v7, 5  ;;  %v1972_v43 = vld [vmem:[#allocation3 + $0x2c] sm:$0x1]  ;;  %v8949_v50 = vld [vmem:[%s11425_s3 + $0xe0] sm:$0xff]  }
 0x194   : > { %v3905_v1 = vrot.slane %v3903_v6, 4  ;;  %v3908_v8 = vrot.slane %v3906_v61, 5  ;;  %v3914_v0 = vrot.slane %v3912_v52, 5  ;;  %v3916_v15 = vshrl.u32 %v3834_v48, 16  ;;  %v1974_v61 = vld [vmem:[#allocation3 + $0x34] sm:$0xf] }
 0x195   : > { %v2077_v11 = vor.u32 %v2076_v42, %v2072_v28  ;;  %8480 = vmatmul.mubr.bf16.vlgmr.msra.gmra.mxu1 %v7573_v2  ;;  %v2068_v16 = vrot.slane %v2067_v20, 4  ;;  %v3922_v17 = vshll.u32 %v3835_v3, 16  ;;  %v3927_v19 = vshrl.u32 %v3836_v62, 16  ;;  %v1975_v42 = vld [vmem:[#allocation3 + $0x38] sm:$0x1] }
 0x196   : > { %v3930_v27 = vshll.u32 %v3836_v62, 16  ;;  %8560 = vmatpush3.bf16.msra.mxu1 %v9472_v39  ;;  %v3909_v21 = vor.u32 %v3908_v8, %v3905_v1  ;;  %v3918_v45 = vrot.slane %v3916_v15, 4  ;;  %v3936_v41 = vshll.u32 %v3837_v5, 16  ;;  %v1971_v39 = vld [vmem:[#allocation3 + $0x28] sm:$0xf] }
 0x197   : > { %v2078_v56 = vrot.slane %v2077_v11, 4  ;;  %v2073_v14 = vsel %vm9322_vm13, %v2068_v16, %v2072_v28  ;;  %v3924_v29 = vrot.slane %v3922_v17, 5  ;;  %v3929_v58 = vrot.slane %v3927_v19, 4  ;;  %8561 = vmatprep.subr.bf16.mxu1 %v8947_v9  ;;  %v8950_v1 = vld [vmem:[%s11425_s3 + $0xd8] sm:$0xff]  }
 0x198   : > { %v3932_v31 = vrot.slane %v3930_v27, 5  ;;  %v3910_v33 = vrot.slane %v3909_v21, 4  ;;  %v3919_v36 = vor.u32 %v3918_v45, %v3914_v0  ;;  %v3938_v46 = vrot.slane %v3936_v41, 5  ;;  %v8953_v27 = vld [vmem:[%s11425_s3 + $0x1b0] sm:$0xff]   ;;  %v3841_v41 = vld [vmem:[#allocation3 + $0x38] sm:$0x1] }
 0x199   : > { %v2083_v35 = vsel %vm9322_vm13, %v2078_v56, %v2082_v34  ;;  %v3940_v37 = vshrl.u32 %v3837_v5, 16  ;;  %v3946_v26 = vshll.u32 %v3838_v24, 16  ;;  %v2085_v47 = vshrl.u32 %v1970_v23, 16  ;;  %v3839_v34 = vld [vmem:[#allocation3 + $0x30] sm:$0xf] }
 0x19a   : > { %v7574_v57 = vcombine.low %v2073_v14, %v2083_v35  ;;  %v3933_v55 = vor.u32 %v3932_v31, %v3929_v58  ;;  %8556 = vmatmul.mubr.bf16.gmra.mxu0 %v7643_v10  ;;  %v3915_v40 = vsel %vm9322_vm13, %v3910_v33, %v3914_v0  ;;  %v3920_v38 = vrot.slane %v3919_v36, 4  ;;  %8562 = vmatpush3.bf16.msra.mxu1 %v8947_v9  ;;  %v3840_v0 = vld [vmem:[#allocation3 + $0x34] sm:$0xf]  ;;  %v8952_v14 = vld [vmem:[%s11425_s3 + $0xd0] sm:$0xff]   ;;  %v3842_v35 = vld [vmem:[#allocation3 + $0x3c] sm:$0xf] }
 0x19b   : > { %v2088_v48 = vshll.u32 %v1970_v23, 16  ;;  %8623 = vmatprep.mubr.bf16.mxu0 %v9705_v13  ;;  %v3942_v25 = vrot.slane %v3940_v37, 4  ;;  %v3948_v54 = vrot.slane %v3946_v26, 5  ;;  %v2094_v60 = vshll.u32 %v1971_v39, 16  ;;  %8563 = vmatprep.subr.bf16.mxu1 %v8948_v53  ;;  %v3843_v26 = vld [vmem:[#allocation3 + $0x40] sm:$0xf] }
 0x19c   : > { %8483 = vmatprep.mubr.bf16.mxu1 %v7574_v57  ;;  %v3934_v51 = vrot.slane %v3933_v55, 4  ;;  %v3925_v10 = vsel %vm9322_vm13, %v3920_v38, %v3924_v29  ;;  %v2087_v59 = vrot.slane %v2085_v47, 4  ;;  %v2098_v6 = vshrl.u32 %v1971_v39, 16 }
 0x19d   : > { %v2090_v7 = vrot.slane %v2088_v48, 5  ;;  %v7709_v62 = vcombine.low %v3915_v40, %v3925_v10  ;;  %v3943_v28 = vor.u32 %v3942_v25, %v3938_v46  ;;  %v2096_v13 = vrot.slane %v2094_v60, 5  ;;  %v8954_v40 = vld [vmem:[%s11425_s3 + $0x1a8] sm:$0xff]  }
 0x19e   : > { %v3939_v44 = vsel %vm9322_vm13, %v3934_v51, %v3938_v46  ;;  %v2100_v52 = vrot.slane %v2098_v6, 4  ;;  %v2104_v2 = vshll.u32 %v1972_v43, 16  ;;  %v2109_v20 = vshrl.u32 %v1973_v30, 16  ;;  %8564 = vmatpush3.bf16.msra.mxu1 %v8948_v53  ;;  %v1976_v51 = vld [vmem:[#allocation3 + $0x3c] sm:$0xf] }
 0x19f   : > { %v2091_v3 = vor.u32 %v2090_v7, %v2087_v59  ;;  %v3944_v5 = vrot.slane %v3943_v28, 4  ;;  %v2112_v9 = vshll.u32 %v1973_v30, 16  ;;  %v2118_v11 = vshll.u32 %v1974_v61, 16  ;;  %8565 = vmatprep.subr.bf16.mxu1 %v8949_v50 }
 0x1a0   : > { %v2122_v8 = vshrl.u32 %v1974_v61, 16  ;;  %v2101_v16 = vor.u32 %v2100_v52, %v2096_v13  ;;  %v2106_v17 = vrot.slane %v2104_v2, 5  ;;  %v2111_v19 = vrot.slane %v2109_v20, 4  ;;  %v1977_v20 = vld [vmem:[#allocation3 + $0x40] sm:$0xf] }
 0x1a1   : > { %v2092_v15 = vrot.slane %v2091_v3, 4  ;;  %v3949_v56 = vsel %vm9322_vm13, %v3944_v5, %v3948_v54  ;;  %v2114_v21 = vrot.slane %v2112_v9, 5  ;;  %v2120_v45 = vrot.slane %v2118_v11, 5 }
 0x1a2   : > { %v2124_v24 = vrot.slane %v2122_v8, 4  ;;  %8624 = vmatmul.mubr.bf16.vlgmr.msra.gmra.mxu0 %v7709_v62  ;;  %v7710_v29 = vcombine.low %v3939_v44, %v3949_v56  ;;  %v2102_v31 = vrot.slane %v2101_v16, 4  ;;  %v2128_v23 = vshll.u32 %v1975_v42, 16  ;;  %8566 = vmatpush3.bf16.msra.mxu1 %v8949_v50  ;;  %v3844_v50 = vld [vmem:[#allocation3 + $0x44] sm:$0x1] }
 0x1a3   : > { %v2097_v58 = vsel %vm9322_vm13, %v2092_v15, %v2096_v13  ;;  %v2115_v33 = vor.u32 %v2114_v21, %v2111_v19  ;;  %v3951_v46 = vshrl.u32 %v3839_v34, 16  ;;  %v3954_v39 = vshll.u32 %v3839_v34, 16  ;;  %8567 = vmatprep.subr.bf16.mxu1 %v8950_v1  ;;  %8704 = vmatpush3.bf16.msra.mxu0 %v9597_v4  ;;  %v8955_v4 = vld [vmem:[%s11425_s3 + $0xc8] sm:$0xff]   ;;  %v8956_v13 = vld [vmem:[%s11425_s3 + $0x1a0] sm:$0xff]   ;;  %v1978_v34 = vld [vmem:[#allocation3 + $0x44] sm:$0x1] }
 0x1a4   : > { %v2125_v36 = vor.u32 %v2124_v24, %v2120_v45  ;;  %8627 = vmatprep.mubr.bf16.mxu0 %v7710_v29  ;;  %v2107_v53 = vsel %vm9322_vm13, %v2102_v31, %v2106_v17  ;;  %v2130_v57 = vrot.slane %v2128_v23, 5  ;;  %v3960_v55 = vshll.u32 %v3840_v0, 16  ;;  %8705 = vmatprep.subr.bf16.mxu0 %v8953_v27  ;;  %v8957_v19 = vld [vmem:[%s11425_s3 + $0x198] sm:$0xff]   ;;  %v1981_v23 = vld [vmem:[#allocation3 + $0x50] sm:$0x1] }
 0x1a5   : > { %v3964_v37 = vshrl.u32 %v3840_v0, 16  ;;  %v7575_v38 = vcombine.low %v2097_v58, %v2107_v53  ;;  %v2116_v43 = vrot.slane %v2115_v33, 4  ;;  %v3953_v48 = vrot.slane %v3951_v46, 4  ;;  %v3845_v53 = vld [vmem:[#allocation3 + $0x48] sm:$0xf] }
 0x1a6   : > { %v2126_v47 = vrot.slane %v2125_v36, 4  ;;  %v3956_v25 = vrot.slane %v3954_v39, 5  ;;  %v3962_v54 = vrot.slane %v3960_v55, 5  ;;  %v3970_v30 = vshll.u32 %v3841_v41, 16  ;;  %8568 = vmatpush3.bf16.msra.mxu1 %v8950_v1  ;;  %v1979_v1 = vld [vmem:[#allocation3 + $0x48] sm:$0xf] }
 0x1a7   : > { %v3966_v60 = vrot.slane %v3964_v37, 4  ;;  %8484 = vmatmul.mubr.bf16.gmra.mxu1 %v7575_v38  ;;  %v2121_v10 = vsel %vm9322_vm13, %v2116_v43, %v2120_v45  ;;  %v3975_v7 = vshrl.u32 %v3842_v35, 16  ;;  %v3978_v6 = vshll.u32 %v3842_v35, 16  ;;  %8569 = vmatprep.subr.bf16.mxu1 %v8952_v14  ;;  %v1980_v41 = vld [vmem:[#allocation3 + $0x4c] sm:$0xf] }
 0x1a8   : > { %v2131_v59 = vsel %vm9322_vm13, %v2126_v47, %v2130_v57  ;;  %v3957_v62 = vor.u32 %v3956_v25, %v3953_v48  ;;  %v3972_v28 = vrot.slane %v3970_v30, 5  ;;  %8706 = vmatpush3.bf16.msra.mxu0 %v8953_v27  ;;  %v3984_v52 = vshll.u32 %v3843_v26, 16  ;;  %v8958_v27 = vld [vmem:[%s11425_s3 + $0xc0] sm:$0xff]   ;;  %v8963_v35 = vld [vmem:[%s11425_s3 + $0x178] sm:$0xff]  }
 0x1a9   : > { %v7576_v61 = vcombine.low %v2121_v10, %v2131_v59  ;;  %v3967_v44 = vor.u32 %v3966_v60, %v3962_v54  ;;  %v3977_v42 = vrot.slane %v3975_v7, 4  ;;  %v3980_v3 = vrot.slane %v3978_v6, 5  ;;  %8707 = vmatprep.subr.bf16.mxu0 %v8954_v40  ;;  %v3846_v48 = vld [vmem:[#allocation3 + $0x4c] sm:$0xf]  ;;  %v8960_v60 = vld [vmem:[%s11425_s3 + $0x190] sm:$0xff]  }
 0x1aa   : > { %v3988_v2 = vshrl.u32 %v3843_v26, 16  ;;  %v3958_v5 = vrot.slane %v3957_v62, 4  ;;  %v3994_v11 = vshll.u32 %v3844_v50, 16  ;;  %v2133_v8 = vshrl.u32 %v1976_v51, 16  ;;  %8570 = vmatpush3.bf16.msra.mxu1 %v8952_v14 }
 0x1ab   : > { %8487 = vmatprep.mubr.bf16.mxu1 %v7576_v61  ;;  %v3968_v9 = vrot.slane %v3967_v44, 4  ;;  %v3981_v0 = vor.u32 %v3980_v3, %v3977_v42  ;;  %v3986_v15 = vrot.slane %v3984_v52, 5  ;;  %v2136_v17 = vshll.u32 %v1976_v51, 16  ;;  %8571 = vmatprep.subr.bf16.mxu1 %v8955_v4 }
 0x1ac   : > { %v3990_v16 = vrot.slane %v3988_v2, 4  ;;  %v3963_v56 = vsel %vm9322_vm13, %v3958_v5, %v3962_v54  ;;  %v3996_v45 = vrot.slane %v3994_v11, 5  ;;  %v2135_v24 = vrot.slane %v2133_v8, 4  ;;  %8708 = vmatpush3.bf16.msra.mxu0 %v8954_v40  ;;  %v3847_v54 = vld [vmem:[#allocation3 + $0x50] sm:$0x1] }
 0x1ad   : > { %v3973_v21 = vsel %vm9322_vm13, %v3968_v9, %v3972_v28  ;;  %v3982_v29 = vrot.slane %v3981_v0, 4  ;;  %v2138_v31 = vrot.slane %v2136_v17, 5  ;;  %8709 = vmatprep.subr.bf16.mxu0 %v8956_v13  ;;  %v2142_v33 = vshll.u32 %v1977_v20, 16  ;;  %v3848_v28 = vld [vmem:[#allocation3 + $0x54] sm:$0xf] }
 0x1ae   : > { %v7711_v14 = vcombine.low %v3963_v56, %v3973_v21  ;;  %v3991_v58 = vor.u32 %v3990_v16, %v3986_v15  ;;  %v2146_v36 = vshrl.u32 %v1977_v20, 16  ;;  %v2152_v46 = vshll.u32 %v1978_v34, 16  ;;  %8572 = vmatpush3.bf16.msra.mxu1 %v8955_v4  ;;  %v3849_v20 = vld [vmem:[#allocation3 + $0x58] sm:$0xf]  ;;  %v3850_v21 = vld [vmem:[#allocation3 + $0x5c] sm:$0x1] }
 0x1af   : > { %v2157_v39 = vshrl.u32 %v1979_v1, 16  ;;  %v3987_v57 = vsel %vm9322_vm13, %v3982_v29, %v3986_v15  ;;  %v2139_v37 = vor.u32 %v2138_v31, %v2135_v24  ;;  %v2160_v26 = vshll.u32 %v1979_v1, 16  ;;  %8573 = vmatprep.subr.bf16.mxu1 %v8958_v27 }
 0x1b0   : > { %8628 = vmatmul.mubr.bf16.gmra.mxu0 %v7711_v14  ;;  %v3992_v55 = vrot.slane %v3991_v58, 4  ;;  %v2144_v40 = vrot.slane %v2142_v33, 5  ;;  %v2148_v38 = vrot.slane %v2146_v36, 4  ;;  %v2154_v43 = vrot.slane %v2152_v46, 5  ;;  %v1982_v14 = vld [vmem:[#allocation3 + $0x54] sm:$0xf] }
 0x1b1   : > { %v2159_v47 = vrot.slane %v2157_v39, 4  ;;  %8710 = vmatpush3.bf16.msra.mxu0 %v8956_v13  ;;  %v2140_v51 = vrot.slane %v2139_v37, 4  ;;  %v2162_v25 = vrot.slane %v2160_v26, 5  ;;  %v2166_v4 = vshll.u32 %v1980_v41, 16  ;;  %v8961_v13 = vld [vmem:[%s11425_s3 + $0x188] sm:$0xff]   ;;  %v8966_v33 = vld [vmem:[%s11425_s3 + $0x180] sm:$0xff]  }
 0x1b2   : > { %v3997_v50 = vsel %vm9322_vm13, %v3992_v55, %v3996_v45  ;;  %8711 = vmatprep.subr.bf16.mxu0 %v8957_v19  ;;  %v2149_v10 = vor.u32 %v2148_v38, %v2144_v40  ;;  %v2170_v59 = vshrl.u32 %v1980_v41, 16  ;;  %v2176_v7 = vshll.u32 %v1981_v23, 16  ;;  %8574 = vmatpush3.bf16.msra.mxu1 %v8958_v27 }
 0x1b3   : > { %v7712_v30 = vcombine.low %v3987_v57, %v3997_v50  ;;  %v2145_v6 = vsel %vm9322_vm13, %v2140_v51, %v2144_v40  ;;  %v2163_v61 = vor.u32 %v2162_v25, %v2159_v47  ;;  %v2168_v62 = vrot.slane %v2166_v4, 5  ;;  %8655 = vmatprep.subr.bf16.mxu1 %v8963_v35  ;;  %v1983_v35 = vld [vmem:[#allocation3 + $0x58] sm:$0xf] }
 0x1b4   : > { %v3999_v44 = vshrl.u32 %v3845_v53, 16  ;;  %v2150_v42 = vrot.slane %v2149_v10, 4  ;;  %v2172_v3 = vrot.slane %v2170_v59, 4  ;;  %v2178_v52 = vrot.slane %v2176_v7, 5  ;;  %v9806_v59 = vld [vmem:[%s11425_s3 + $0x238] sm:$0xff]  }
 0x1b5   : > { %8631 = vmatprep.mubr.bf16.mxu0 %v7712_v30  ;;  %v4002_v2 = vshll.u32 %v3845_v53, 16  ;;  %8712 = vmatpush3.bf16.msra.mxu0 %v8957_v19  ;;  %v2164_v34 = vrot.slane %v2163_v61, 4  ;;  %v4008_v5 = vshll.u32 %v3846_v48, 16  ;;  %v4012_v9 = vshrl.u32 %v3846_v48, 16  ;;  %v1984_v48 = vld [vmem:[#allocation3 + $0x5c] sm:$0x1] }
 0x1b6   : > { %v4001_v1 = vrot.slane %v3999_v44, 4  ;;  %8713 = vmatprep.subr.bf16.mxu0 %v8960_v60  ;;  %v2155_v11 = vsel %vm9322_vm13, %v2150_v42, %v2154_v43  ;;  %v2173_v8 = vor.u32 %v2172_v3, %v2168_v62  ;;  %v4018_v15 = vshll.u32 %v3847_v54, 16  ;;  %v1986_v3 = vld [vmem:[#allocation3 + $0x64] sm:$0xf] }
 0x1b7   : > { %v4004_v0 = vrot.slane %v4002_v2, 5  ;;  %v7577_v16 = vcombine.low %v2145_v6, %v2155_v11  ;;  %v2169_v17 = vsel %vm9322_vm13, %v2164_v34, %v2168_v62  ;;  %v4010_v27 = vrot.slane %v4008_v5, 5  ;;  %v1985_v62 = vld [vmem:[#allocation3 + $0x60] sm:$0xf]  ;;  %v1987_v5 = vld [vmem:[#allocation3 + $0x68] sm:$0x1] }
 0x1b8   : > { %v4014_v56 = vrot.slane %v4012_v9, 4  ;;  %v2174_v45 = vrot.slane %v2173_v8, 4  ;;  %v4020_v24 = vrot.slane %v4018_v15, 5  ;;  %v4023_v41 = vshrl.u32 %v3848_v28, 16  ;;  %v1562_v2 = vld [vmem:[#allocation3 + $0xc0] sm:$0xf] }
 0x1b9   : > { %v4005_v19 = vor.u32 %v4004_v0, %v4001_v1  ;;  %8714 = vmatpush3.bf16.msra.mxu0 %v8960_v60  ;;  %8488 = vmatmul.mubr.bf16.gmra.mxu1 %v7577_v16  ;;  %v4026_v58 = vshll.u32 %v3848_v28, 16  ;;  %v4032_v31 = vshll.u32 %v3849_v20, 16  ;;  %v4036_v23 = vshrl.u32 %v3849_v20, 16  ;;  %v3851_v15 = vld [vmem:[#allocation3 + $0x60] sm:$0xf] }
 0x1ba   : > { %v4015_v29 = vor.u32 %v4014_v56, %v4010_v27  ;;  %8715 = vmatprep.subr.bf16.mxu0 %v8961_v13  ;;  %v2179_v36 = vsel %vm9322_vm13, %v2174_v45, %v2178_v52  ;;  %v4025_v39 = vrot.slane %v4023_v41, 4  ;;  %v4042_v53 = vshll.u32 %v3850_v21, 16  ;;  %v787_v21 = vpop.f32.mrf.mxu0 }
 0x1bb   : > { %v4006_v46 = vrot.slane %v4005_v19, 4  ;;  %v7578_v57 = vcombine.low %v2169_v17, %v2179_v36  ;;  %v4028_v37 = vrot.slane %v4026_v58, 5  ;;  %v4034_v26 = vrot.slane %v4032_v31, 5 }
 0x1bc   : > { %v4016_v55 = vrot.slane %v4015_v29, 4  ;;  %v4038_v38 = vrot.slane %v4036_v23, 4  ;;  %v4044_v43 = vrot.slane %v4042_v53, 5  ;;  %v831_v47 = vmax.f32 %v9674_v63, 0.0 }
 0x1bd   : > { %v4011_v40 = vsel %vm9322_vm13, %v4006_v46, %v4010_v27  ;;  %8716 = vmatpush3.bf16.msra.mxu0 %v8961_v13  ;;  %8491 = vmatprep.mubr.bf16.mxu1 %v7578_v57  ;;  %v4029_v51 = vor.u32 %v4028_v37, %v4025_v39  ;;  %v2181_v25 = vshrl.u32 %v1982_v14, 16  ;;  %v2184_v4 = vshll.u32 %v1982_v14, 16  ;;  %v3852_v14 = vld [vmem:[#allocation3 + $0x64] sm:$0xf]  ;;  %v9019_v39 = vld [vmem:[%s11424_s2] ss:$0 sm:$0xff] }
 0x1be   : > { %v4021_v50 = vsel %vm9322_vm13, %v4016_v55, %v4020_v24  ;;  %8717 = vmatprep.subr.bf16.mxu0 %v8966_v33  ;;  %v4039_v60 = vor.u32 %v4038_v38, %v4034_v26  ;;  %v7992_v30 = vpack.c.bf16 %v831_v47, %v831_v47  ;;  %v2190_v10 = vshll.u32 %v1983_v35, 16 }
 0x1bf   : > { %v7713_v54 = vcombine.low %v4011_v40, %v4021_v50  ;;  %v4030_v63 = vrot.slane %v4029_v51, 4  ;;  %v2183_v7 = vrot.slane %v2181_v25, 4  ;;  %v2186_v6 = vrot.slane %v2184_v4, 5 }
 0x1c0   : > { %v2194_v61 = vshrl.u32 %v1983_v35, 16  ;;  %v4040_v44 = vrot.slane %v4039_v60, 4  ;;  %v1363_v28 = vshrl.u32 %v7992_v30, 16  ;;  %v1366_v13 = vshll.u32 %v7992_v30, 16  ;;  %v3853_v35 = vld [vmem:[#allocation3 + $0x68] sm:$0x1] }
 0x1c1   : > { %8632 = vmatmul.mubr.bf16.gmra.mxu0 %v7713_v54  ;;  %v2192_v42 = vrot.slane %v2190_v10, 5  ;;  %v4035_v52 = vsel %vm9322_vm13, %v4030_v63, %v4034_v26  ;;  %v2187_v20 = vor.u32 %v2186_v6, %v2183_v7  ;;  %v2200_v1 = vshll.u32 %v1984_v48, 16  ;;  %v3855_v6 = vld [vmem:[#allocation3 + $0x70] sm:$0xf] }
 0x1c2   : > { %v2196_v34 = vrot.slane %v2194_v61, 4  ;;  %8718 = vmatpush3.bf16.msra.mxu0 %v8966_v33  ;;  %v4045_v9 = vsel %vm9322_vm13, %v4040_v44, %v4044_v43  ;;  %v9812_v11 = vrot.slane %v1363_v28, 7  ;;  %v2205_v8 = vshrl.u32 %v1985_v62, 16 }
 0x1c3   : > { %v2208_v0 = vshll.u32 %v1985_v62, 16  ;;  %8799 = vmatprep.subr.bf16.mxu0 %v9806_v59  ;;  %v7714_v16 = vcombine.low %v4035_v52, %v4045_v9  ;;  %v2188_v17 = vrot.slane %v2187_v20, 4  ;;  %v2202_v56 = vrot.slane %v2200_v1, 5 }
 0x1c4   : > { %v2197_v27 = vor.u32 %v2196_v34, %v2192_v42  ;;  %v1368_v45 = vor.u32 %v1366_v13, %v9812_v11  ;;  %v1369_v19 = vrot.slane %v9812_v11, 4  ;;  %v2207_v24 = vrot.slane %v2205_v8, 4 }
 0x1c5   : > { %v2210_v41 = vrot.slane %v2208_v0, 5  ;;  %8635 = vmatprep.mubr.bf16.mxu0 %v7714_v16  ;;  %v2193_v29 = vsel %vm9322_vm13, %v2188_v17, %v2192_v42  ;;  %v2214_v31 = vshll.u32 %v1986_v3, 16  ;;  %v2218_v23 = vshrl.u32 %v1986_v3, 16  ;;  %v3856_v42 = vld [vmem:[#allocation3 + $0x74] sm:$0x1] }
 0x1c6   : > { %v2198_v58 = vrot.slane %v2197_v27, 4  ;;  %v1563_v33 = vsel %vm9159_vm5, %v1368_v45, %v1562_v2  ;;  %v2224_v46 = vshll.u32 %v1987_v5, 16  ;;  %v788_v53 = vadd.f32 %v9019_v39, %v787_v21  ;;  %v1566_v5 = vld [vmem:[#allocation3 + $0xc8] sm:$0x1]  ;;  %v1988_v0 = vld [vmem:[#allocation3 + $0x6c] sm:$0xf] }
 0x1c7   : > { %v2211_v36 = vor.u32 %v2210_v41, %v2207_v24  ;;  %1564 = vst [vmem:[#allocation3 + $0xc0] sm:$0xf] %v1563_v33  ;;  %v2216_v55 = vrot.slane %v2214_v31, 5  ;;  %v2220_v37 = vrot.slane %v2218_v23, 4  ;;  %v4047_v26 = vshrl.u32 %v3851_v15, 16 }
 0x1c8   : > { %v2203_v57 = vsel %vm9322_vm13, %v2198_v58, %v2202_v56  ;;  %v2226_v43 = vrot.slane %v2224_v46, 5  ;;  %v832_v47 = vmax.f32 %v788_v53, 0.0  ;;  %v4050_v51 = vshll.u32 %v3851_v15, 16  ;;  %v1989_v31 = vld [vmem:[#allocation3 + $0x70] sm:$0xf] }
 0x1c9   : > { %v7579_v40 = vcombine.low %v2193_v29, %v2203_v57  ;;  %v2212_v38 = vrot.slane %v2211_v36, 4  ;;  %v2221_v48 = vor.u32 %v2220_v37, %v2216_v55  ;;  %v4049_v50 = vrot.slane %v4047_v26, 4  ;;  %v1990_v23 = vld [vmem:[#allocation3 + $0x74] sm:$0x1]  ;;  %v1991_v39 = vld [vmem:[#allocation3 + $0x78] sm:$0xf] }
 0x1ca   : > { %v4056_v25 = vshll.u32 %v3852_v14, 16  ;;  %v7993_v54 = vpack.c.bf16 %v832_v47, %v832_v47  ;;  %v4060_v60 = vshrl.u32 %v3852_v14, 16  ;;  %v4066_v30 = vshll.u32 %v3853_v35, 16  ;;  %v1993_v47 = vld [vmem:[#allocation3 + $0x80] sm:$0x1] }
 0x1cb   : > { %8492 = vmatmul.mubr.bf16.gmra.mxu1 %v7579_v40  ;;  %v2217_v4 = vsel %vm9322_vm13, %v2212_v38, %v2216_v55  ;;  %v2222_v10 = vrot.slane %v2221_v48, 4  ;;  %v4052_v63 = vrot.slane %v4050_v51, 5  ;;  %v4071_v61 = vshrl.u32 %v3854_v49, 16 }
 0x1cc   : > { %v4058_v7 = vrot.slane %v4056_v25, 5  ;;  %v1371_v62 = vshrl.u32 %v7993_v54, 16  ;;  %v1374_v44 = vshll.u32 %v7993_v54, 16  ;;  %v4062_v28 = vrot.slane %v4060_v60, 4 }
 0x1cd   : > { %v4068_v13 = vrot.slane %v4066_v30, 5  ;;  %v2227_v3 = vsel %vm9322_vm13, %v2222_v10, %v2226_v43  ;;  %v4053_v52 = vor.u32 %v4052_v63, %v4049_v50  ;;  %v4073_v2 = vrot.slane %v4071_v61, 4 }
 0x1ce   : > { %v4074_v20 = vshll.u32 %v3854_v49, 16  ;;  %v7580_v34 = vcombine.low %v2217_v4, %v2227_v3  ;;  %v1373_v1 = vrot.slane %v1371_v62, 7  ;;  %v4063_v9 = vor.u32 %v4062_v28, %v4058_v7  ;;  %v3857_v4 = vld [vmem:[#allocation3 + $0x78] sm:$0xf]  ;;  %v3858_v62 = vld [vmem:[#allocation3 + $0x7c] sm:$0xf] }
 0x1cf   : > { %v4080_v8 = vshll.u32 %v3855_v6, 16  ;;  %v4054_v15 = vrot.slane %v4053_v52, 4  ;;  %v4084_v17 = vshrl.u32 %v3855_v6, 16  ;;  %v4090_v27 = vshll.u32 %v3856_v42, 16  ;;  %v3859_v42 = vld [vmem:[#allocation3 + $0x80] sm:$0x1] }
 0x1d0   : > { %v4076_v16 = vrot.slane %v4074_v20, 5  ;;  %8495 = vmatprep.mubr.bf16.mxu1 %v7580_v34  ;;  %v1376_v56 = vor.u32 %v1374_v44, %v1373_v1  ;;  %v1378_v21 = vrot.slane %v1373_v1, 4  ;;  %v4064_v45 = vrot.slane %v4063_v9, 4  ;;  %v3860_v1 = vld [vmem:[#allocation3 + $0x84] sm:$0xf] }
 0x1d1   : > { %v4082_v24 = vrot.slane %v4080_v8, 5  ;;  %v4059_v41 = vsel %vm9322_vm13, %v4054_v15, %v4058_v7  ;;  %v4086_v29 = vrot.slane %v4084_v17, 4  ;;  %v4092_v58 = vrot.slane %v4090_v27, 5  ;;  %v3861_v15 = vld [vmem:[#allocation3 + $0x88] sm:$0xf] }
 0x1d2   : > { %v4077_v14 = vor.u32 %v4076_v16, %v4073_v2  ;;  %v1377_v35 = vsel %vm9265_vm7, %v1369_v19, %v1376_v56  ;;  %v1567_v33 = vsel %vm9125_vm3, %v1378_v21, %v1566_v5  ;;  %v4069_v36 = vsel %vm9322_vm13, %v4064_v45, %v4068_v13 }
 0x1d3   : > { %v2229_v46 = vshrl.u32 %v1988_v0, 16  ;;  %1565 = vst [vmem:[#allocation3 + $0xc4] sm:$0xf] %v1377_v35  ;;  %1568 = vst [vmem:[#allocation3 + $0xc8] sm:$0x1] %v1567_v33  ;;  %v7715_v53 = vcombine.low %v4059_v41, %v4069_v36  ;;  %v4087_v55 = vor.u32 %v4086_v29, %v4082_v24  ;;  %v2232_v37 = vshll.u32 %v1988_v0, 16 }
 0x1d4   : > { %v4078_v57 = vrot.slane %v4077_v14, 4  ;;  %v2238_v40 = vshll.u32 %v1989_v31, 16  ;;  %v2242_v11 = vshrl.u32 %v1989_v31, 16  ;;  %v2248_v38 = vshll.u32 %v1990_v23, 16  ;;  %v3862_v31 = vld [vmem:[#allocation3 + $0x8c] sm:$0x1] }
 0x1d5   : > { %v2231_v26 = vrot.slane %v2229_v46, 4  ;;  %8636 = vmatmul.mubr.bf16.gmra.mxu0 %v7715_v53  ;;  %v4088_v19 = vrot.slane %v4087_v55, 4  ;;  %v2234_v43 = vrot.slane %v2232_v37, 5  ;;  %v2253_v49 = vshrl.u32 %v1991_v39, 16 }
 0x1d6   : > { %v4083_v18 = vsel %vm9322_vm13, %v4078_v57, %v4082_v24  ;;  %v2240_v48 = vrot.slane %v2238_v40, 5  ;;  %v2244_v50 = vrot.slane %v2242_v11, 4  ;;  %v2250_v51 = vrot.slane %v2248_v38, 5 }
 0x1d7   : > { %v2256_v25 = vshll.u32 %v1991_v39, 16  ;;  %v4093_v54 = vsel %vm9322_vm13, %v4088_v19, %v4092_v58  ;;  %v2235_v60 = vor.u32 %v2234_v43, %v2231_v26  ;;  %v2255_v30 = vrot.slane %v2253_v49, 4  ;;  %v1994_v39 = vld [vmem:[#allocation3 + $0x84] sm:$0xf]  ;;  %v1995_v26 = vld [vmem:[#allocation3 + $0x88] sm:$0xf] }
 0x1d8   : > { %v2262_v10 = vshll.u32 %v1992_v12, 16  ;;  %v7716_v63 = vcombine.low %v4083_v18, %v4093_v54  ;;  %v2245_v7 = vor.u32 %v2244_v50, %v2240_v48  ;;  %v2266_v61 = vshrl.u32 %v1992_v12, 16  ;;  %v1996_v50 = vld [vmem:[#allocation3 + $0x8c] sm:$0x1] }
 0x1d9   : > { %v2258_v6 = vrot.slane %v2256_v25, 5  ;;  %v2236_v44 = vrot.slane %v2235_v60, 4  ;;  %v2272_v13 = vshll.u32 %v1993_v47, 16  ;;  %v4095_v3 = vshrl.u32 %v3857_v4, 16 }
 0x1da   : > { %v2264_v28 = vrot.slane %v2262_v10, 5  ;;  %8639 = vmatprep.mubr.bf16.mxu0 %v7716_v63  ;;  %v2246_v52 = vrot.slane %v2245_v7, 4  ;;  %v2268_v20 = vrot.slane %v2266_v61, 4  ;;  %v4098_v34 = vshll.u32 %v3857_v4, 16  ;;  %v1997_v10 = vld [vmem:[#allocation3 + $0x90] sm:$0xf] }
 0x1db   : > { %v2259_v2 = vor.u32 %v2258_v6, %v2255_v30  ;;  %v2241_v5 = vsel %vm9322_vm13, %v2236_v44, %v2240_v48  ;;  %v2274_v9 = vrot.slane %v2272_v13, 5  ;;  %v4097_v8 = vrot.slane %v4095_v3, 4 }
 0x1dc   : > { %v4104_v0 = vshll.u32 %v3858_v62, 16  ;;  %v2251_v16 = vsel %vm9322_vm13, %v2246_v52, %v2250_v51  ;;  %v2269_v27 = vor.u32 %v2268_v20, %v2264_v28  ;;  %v4100_v56 = vrot.slane %v4098_v34, 5 }
 0x1dd   : > { %v2260_v17 = vrot.slane %v2259_v2, 4  ;;  %v7581_v21 = vcombine.low %v2241_v5, %v2251_v16  ;;  %v4108_v24 = vshrl.u32 %v3858_v62, 16  ;;  %v4114_v41 = vshll.u32 %v3859_v42, 16  ;;  %v1998_v62 = vld [vmem:[#allocation3 + $0x94] sm:$0xf] }
 0x1de   : > { %v4106_v45 = vrot.slane %v4104_v0, 5  ;;  %v2270_v29 = vrot.slane %v2269_v27, 4  ;;  %v4101_v58 = vor.u32 %v4100_v56, %v4097_v8  ;;  %v4119_v23 = vshrl.u32 %v3860_v1, 16  ;;  %v1999_v2 = vld [vmem:[#allocation3 + $0x98] sm:$0x1] }
 0x1df   : > { %v2265_v14 = vsel %vm9322_vm13, %v2260_v17, %v2264_v28  ;;  %8496 = vmatmul.mubr.bf16.gmra.mxu1 %v7581_v21  ;;  %v4110_v35 = vrot.slane %v4108_v24, 4  ;;  %v4116_v33 = vrot.slane %v4114_v41, 5  ;;  %v4122_v36 = vshll.u32 %v3860_v1, 16  ;;  %v3863_v0 = vld [vmem:[#allocation3 + $0x90] sm:$0xf] }
 0x1e0   : > { %v4128_v46 = vshll.u32 %v3861_v15, 16  ;;  %v2275_v53 = vsel %vm9322_vm13, %v2270_v29, %v2274_v9  ;;  %v4102_v57 = vrot.slane %v4101_v58, 4  ;;  %v4121_v55 = vrot.slane %v4119_v23, 4  ;;  %v3864_v56 = vld [vmem:[#allocation3 + $0x94] sm:$0xf] }
 0x1e1   : > { %v4132_v37 = vshrl.u32 %v3861_v15, 16  ;;  %v7582_v40 = vcombine.low %v2265_v14, %v2275_v53  ;;  %v4111_v11 = vor.u32 %v4110_v35, %v4106_v45  ;;  %v4124_v38 = vrot.slane %v4122_v36, 5  ;;  %v3865_v58 = vld [vmem:[#allocation3 + $0x98] sm:$0x1] }
 0x1e2   : > { %v4130_v12 = vrot.slane %v4128_v46, 5  ;;  %v4107_v18 = vsel %vm9322_vm13, %v4102_v57, %v4106_v45  ;;  %v4138_v43 = vshll.u32 %v3862_v31, 16  ;;  %v2277_v47 = vshrl.u32 %v1994_v39, 16 }
 0x1e3   : > { %v4134_v19 = vrot.slane %v4132_v37, 4  ;;  %8499 = vmatprep.mubr.bf16.mxu1 %v7582_v40  ;;  %v4112_v49 = vrot.slane %v4111_v11, 4  ;;  %v4125_v48 = vor.u32 %v4124_v38, %v4121_v55  ;;  %v2280_v51 = vshll.u32 %v1994_v39, 16  ;;  %v3866_v39 = vld [vmem:[#allocation3 + $0x9c] sm:$0xf] }
 0x1e4   : > { %v2286_v25 = vshll.u32 %v1995_v26, 16  ;;  %v4140_v54 = vrot.slane %v4138_v43, 5  ;;  %v2279_v60 = vrot.slane %v2277_v47, 4  ;;  %v2290_v30 = vshrl.u32 %v1995_v26, 16  ;;  %v3867_v26 = vld [vmem:[#allocation3 + $0xa0] sm:$0xf] }
 0x1e5   : > { %v4135_v4 = vor.u32 %v4134_v19, %v4130_v12  ;;  %v4117_v63 = vsel %vm9322_vm13, %v4112_v49, %v4116_v33  ;;  %v4126_v7 = vrot.slane %v4125_v48, 4  ;;  %v2282_v6 = vrot.slane %v2280_v51, 5  ;;  %v3868_v43 = vld [vmem:[#allocation3 + $0xa4] sm:$0x1] }
 0x1e6   : > { %v2288_v61 = vrot.slane %v2286_v25, 5  ;;  %v7717_v44 = vcombine.low %v4107_v18, %v4117_v63  ;;  %v2292_v13 = vrot.slane %v2290_v30, 4  ;;  %v2296_v42 = vshll.u32 %v1996_v50, 16 }
 0x1e7   : > { %v4136_v28 = vrot.slane %v4135_v4, 4  ;;  %v4131_v3 = vsel %vm9322_vm13, %v4126_v7, %v4130_v12  ;;  %v2283_v52 = vor.u32 %v2282_v6, %v2279_v60  ;;  %v2301_v20 = vshrl.u32 %v1997_v10, 16 }
 0x1e8   : > { %v2304_v34 = vshll.u32 %v1997_v10, 16  ;;  %8640 = vmatmul.mubr.bf16.gmra.mxu0 %v7717_v44  ;;  %v2293_v5 = vor.u32 %v2292_v13, %v2288_v61  ;;  %v2298_v9 = vrot.slane %v2296_v42, 5  ;;  %v2310_v8 = vshll.u32 %v1998_v62, 16  ;;  %v2000_v10 = vld [vmem:[#allocation3 + $0x9c] sm:$0xf] }
 0x1e9   : > { %v4141_v1 = vsel %vm9322_vm13, %v4136_v28, %v4140_v54  ;;  %v2284_v16 = vrot.slane %v2283_v52, 4  ;;  %v2303_v17 = vrot.slane %v2301_v20, 4  ;;  %v2314_v24 = vshrl.u32 %v1998_v62, 16  ;;  %v2001_v62 = vld [vmem:[#allocation3 + $0xa0] sm:$0xf] }
 0x1ea   : > { %v7718_v15 = vcombine.low %v4131_v3, %v4141_v1  ;;  %v2306_v27 = vrot.slane %v2304_v34, 5  ;;  %v2294_v21 = vrot.slane %v2293_v5, 4  ;;  %v2312_v45 = vrot.slane %v2310_v8, 5  ;;  %v2002_v3 = vld [vmem:[#allocation3 + $0xa4] sm:$0x1] }
 0x1eb   : > { %v2320_v41 = vshll.u32 %v1999_v2, 16  ;;  %v2289_v14 = vsel %vm9322_vm13, %v2284_v16, %v2288_v61  ;;  %v4143_v31 = vshrl.u32 %v3863_v0, 16  ;;  %v4146_v23 = vshll.u32 %v3863_v0, 16  ;;  %v2003_v0 = vld [vmem:[#allocation3 + $0xa8] sm:$0xf] }
 0x1ec   : > { %8643 = vmatprep.mubr.bf16.mxu0 %v7718_v15  ;;  %v2307_v29 = vor.u32 %v2306_v27, %v2303_v17  ;;  %v2299_v35 = vsel %vm9322_vm13, %v2294_v21, %v2298_v9  ;;  %v2316_v33 = vrot.slane %v2314_v24, 4  ;;  %v4152_v46 = vshll.u32 %v3864_v56, 16 }
 0x1ed   : > { %v2322_v36 = vrot.slane %v2320_v41, 5  ;;  %v7583_v53 = vcombine.low %v2289_v14, %v2299_v35  ;;  %v4145_v55 = vrot.slane %v4143_v31, 4  ;;  %v4148_v37 = vrot.slane %v4146_v23, 5  ;;  %v2005_v23 = vld [vmem:[#allocation3 + $0xb0] sm:$0x1] }
 0x1ee   : > { %v2308_v57 = vrot.slane %v2307_v29, 4  ;;  %v2317_v40 = vor.u32 %v2316_v33, %v2312_v45  ;;  %v4154_v11 = vrot.slane %v4152_v46, 5  ;;  %v4156_v38 = vshrl.u32 %v3864_v56, 16  ;;  %v2004_v56 = vld [vmem:[#allocation3 + $0xac] sm:$0xf] }
 0x1ef   : > { %v4162_v12 = vshll.u32 %v3865_v58, 16  ;;  %8500 = vmatmul.mubr.bf16.gmra.mxu1 %v7583_v53  ;;  %v4149_v19 = vor.u32 %v4148_v37, %v4145_v55  ;;  %v4167_v47 = vshrl.u32 %v3866_v39, 16  ;;  %v4170_v49 = vshll.u32 %v3866_v39, 16  ;;  %v3869_v53 = vld [vmem:[#allocation3 + $0xa8] sm:$0xf] }
 0x1f0   : > { %v2313_v18 = vsel %vm9322_vm13, %v2308_v57, %v2312_v45  ;;  %v2318_v48 = vrot.slane %v2317_v40, 4  ;;  %v4158_v50 = vrot.slane %v4156_v38, 4  ;;  %v4176_v25 = vshll.u32 %v3867_v26, 16 }
 0x1f1   : > { %v4164_v51 = vrot.slane %v4162_v12, 5  ;;  %v4150_v4 = vrot.slane %v4149_v19, 4  ;;  %v4169_v54 = vrot.slane %v4167_v47, 4  ;;  %v4172_v60 = vrot.slane %v4170_v49, 5 }
 0x1f2   : > { %v4180_v30 = vshrl.u32 %v3867_v26, 16  ;;  %v2323_v63 = vsel %vm9322_vm13, %v2318_v48, %v2322_v36  ;;  %v4159_v7 = vor.u32 %v4158_v50, %v4154_v11  ;;  %v4178_v6 = vrot.slane %v4176_v25, 5 }
 0x1f3   : > { %v4186_v61 = vshll.u32 %v3868_v43, 16  ;;  %v7584_v44 = vcombine.low %v2313_v18, %v2323_v63  ;;  %v4155_v28 = vsel %vm9322_vm13, %v4150_v4, %v4154_v11  ;;  %v4173_v13 = vor.u32 %v4172_v60, %v4169_v54  ;;  %v3870_v11 = vld [vmem:[#allocation3 + $0xac] sm:$0xf]  ;;  %v3871_v54 = vld [vmem:[#allocation3 + $0xb0] sm:$0x1] }
 0x1f4   : > { %v4182_v42 = vrot.slane %v4180_v30, 4  ;;  %v4160_v52 = vrot.slane %v4159_v7, 4  ;;  %v2325_v20 = vshrl.u32 %v2000_v10, 16  ;;  %v2328_v34 = vshll.u32 %v2000_v10, 16  ;;  %v3872_v30 = vld [vmem:[#allocation3 + $0xb4] sm:$0xf] }
 0x1f5   : > { %v4188_v2 = vrot.slane %v4186_v61, 5  ;;  %8503 = vmatprep.mubr.bf16.mxu1 %v7584_v44  ;;  %v4174_v1 = vrot.slane %v4173_v13, 4  ;;  %v2334_v9 = vshll.u32 %v2001_v62, 16  ;;  %v2338_v8 = vshrl.u32 %v2001_v62, 16  ;;  %v9874_v14 = vpop.f32.mrf.mxu1  ;;  %v3873_v61 = vld [vmem:[#allocation3 + $0xb8] sm:$0xf] }
 0x1f6   : > { %v4183_v5 = vor.u32 %v4182_v42, %v4178_v6  ;;  %v4165_v15 = vsel %vm9322_vm13, %v4160_v52, %v4164_v51  ;;  %v2327_v16 = vrot.slane %v2325_v20, 4  ;;  %v2330_v17 = vrot.slane %v2328_v34, 5 }
 0x1f7   : > { %v2344_v27 = vshll.u32 %v2002_v3, 16  ;;  %v7719_v21 = vcombine.low %v4155_v28, %v4165_v15  ;;  %v4179_v45 = vsel %vm9322_vm13, %v4174_v1, %v4178_v6  ;;  %v2336_v41 = vrot.slane %v2334_v9, 5  ;;  %v9878_v57 = vpop.f32.mrf.mxu1 }
 0x1f8   : > { %v4184_v24 = vrot.slane %v4183_v5, 4  ;;  %v2331_v29 = vor.u32 %v2330_v17, %v2327_v16  ;;  %v2340_v58 = vrot.slane %v2338_v8, 4  ;;  %v2349_v35 = vshrl.u32 %v2003_v0, 16  ;;  %v3874_v5 = vld [vmem:[#allocation3 + $0xbc] sm:$0x1] }
 0x1f9   : > { %v2346_v31 = vrot.slane %v2344_v27, 5  ;;  %8644 = vmatmul.mubr.bf16.gmra.mxu0 %v7719_v21  ;;  %v2352_v36 = vshll.u32 %v2003_v0, 16  ;;  %v2358_v46 = vshll.u32 %v2004_v56, 16  ;;  %v2362_v39 = vshrl.u32 %v2004_v56, 16  ;;  %v9882_v50 = vpop.f32.mrf.mxu1  ;;  %v2006_v0 = vld [vmem:[#allocation3 + $0xb4] sm:$0xf] }
 0x1fa   : > { %v4189_v33 = vsel %vm9322_vm13, %v4184_v24, %v4188_v2  ;;  %v2332_v37 = vrot.slane %v2331_v29, 4  ;;  %v2341_v26 = vor.u32 %v2340_v58, %v2336_v41  ;;  %v2351_v40 = vrot.slane %v2349_v35, 4  ;;  %v2007_v56 = vld [vmem:[#allocation3 + $0xb8] sm:$0xf]  ;;  %v2008_v35 = vld [vmem:[#allocation3 + $0xbc] sm:$0x1] }
 0x1fb   : > { %v7720_v55 = vcombine.low %v4179_v45, %v4189_v33  ;;  %v2354_v38 = vrot.slane %v2352_v36, 5  ;;  %v2360_v12 = vrot.slane %v2358_v46, 5  ;;  %v2364_v18 = vrot.slane %v2362_v39, 4  ;;  %v9886_v20 = vpop.f32.mrf.mxu1 }
 0x1fc   : > { %v2368_v19 = vshll.u32 %v2005_v23, 16  ;;  %v2337_v43 = vsel %vm9322_vm13, %v2332_v37, %v2336_v41  ;;  %v2342_v47 = vrot.slane %v2341_v26, 4  ;;  %v4191_v49 = vshrl.u32 %v3869_v53, 16  ;;  %11440 = vst [vmem:[#allocation8_spill] sm:$0xff] %v9886_v20  ;;  %v3875_v37 = vld [vmem:[#allocation3 + $0xc0] sm:$0xf] }
 0x1fd   : > { %8647 = vmatprep.mubr.bf16.mxu0 %v7720_v55  ;;  %v4194_v48 = vshll.u32 %v3869_v53, 16  ;;  %v2355_v51 = vor.u32 %v2354_v38, %v2351_v40  ;;  %v2365_v25 = vor.u32 %v2364_v18, %v2360_v12  ;;  %v4200_v60 = vshll.u32 %v3870_v11, 16  ;;  %v4654_v20 = vld [vmem:[#allocation3 + $0x24] sm:$0xe] }
 0x1fe   : > { %v2370_v4 = vrot.slane %v2368_v19, 5  ;;  %v2347_v10 = vsel %vm9322_vm13, %v2342_v47, %v2346_v31  ;;  %v4193_v63 = vrot.slane %v4191_v49, 4  ;;  %v4204_v6 = vshrl.u32 %v3870_v11, 16  ;;  %v3876_v49 = vld [vmem:[#allocation3 + $0xc4] sm:$0xf] }
 0x1ff   : > { %v4196_v7 = vrot.slane %v4194_v48, 5  ;;  %v7585_v62 = vcombine.low %v2337_v43, %v2347_v10  ;;  %v2356_v44 = vrot.slane %v2355_v51, 4  ;;  %v2366_v28 = vrot.slane %v2365_v25, 4  ;;  %v3877_v10 = vld [vmem:[#allocation3 + $0xc8] sm:$0x1] }
 0x200   : > { %v4202_v13 = vrot.slane %v4200_v60, 5  ;;  %v4206_v3 = vrot.slane %v4204_v6, 4  ;;  %v4210_v52 = vshll.u32 %v3871_v54, 16  ;;  %v4215_v2 = vshrl.u32 %v3872_v30, 16 }
 0x201   : > { %v4197_v42 = vor.u32 %v4196_v7, %v4193_v63  ;;  %8504 = vmatmul.mubr.bf16.gmra.mxu1 %v7585_v62  ;;  %v2361_v34 = vsel %vm9322_vm13, %v2356_v44, %v2360_v12  ;;  %v2371_v1 = vsel %vm9322_vm13, %v2366_v28, %v2370_v4  ;;  %v4218_v9 = vshll.u32 %v3872_v30, 16  ;;  %v9892_v21 = vpop.f32.mrf.mxu1 }
 0x202   : > { %v4224_v8 = vshll.u32 %v3873_v61, 16  ;;  %v7586_v15 = vcombine.low %v2361_v34, %v2371_v1  ;;  %v4207_v17 = vor.u32 %v4206_v3, %v4202_v13  ;;  %v4212_v27 = vrot.slane %v4210_v52, 5 }
 0x203   : > { %v4198_v16 = vrot.slane %v4197_v42, 4  ;;  %v4217_v45 = vrot.slane %v4215_v2, 4  ;;  %v4220_v24 = vrot.slane %v4218_v9, 5  ;;  %v4228_v29 = vshrl.u32 %v3873_v61, 16  ;;  %v9896_v36 = vpop.f32.mrf.mxu1 }
 0x204   : > { %v4226_v41 = vrot.slane %v4224_v8, 5  ;;  %8507 = vmatprep.mubr.bf16.mxu1 %v7586_v15  ;;  %v4208_v31 = vrot.slane %v4207_v17, 4  ;;  %v4234_v23 = vshll.u32 %v3874_v5, 16  ;;  %v2373_v33 = vshrl.u32 %v2006_v0, 16 }
 0x205   : > { %v4203_v58 = vsel %vm9322_vm13, %v4198_v16, %v4202_v13  ;;  %v4221_v46 = vor.u32 %v4220_v24, %v4217_v45  ;;  %v4230_v39 = vrot.slane %v4228_v29, 4  ;;  %v2376_v53 = vshll.u32 %v2006_v0, 16  ;;  %v9900_v12 = vpop.f32.mrf.mxu1  ;;  %v8959_v45 = vld [vmem:[#allocation3 + $0xc] sm:$0xff]  }
 0x206   : > { %v2382_v55 = vshll.u32 %v2007_v56, 16  ;;  %v4213_v26 = vsel %vm9322_vm13, %v4208_v31, %v4212_v27  ;;  %v4236_v40 = vrot.slane %v4234_v23, 5  ;;  %v2375_v11 = vrot.slane %v2373_v33, 4 }
 0x207   : > { %v2386_v38 = vshrl.u32 %v2007_v56, 16  ;;  %v7721_v18 = vcombine.low %v4203_v58, %v4213_v26  ;;  %v4222_v19 = vrot.slane %v4221_v46, 4  ;;  %v4231_v43 = vor.u32 %v4230_v39, %v4226_v41  ;;  %v9904_v44 = vpop.f32.mrf.mxu1  ;;  %v8962_v46 = vld [vmem:[#allocation3 + $0x18] sm:$0xff]   ;;  %v8965_v26 = vld [vmem:[#allocation3 + $0x24] sm:$0xff]  }
 0x208   : > { %v2378_v47 = vrot.slane %v2376_v53, 5  ;;  %v2384_v48 = vrot.slane %v2382_v55, 5  ;;  %v2392_v25 = vshll.u32 %v2008_v35, 16  ;;  %v4239_v4 = vshrl.u32 %v3875_v37, 16  ;;  %11441 = vst [vmem:[#allocation9_spill] sm:$0xff] %v9904_v44  ;;  %v8964_v55 = vld [vmem:[#allocation3 + $0x18] sm:$0xff]  }
 0x209   : > { %v2388_v51 = vrot.slane %v2386_v38, 4  ;;  %8648 = vmatmul.mubr.bf16.gmra.mxu0 %v7721_v18  ;;  %v4227_v54 = vsel %vm9322_vm13, %v4222_v19, %v4226_v41  ;;  %v4232_v60 = vrot.slane %v4231_v43, 4  ;;  %v4242_v63 = vshll.u32 %v3875_v37, 16  ;;  %v8969_v37 = vld [vmem:[%s11425_s3 + $0x170] sm:$0xff]   ;;  %v9020_v38 = vld [vmem:[%s11425_s3 + $0x178] sm:$0xff]   ;;  %v8974_v19 = vld [vmem:[%s11425_s3 + $0x168] sm:$0xff]  }
 0x20a   : > { %v2379_v30 = vor.u32 %v2378_v47, %v2375_v11  ;;  %v2394_v6 = vrot.slane %v2392_v25, 5  ;;  %v4241_v61 = vrot.slane %v4239_v4, 4  ;;  %v4248_v62 = vshll.u32 %v3876_v49, 16  ;;  %v8967_v43 = vld [vmem:[#allocation3 + $0x24] sm:$0xff]   ;;  %v8968_v47 = vld [vmem:[#allocation3 + $0x30] sm:$0xff]  }
 0x20b   : > { %v2389_v7 = vor.u32 %v2388_v51, %v2384_v48  ;;  %v4237_v28 = vsel %vm9322_vm13, %v4232_v60, %v4236_v40  ;;  %v4244_v42 = vrot.slane %v4242_v63, 5  ;;  %v4252_v3 = vshrl.u32 %v3876_v49, 16  ;;  %v8993_v49 = vld [vmem:[%s11425_s3 + $0x230] sm:$0xff]   ;;  %v8970_v25 = vld [vmem:[#allocation3 + $0x30] sm:$0xff]  }
 0x20c   : > { %v2380_v13 = vrot.slane %v2379_v30, 4  ;;  %v7722_v52 = vcombine.low %v4227_v54, %v4237_v28  ;;  %v4250_v34 = vrot.slane %v4248_v62, 5  ;;  %v4258_v1 = vshll.u32 %v3877_v10, 16  ;;  %v9912_v15 = vpop.f32.mrf.mxu1  ;;  %v8979_v4 = vld [vmem:[%s11425_s3 + $0x160] sm:$0xff]   ;;  %v8971_v60 = vld [vmem:[#allocation3 + $0x3c] sm:$0xff]  }
 0x20d   : > { %v2390_v2 = vrot.slane %v2389_v7, 4  ;;  %v4245_v5 = vor.u32 %v4244_v42, %v4241_v61  ;;  %v4254_v9 = vrot.slane %v4252_v3, 4  ;;  %11442 = vst [vmem:[#allocation10_spill] sm:$0xff] %v9912_v15  ;;  %v8995_v30 = vld [vmem:[%s11425_s3 + $0x228] sm:$0xff]   ;;  %v8984_v7 = vld [vmem:[%s11425_s3 + $0x158] sm:$0xff]   ;;  %v9000_v61 = vld [vmem:[%s11425_s3 + $0x220] sm:$0xff]  }
 0x20e   : > { %8651 = vmatprep.mubr.bf16.mxu0 %v7722_v52  ;;  %v2385_v8 = vsel %vm9322_vm13, %v2380_v13, %v2384_v48  ;;  %v4260_v56 = vrot.slane %v4258_v1, 5  ;;  %v9914_v24 = vpop.f32.mrf.mxu1  ;;  %v9918_v58 = vpop.f32.mrf.mxu0  ;;  %v8975_v13 = vld [vmem:[#allocation3 + $0x48] sm:$0xff]   ;;  %v8990_v42 = vld [vmem:[%s11425_s3 + $0x150] sm:$0xff]   ;;  %v8976_v3 = vld [vmem:[#allocation3 + $0x54] sm:$0xff]  }
 0x20f   : > { %v2395_v0 = vsel %vm9322_vm13, %v2390_v2, %v2394_v6  ;;  %v4246_v17 = vrot.slane %v4245_v5, 4  ;;  %v4255_v27 = vor.u32 %v4254_v9, %v4250_v34  ;;  %11443 = vst [vmem:[#allocation11_spill] sm:$0xff] %v9914_v24  ;;  %v8972_v6 = vld [vmem:[#allocation3 + $0x3c] sm:$0xff]   ;;  %v9002_v52 = vld [vmem:[%s11425_s3 + $0x218] sm:$0xff]   ;;  %v8977_v5 = vld [vmem:[#allocation3 + $0x54] sm:$0xff]  }
 0x210   : > { %v7587_v16 = vcombine.low %v2385_v8, %v2395_v0  ;;  %v9920_v31 = vpop.f32.mrf.mxu1  ;;  %v9926_v39 = vpop.f32.mrf.mxu0  ;;  %v8997_v1 = vld [vmem:[%s11425_s3 + $0x148] sm:$0xff]   ;;  %v8978_v9 = vld [vmem:[#allocation3 + $0x60] sm:$0xff]   ;;  %v10052_v44 = vld [vmem:[#allocation3 + $0x34] sm:$0xf] }
 0x211   : > { %v4251_v41 = vsel %vm9322_vm13, %v4246_v17, %v4250_v34  ;;  %v4256_v29 = vrot.slane %v4255_v27, 4  ;;  %11444 = vst [vmem:[#allocation12_spill] sm:$0xff] %v9920_v31  ;;  %v9006_v8 = vld [vmem:[%s11425_s3 + $0x210] sm:$0xff]   ;;  %v9004_v27 = vld [vmem:[%s11425_s3 + $0x140] sm:$0xff]  }
 0x212   : > { %8508 = vmatmul.mubr.bf16.gmra.mxu1 %v7587_v16  ;;  %v9924_v33 = vpop.f32.mrf.mxu1  ;;  %v9935_v11 = vpop.f32.mrf.mxu0  ;;  %v8980_v17 = vld [vmem:[#allocation3 + $0x60] sm:$0xff]  }
 0x213   : > { %8575 = vmatprep.mubr.bf16.mxu1 %v8959_v45  ;;  %v4261_v23 = vsel %vm9322_vm13, %v4256_v29, %v4260_v56  ;;  %11445 = vst [vmem:[#allocation13_spill] sm:$0xff] %v9924_v33  ;;  %v8981_v45 = vld [vmem:[#allocation3 + $0x6c] sm:$0xff]   ;;  %v4651_v33 = vld [vmem:[#allocation3 + $0x18] sm:$0xe] }
 0x214   : > { %v7723_v35 = vcombine.low %v4251_v41, %v4261_v23  ;;  %v9928_v53 = vpop.f32.mrf.mxu1  ;;  %v9948_v48 = vpop.f32.mrf.mxu0  ;;  %v9008_v41 = vld [vmem:[%s11425_s3 + $0x208] sm:$0xff]  }
 0x215   : > { %11446 = vst [vmem:[#allocation14_spill] sm:$0xff] %v9928_v53  ;;  %11449 = vst [vmem:[#allocation17_spill] sm:$0xff] %v9948_v48 }
 0x216   : > { %8652 = vmatmul.mubr.bf16.gmra.mxu0 %v7723_v35  ;;  %v9933_v40 = vpop.f32.mrf.mxu1  ;;  %v10010_v35 = vld [vmem:[%s11425_s3 + $0x1f8] sm:$0xff]  }
 0x217   : > { %8719 = vmatprep.mubr.bf16.mxu0 %v8962_v46  ;;  %11447 = vst [vmem:[#allocation15_spill] sm:$0xff] %v9933_v40  ;;  %v8982_v46 = vld [vmem:[#allocation3 + $0x6c] sm:$0xff]  }
 0x218   : > { %v9940_v18 = vpop.f32.mrf.mxu1 }
 0x219   : > { %11448 = vst [vmem:[#allocation16_spill] sm:$0xff] %v9940_v18  ;;  %v6526_v18 = vld [vmem:[#allocation3 + $0x54] sm:$0xe] }
 0x21a   : > { %8576 = vmatmul.mubr.bf16.vlgmr.msra.gmra.mxu1 %v8964_v55  ;;  %v9950_v51 = vpop.f32.mrf.mxu1  ;;  %v8983_v55 = vld [vmem:[#allocation3 + $0x78] sm:$0xff]  }
 0x21b   : > { %8656 = vmatpush3.bf16.msra.mxu1 %v9020_v38  ;;  %8579 = vmatprep.mubr.bf16.mxu1 %v8965_v26  ;;  %11450 = vst [vmem:[#allocation18_spill] sm:$0xff] %v9950_v51 }
 0x21c   : > { %8657 = vmatprep.subr.bf16.mxu1 %v8969_v37 }
 0x21e   : > { %8720 = vmatmul.mubr.bf16.vlgmr.msra.gmra.mxu0 %v8967_v43  ;;  %v8986_v43 = vld [vmem:[#allocation3 + $0x84] sm:$0xff]  }
 0x21f   : > { %8658 = vmatpush3.bf16.msra.mxu1 %v8969_v37  ;;  %8723 = vmatprep.mubr.bf16.mxu0 %v8968_v47  ;;  %v9955_v54 = vpop.f32.mrf.mxu0  ;;  %v9010_v37 = vld [vmem:[%s11425_s3 + $0x200] sm:$0xff]  }
 0x220   : > { %8659 = vmatprep.subr.bf16.mxu1 %v8974_v19  ;;  %11451 = vst [vmem:[#allocation19_spill] sm:$0xff] %v9955_v54  ;;  %8800 = vmatpush3.bf16.msra.mxu0 %v9806_v59  ;;  %v9963_v63 = vpop.f32.mrf.mxu1  ;;  %v8973_v59 = vld [vmem:[#allocation3 + $0x48] sm:$0xff]   ;;  %v5695_v54 = vld [vmem:[#allocation3 + $0x20] sm:$0x1] }
 0x221   : > { %8801 = vmatprep.subr.bf16.mxu0 %v8993_v49  ;;  %v9961_v10 = vpop.f32.mrf.mxu0  ;;  %11453 = vst [vmem:[#allocation21_spill] sm:$0xff] %v9963_v63  ;;  %v10179_v63 = vld [vmem:[#allocation3 + $0x64] sm:$0xf] }
 0x222   : > { %8580 = vmatmul.mubr.bf16.gmra.mxu1 %v8970_v25  ;;  %11452 = vst [vmem:[#allocation20_spill] sm:$0xff] %v9961_v10  ;;  %v9973_v28 = vpop.f32.mrf.mxu1  ;;  %v8987_v25 = vld [vmem:[#allocation3 + $0x84] sm:$0xff]  }
 0x223   : > { %8583 = vmatprep.mubr.bf16.mxu1 %v8971_v60  ;;  %8660 = vmatpush3.bf16.msra.mxu1 %v8974_v19  ;;  %v9971_v62 = vpop.f32.mrf.mxu0  ;;  %11455 = vst [vmem:[#allocation23_spill] sm:$0xff] %v9973_v28  ;;  %v8985_v19 = vld [vmem:[#allocation3 + $0x78] sm:$0xff]   ;;  %v8989_v60 = vld [vmem:[#allocation3 + $0x90] sm:$0xff]  }
 0x224   : > { %8661 = vmatprep.subr.bf16.mxu1 %v8979_v4  ;;  %8802 = vmatpush3.bf16.msra.mxu0 %v8993_v49  ;;  %11454 = vst [vmem:[#allocation22_spill] sm:$0xff] %v9971_v62  ;;  %v9983_v34 = vpop.f32.mrf.mxu1  ;;  %v4693_v62 = vld [vmem:[#allocation3 + $0xc0] sm:$0xe] }
 0x225   : > { %8803 = vmatprep.subr.bf16.mxu0 %v8995_v30  ;;  %v9981_v2 = vpop.f32.mrf.mxu0  ;;  %11457 = vst [vmem:[#allocation25_spill] sm:$0xff] %v9983_v34  ;;  %v10101_v34 = vld [vmem:[#allocation3 + $0x4c] sm:$0xf] }
 0x226   : > { %8724 = vmatmul.mubr.bf16.gmra.mxu0 %v8972_v6  ;;  %11456 = vst [vmem:[#allocation24_spill] sm:$0xff] %v9981_v2  ;;  %v9993_v16 = vpop.f32.mrf.mxu1  ;;  %v8991_v6 = vld [vmem:[#allocation3 + $0x90] sm:$0xff]  }
 0x227   : > { %8662 = vmatpush3.bf16.msra.mxu1 %v8979_v4  ;;  %8727 = vmatprep.mubr.bf16.mxu0 %v8973_v59  ;;  %11459 = vst [vmem:[#allocation27_spill] sm:$0xff] %v9993_v16  ;;  %v4649_v59 = vld [vmem:[#allocation3 + $0x10] sm:$0xf] }
 0x228   : > { %8663 = vmatprep.subr.bf16.mxu1 %v8984_v7  ;;  %8804 = vmatpush3.bf16.msra.mxu0 %v8995_v30 }
 0x229   : > { %8805 = vmatprep.subr.bf16.mxu0 %v9000_v61 }
 0x22a   : > { %8584 = vmatmul.mubr.bf16.gmra.mxu1 %v8975_v13  ;;  %v10030_v13 = vld [vmem:[#allocation3 + $0x1c] sm:$0xf] }
 0x22b   : > { %8587 = vmatprep.mubr.bf16.mxu1 %v8976_v3  ;;  %8664 = vmatpush3.bf16.msra.mxu1 %v8984_v7  ;;  %v10034_v3 = vld [vmem:[#allocation3 + $0x1c] sm:$0xf] }
 0x22c   : > { %8665 = vmatprep.subr.bf16.mxu1 %v8990_v42  ;;  %8806 = vmatpush3.bf16.msra.mxu0 %v9000_v61  ;;  %v8992_v61 = vld [vmem:[#allocation3 + $0x9c] sm:$0xff]  }
 0x22d   : > { %8807 = vmatprep.subr.bf16.mxu0 %v9002_v52  ;;  %v9991_v0 = vpop.f32.mrf.mxu0 }
 0x22e   : > { %11458 = vst [vmem:[#allocation26_spill] sm:$0xff] %v9991_v0  ;;  %8728 = vmatmul.mubr.bf16.gmra.mxu0 %v8977_v5 }
 0x22f   : > { %8666 = vmatpush3.bf16.msra.mxu1 %v8990_v42  ;;  %8731 = vmatprep.mubr.bf16.mxu0 %v8978_v9  ;;  %v9998_v56 = vpop.f32.mrf.mxu0  ;;  %v10003_v29 = vpop.f32.mrf.mxu1  ;;  %v6609_v9 = vrot.slane %v10030_v13, 5  ;;  %v4653_v13 = vld [vmem:[#allocation3 + $0x20] sm:$0x1] }
 0x230   : > { %8667 = vmatprep.subr.bf16.mxu1 %v8997_v1  ;;  %11460 = vst [vmem:[#allocation28_spill] sm:$0xff] %v9998_v56  ;;  %8808 = vmatpush3.bf16.msra.mxu0 %v9002_v52  ;;  %11461 = vst [vmem:[#allocation29_spill] sm:$0xff] %v10003_v29 }
 0x231   : > { %8809 = vmatprep.subr.bf16.mxu0 %v9006_v8  ;;  %v10005_v23 = vpop.f32.mrf.mxu0  ;;  %v10015_v26 = vpop.f32.mrf.mxu1 }
 0x232   : > { %8588 = vmatmul.mubr.bf16.gmra.mxu1 %v8980_v17  ;;  %11462 = vst [vmem:[#allocation30_spill] sm:$0xff] %v10005_v23  ;;  %11463 = vst [vmem:[#allocation31_spill] sm:$0xff] %v10015_v26  ;;  %v4753_v17 = vrot.slane %v10034_v3, 5  ;;  %v10050_v3 = vld [vmem:[#allocation3 + $0x28] sm:$0xf]  ;;  %v4756_v26 = vrot.slane %v4653_v13, 5 }
 0x233   : > { %8591 = vmatprep.mubr.bf16.mxu1 %v8981_v45  ;;  %8668 = vmatpush3.bf16.msra.mxu1 %v8997_v1  ;;  %v10017_v38 = vpop.f32.mrf.mxu0  ;;  %v10020_v47 = vpop.f32.mrf.mxu1  ;;  %v4746_v1 = vrot.slane %v4649_v59, 5  ;;  %v8996_v45 = vld [vmem:[#allocation3 + $0xa8] sm:$0xff]   ;;  %v8999_v59 = vld [vmem:[#allocation3 + $0xb4] sm:$0xff]   ;;  %v6616_v29 = vrot.slane %v10050_v3, 5  ;;  %v6517_v3 = vld [vmem:[#allocation3 + $0x30] sm:$0xe] }
 0x234   : > { %8669 = vmatprep.subr.bf16.mxu1 %v9004_v27  ;;  %8810 = vmatpush3.bf16.msra.mxu0 %v9006_v8  ;;  %11464 = vst [vmem:[#allocation32_spill] sm:$0xff] %v10017_v38  ;;  %11465 = vst [vmem:[#allocation33_spill] sm:$0xff] %v10020_v47  ;;  %v8994_v8 = vld [vmem:[#allocation3 + $0x9c] sm:$0xff]   ;;  %v4755_v2 = vrot.slane %v4753_v17, 4 }
 0x235   : > { %8811 = vmatprep.subr.bf16.mxu0 %v9008_v41  ;;  %v10026_v30 = vpop.f32.mrf.mxu1 }
 0x236   : > { %8732 = vmatmul.mubr.bf16.gmra.mxu0 %v8982_v46  ;;  %11468 = vst [vmem:[#allocation36_spill] sm:$0xff] %v10026_v30  ;;  %v4650_v46 = vld [vmem:[#allocation3 + $0x14] sm:$0x1]  ;;  %v10077_v13 = vsel %vm9290_vm10, %v4755_v2, %v4756_v26 }
 0x237   : > { %8670 = vmatpush3.bf16.msra.mxu1 %v9004_v27  ;;  %8735 = vmatprep.mubr.bf16.mxu0 %v8983_v55  ;;  %v4749_v38 = vrot.slane %v4650_v46, 5  ;;  %v9001_v30 = vld [vmem:[#allocation3 + $0xb4] sm:$0xff]  }
 0x238   : > { %8751 = vmatprep.subr.bf16.mxu1 %v10010_v35  ;;  %8812 = vmatpush3.bf16.msra.mxu0 %v9008_v41  ;;  %v4648_v41 = vld [vmem:[#allocation3 + $0xc] sm:$0xe] }
 0x239   : > { %8813 = vmatprep.subr.bf16.mxu0 %v9010_v37  ;;  %v7732_v47 = vrot.slane %v4648_v41, 9  ;;  %v6623_v41 = vrot.slane %v10052_v44, 5 }
 0x23a   : > { %8592 = vmatmul.mubr.bf16.gmra.mxu1 %v8985_v19  ;;  %v10022_v49 = vpop.f32.mrf.mxu0  ;;  %v4748_v19 = vrot.slane %v4746_v1, 4 }
 0x23b   : > { %8595 = vmatprep.mubr.bf16.mxu1 %v8986_v43  ;;  %11466 = vst [vmem:[#allocation34_spill] sm:$0xff] %v10022_v49  ;;  %v6511_v43 = vld [vmem:[#allocation3 + $0x18] sm:$0xe]  ;;  %v6625_v2 = vrot.slane %v6623_v41, 4 }
 0x23c   : > { %8814 = vmatpush3.bf16.msra.mxu0 %v9010_v37  ;;  %v10024_v4 = vpop.f32.mrf.mxu0  ;;  %v8998_v37 = vld [vmem:[#allocation3 + $0xa8] sm:$0xff]   ;;  %v4750_v46 = vsel %vm9290_vm10, %v4748_v19, %v4749_v38  ;;  %v4747_v38 = vsel %vm9290_vm10, %v7732_v47, %v4746_v1  ;;  %v7733_v19 = vrot.slane %v4651_v33, 9  ;;  %v7734_v1 = vrot.slane %v4654_v20, 9  ;;  %v9005_v33 = vld [vmem:[#allocation3 + $0xc0] sm:$0xff]  }
 0x23d   : > { %11467 = vst [vmem:[#allocation35_spill] sm:$0xff] %v10024_v4  ;;  %v10193_v4 = vld [vmem:[#allocation3 + $0x64] sm:$0xf] }
 0x23e   : > { %8736 = vmatmul.mubr.bf16.gmra.mxu0 %v8987_v25  ;;  %v10028_v7 = vpop.f32.mrf.mxu0  ;;  %v10036_v52 = vpop.f32.mrf.mxu1  ;;  %v6513_v25 = vld [vmem:[#allocation3 + $0x20] sm:$0x1]  ;;  %v10093_v26 = vsel %vm9290_vm10, %v7733_v19, %v4753_v17  ;;  %v7870_v19 = vrot.slane %v6517_v3, 9 }
 0x23f   : > { %11469 = vst [vmem:[#allocation37_spill] sm:$0xff] %v10028_v7  ;;  %8739 = vmatprep.mubr.bf16.mxu0 %v8989_v60  ;;  %11471 = vst [vmem:[#allocation39_spill] sm:$0xff] %v10036_v52  ;;  %v10046_v60 = vld [vmem:[#allocation3 + $0x28] sm:$0xf]  ;;  %v6612_v48 = vrot.slane %v6513_v25, 5  ;;  %v7868_v25 = vrot.slane %v6511_v43, 9 }
 0x240   : > { %v10032_v42 = vpop.f32.mrf.mxu0  ;;  %v10044_v55 = vpop.f32.mrf.mxu1  ;;  %v10057_v52 = vld [vmem:[#allocation3 + $0x34] sm:$0xf]  ;;  %v4662_v43 = vld [vmem:[#allocation3 + $0x44] sm:$0x1]  ;;  %v4660_v7 = vld [vmem:[#allocation3 + $0x3c] sm:$0xe] }
 0x241   : > { %11470 = vst [vmem:[#allocation38_spill] sm:$0xff] %v10032_v42  ;;  %11474 = vst [vmem:[#allocation42_spill] sm:$0xff] %v10044_v55  ;;  %v4760_v55 = vrot.slane %v10046_v60, 5  ;;  %v10084_v16 = vsel %vm9290_vm10, %v7868_v25, %v6609_v9  ;;  %v11482_v42 = vrot.slane %v10057_v52, 5 }
 0x242   : > { %8596 = vmatmul.mubr.bf16.gmra.mxu1 %v8991_v6  ;;  %v10038_v5 = vpop.f32.mrf.mxu0 }
 0x243   : > { %8599 = vmatprep.mubr.bf16.mxu1 %v8992_v61  ;;  %11472 = vst [vmem:[#allocation40_spill] sm:$0xff] %v10038_v5  ;;  %v6611_v61 = vrot.slane %v6609_v9, 4  ;;  %v4762_v44 = vrot.slane %v4760_v55, 4  ;;  %v4659_v5 = vld [vmem:[#allocation3 + $0x38] sm:$0x1]  ;;  %v10105_v20 = vsel %vm9290_vm10, %v7734_v1, %v4760_v55  ;;  %v4769_v28 = vrot.slane %v11482_v42, 4 }
 0x244   : > { %v10042_v27 = vpop.f32.mrf.mxu0  ;;  %v10095_v9 = vld [vmem:[#allocation3 + $0x40] sm:$0xf] }
 0x245   : > { %11473 = vst [vmem:[#allocation41_spill] sm:$0xff] %v10042_v27  ;;  %v10070_v60 = vsel %vm9290_vm10, %v6611_v61, %v6612_v48  ;;  %v6519_v27 = vld [vmem:[#allocation3 + $0x38] sm:$0x1]  ;;  %v9003_v48 = vld [vmem:[#allocation3 + $0xc0] sm:$0xff]   ;;  %v7764_v61 = vcombine.low %v4747_v38, %v4750_v46  ;;  %v6618_v46 = vrot.slane %v6616_v29, 4 }
 0x246   : > { %8740 = vmatmul.mubr.bf16.gmra.mxu0 %v8994_v8  ;;  %v10048_v6 = vpop.f32.mrf.mxu0  ;;  %v4657_v38 = vld [vmem:[#allocation3 + $0x30] sm:$0xe] }
 0x247   : > { %11475 = vst [vmem:[#allocation43_spill] sm:$0xff] %v10048_v6  ;;  %8743 = vmatprep.mubr.bf16.mxu0 %v8996_v45  ;;  %v10059_v45 = vpop.f32.mrf.mxu1  ;;  %v4656_v6 = vld [vmem:[#allocation3 + $0x2c] sm:$0x1] }
 0x248   : > { %v10054_v8 = vpop.f32.mrf.mxu0  ;;  %11477 = vst [vmem:[#allocation45_spill] sm:$0xff] %v10059_v45  ;;  %v6514_v45 = vld [vmem:[#allocation3 + $0x24] sm:$0xe] }
 0x249   : > { %11476 = vst [vmem:[#allocation44_spill] sm:$0xff] %v10054_v8  ;;  %v10064_v8 = vld [vmem:[#allocation3 + $0x40] sm:$0xf]  ;;  %v10087_v47 = vpop.f32.mrf.mxu1 }
 0x24a   : > { %8600 = vmatmul.mubr.bf16.gmra.mxu1 %v8998_v37  ;;  %v10066_v37 = vpop.f32.mrf.mxu0  ;;  %11480 = vst [vmem:[#allocation48_spill] sm:$0xff] %v10087_v47  ;;  %v4763_v47 = vrot.slane %v4656_v6, 5  ;;  %v11484_v55 = vrot.slane %v10064_v8, 5 }
 0x24b   : > { %8603 = vmatprep.mubr.bf16.mxu1 %v8999_v59  ;;  %11478 = vst [vmem:[#allocation46_spill] sm:$0xff] %v10066_v37  ;;  %v6516_v59 = vld [vmem:[#allocation3 + $0x2c] sm:$0x1]  ;;  %v10120_v3 = vpop.f32.mrf.mxu1 }
 0x24c   : > { %v10080_v37 = vpop.f32.mrf.mxu0  ;;  %v6619_v17 = vrot.slane %v6516_v59, 5  ;;  %v10115_v6 = vsel %vm9290_vm10, %v4762_v44, %v4763_v47  ;;  %v4776_v1 = vrot.slane %v11484_v55, 4  ;;  %v6630_v59 = vrot.slane %v10095_v9, 5  ;;  %11485 = vst [vmem:[#allocation51_spill] sm:$0xff] %v10120_v3  ;;  %v6520_v47 = vld [vmem:[#allocation3 + $0x3c] sm:$0xe] }
 0x24d   : > { %11479 = vst [vmem:[#allocation47_spill] sm:$0xff] %v10080_v37  ;;  %v7869_v37 = vrot.slane %v6514_v45, 9  ;;  %v6626_v45 = vrot.slane %v6519_v27, 5  ;;  %v4770_v44 = vrot.slane %v4659_v5, 5  ;;  %v4777_v3 = vrot.slane %v4662_v43, 5 }
 0x24e   : > { %8744 = vmatmul.mubr.bf16.gmra.mxu0 %v9001_v30  ;;  %v10097_v25 = vpop.f32.mrf.mxu0  ;;  %v9007_v30 = vld [vmem:[#allocation3 + $0xcc] sm:$0xff]   ;;  %v10144_v5 = vsel %vm9290_vm10, %v7870_v19, %v6623_v41  ;;  %v7736_v27 = vrot.slane %v4660_v7, 9 }
 0x24f   : > { %11481 = vst [vmem:[#allocation49_spill] sm:$0xff] %v10097_v25  ;;  %8747 = vmatprep.mubr.bf16.mxu0 %v9003_v48  ;;  %v10109_v25 = vld [vmem:[#allocation3 + $0x4c] sm:$0xf]  ;;  %v10124_v42 = vsel %vm9290_vm10, %v7869_v37, %v6616_v29  ;;  %v10137_v9 = vsel %vm9290_vm10, %v6625_v2, %v6626_v45  ;;  %v6522_v29 = vld [vmem:[#allocation3 + $0x44] sm:$0x1] }
 0x250   : > { %v10111_v48 = vpop.f32.mrf.mxu0  ;;  %v6525_v2 = vld [vmem:[#allocation3 + $0x50] sm:$0x1]  ;;  %v10159_v37 = vld [vmem:[#allocation3 + $0x58] sm:$0xf] }
 0x251   : > { %11483 = vst [vmem:[#allocation50_spill] sm:$0xff] %v10111_v48  ;;  %v10131_v48 = vld [vmem:[#allocation3 + $0x58] sm:$0xf]  ;;  %v4665_v41 = vld [vmem:[#allocation3 + $0x50] sm:$0x1] }
 0x252   : > { %8604 = vmatmul.mubr.bf16.gmra.mxu1 %v9005_v33  ;;  %v10128_v33 = vsel %vm9290_vm10, %v6618_v46, %v6619_v17  ;;  %v10133_v55 = vpop.f32.mrf.mxu0  ;;  %v7766_v46 = vcombine.low %v10105_v20, %v10115_v6  ;;  %v10148_v17 = vsel %vm9290_vm10, %v4769_v28, %v4770_v44  ;;  %v6632_v20 = vrot.slane %v6630_v59, 4  ;;  %v4663_v6 = vld [vmem:[#allocation3 + $0x48] sm:$0xe]  ;;  %v10161_v28 = vpop.f32.mrf.mxu1 }
 0x253   : > { %8671 = vmatprep.mubr.bf16.mxu1 %v7764_v61  ;;  %11486 = vst [vmem:[#allocation52_spill] sm:$0xff] %v10133_v55  ;;  %v7735_v61 = vrot.slane %v4657_v38, 9  ;;  %v6523_v55 = vld [vmem:[#allocation3 + $0x48] sm:$0xe]  ;;  %v10156_v38 = vsel %vm9290_vm10, %v4776_v1, %v4777_v3  ;;  %v4788_v19 = vrot.slane %v10131_v48, 5  ;;  %11488 = vst [vmem:[#allocation54_spill] sm:$0xff] %v10161_v28 }
 0x254   : > { %v10150_v45 = vpop.f32.mrf.mxu0  ;;  %v11489_v44 = vrot.slane %v10057_v52, 5  ;;  %v11490_v1 = vrot.slane %v10064_v8, 5  ;;  %v11491_v48 = vrot.slane %v10101_v34, 5  ;;  %v4666_v28 = vld [vmem:[#allocation3 + $0x54] sm:$0xe]  ;;  %v11493_v52 = vcombine.low %v10084_v16, %v10070_v60  ;;  %v9011_v8 = vld [vmem:[%s11425_s3 + $0x1f0] sm:$0xff]  }
 0x255   : > { %11487 = vst [vmem:[#allocation53_spill] sm:$0xff] %v10150_v45  ;;  %v7872_v51 = vrot.slane %v6523_v55, 9  ;;  %v6640_v16 = vrot.slane %v6525_v2, 5  ;;  %v6651_v55 = vrot.slane %v10179_v63, 5  ;;  %v10210_v2 = vpop.f32.mrf.mxu1  ;;  %v9012_v63 = vld [vmem:[%s11425_s3 + $0x1e8] sm:$0xff]   ;;  %v11500_v60 = vrot.slane %v10109_v25, 5 }
 0x256   : > { %8748 = vmatmul.mubr.bf16.gmra.mxu0 %v9007_v30  ;;  %v10169_v43 = vsel %vm9290_vm10, %v7735_v61, %v11489_v44  ;;  %v10175_v3 = vsel %vm9290_vm10, %v7736_v27, %v11490_v1  ;;  %v6639_v45 = vrot.slane %v11491_v48, 4  ;;  %v4668_v30 = vld [vmem:[#allocation3 + $0x5c] sm:$0x1]  ;;  %v10181_v7 = vpop.f32.mrf.mxu0  ;;  %v7871_v61 = vrot.slane %v6520_v47, 9  ;;  %11497 = vst [vmem:[#allocation57_spill] sm:$0xff] %v10210_v2 }
 0x257   : > { %11492 = vst [vmem:[#allocation55_spill] sm:$0xff] %v10181_v7  ;;  %8815 = vmatprep.mubr.bf16.mxu0 %v11493_v52  ;;  %v6633_v44 = vrot.slane %v6522_v29, 5  ;;  %v11494_v1 = vrot.slane %v10109_v25, 5  ;;  %v10198_v52 = vld [vmem:[#allocation3 + $0x70] sm:$0xf]  ;;  %v11496_v47 = vcombine.low %v10093_v26, %v10077_v13  ;;  %v4790_v27 = vrot.slane %v4788_v19, 4 }
 0x258   : > { %v10200_v49 = vpop.f32.mrf.mxu0  ;;  %v10215_v7 = vsel %vm9290_vm10, %v7871_v61, %v6630_v59  ;;  %v10219_v13 = vsel %vm9290_vm10, %v6639_v45, %v6640_v16  ;;  %v7737_v26 = vrot.slane %v4663_v6, 9  ;;  %v7738_v59 = vrot.slane %v4666_v28, 9  ;;  %v6531_v45 = vld [vmem:[#allocation3 + $0x68] sm:$0x1]  ;;  %v10248_v6 = vld [vmem:[#allocation3 + $0x70] sm:$0xf] }
 0x259   : > { %v4783_v48 = vrot.slane %v11494_v1, 4  ;;  %11495 = vst [vmem:[#allocation56_spill] sm:$0xff] %v10200_v49  ;;  %v10207_v29 = vsel %vm9290_vm10, %v6632_v20, %v6633_v44  ;;  %v4784_v1 = vrot.slane %v4665_v41, 5  ;;  %v6528_v20 = vld [vmem:[#allocation3 + $0x5c] sm:$0x1]  ;;  %v11499_v16 = vrot.slane %v10101_v34, 5 }
 0x25a   : > { %8672 = vmatmul.mubr.bf16.vlgmr.msra.gmra.mxu1 %v11496_v47  ;;  %v6529_v41 = vld [vmem:[#allocation3 + $0x60] sm:$0xe]  ;;  %v10222_v47 = vpop.f32.mrf.mxu0  ;;  %v11501_v28 = vrot.slane %v10159_v37, 5  ;;  %v10254_v34 = vsel %vm9290_vm10, %v7738_v59, %v4788_v19  ;;  %v6653_v25 = vrot.slane %v6651_v55, 4  ;;  %v11504_v61 = vcombine.low %v10124_v42, %v10128_v33  ;;  %v6535_v19 = vld [vmem:[#allocation3 + $0x78] sm:$0xe] }
 0x25b   : > { %8752 = vmatpush3.bf16.msra.mxu1 %v10010_v35  ;;  %8675 = vmatprep.mubr.bf16.mxu1 %v7766_v46  ;;  %11498 = vst [vmem:[#allocation58_spill] sm:$0xff] %v10222_v47  ;;  %v10229_v35 = vsel %vm9290_vm10, %v4783_v48, %v4784_v1  ;;  %v4791_v46 = vrot.slane %v4668_v30, 5  ;;  %v10238_v44 = vsel %vm9290_vm10, %v7872_v51, %v11499_v16  ;;  %v4671_v1 = vld [vmem:[#allocation3 + $0x68] sm:$0x1]  ;;  %v10260_v16 = vld [vmem:[#allocation3 + $0x7c] sm:$0xf] }
 0x25c   : > { %8753 = vmatprep.subr.bf16.mxu1 %v9011_v8  ;;  %v10244_v48 = vsel %vm9290_vm10, %v7737_v26, %v11500_v60  ;;  %v6646_v30 = vrot.slane %v11501_v28, 4  ;;  %v4669_v60 = vld [vmem:[#allocation3 + $0x60] sm:$0xe]  ;;  %v4672_v26 = vld [vmem:[#allocation3 + $0x6c] sm:$0xe]  ;;  %v10262_v28 = vpop.f32.mrf.mxu1  ;;  %v10264_v47 = vpop.f32.mrf.mxu0  ;;  %v7873_v59 = vrot.slane %v6526_v18, 9 }
 0x25d   : > { %v10258_v51 = vsel %vm9290_vm10, %v4790_v27, %v4791_v46  ;;  %11502 = vst [vmem:[#allocation59_spill] sm:$0xff] %v10262_v28  ;;  %11503 = vst [vmem:[#allocation60_spill] sm:$0xff] %v10264_v47  ;;  %v6647_v27 = vrot.slane %v6528_v20, 5  ;;  %v9013_v46 = vld [vmem:[%s11425_s3 + $0x1e0] sm:$0xff]   ;;  %v11505_v2 = vrot.slane %v10193_v4, 5  ;;  %v11506_v47 = vcombine.low %v10144_v5, %v10137_v9 }
 0x25e   : > { %8816 = vmatmul.mubr.bf16.vlgmr.msra.gmra.mxu0 %v11504_v61  ;;  %v4674_v28 = vld [vmem:[#allocation3 + $0x74] sm:$0x1]  ;;  %v7874_v42 = vrot.slane %v6529_v41, 9  ;;  %v6654_v33 = vrot.slane %v6531_v45, 5  ;;  %v6658_v18 = vrot.slane %v10248_v6, 5  ;;  %v4798_v40 = vrot.slane %v4671_v1, 5  ;;  %v10310_v5 = vpop.f32.mrf.mxu1 }
 0x25f   : > { %8754 = vmatpush3.bf16.msra.mxu1 %v9011_v8  ;;  %v4797_v49 = vrot.slane %v11505_v2, 4  ;;  %8819 = vmatprep.mubr.bf16.mxu0 %v11506_v47  ;;  %v11507_v8 = vrot.slane %v10198_v52, 5  ;;  %v10282_v20 = vld [vmem:[#allocation3 + $0x7c] sm:$0xf]  ;;  %v10288_v2 = vsel %vm9290_vm10, %v6646_v30, %v6647_v27  ;;  %v6532_v9 = vld [vmem:[#allocation3 + $0x6c] sm:$0xe]  ;;  %v11508_v47 = vcombine.low %v10169_v43, %v10148_v17  ;;  %v10312_v17 = vpop.f32.mrf.mxu0 }
 0x260   : > { %8755 = vmatprep.subr.bf16.mxu1 %v9012_v63  ;;  %v10291_v41 = vld [vmem:[#allocation3 + $0x88] sm:$0xf]  ;;  %v11509_v45 = vrot.slane %v10159_v37, 5  ;;  %v10304_v30 = vsel %vm9290_vm10, %v7874_v42, %v6651_v55  ;;  %v10308_v1 = vsel %vm9290_vm10, %v6653_v25, %v6654_v33  ;;  %v4805_v27 = vrot.slane %v4674_v28, 5  ;;  %11510 = vst [vmem:[#allocation61_spill] sm:$0xff] %v10312_v17 }
 0x261   : > { %v4804_v61 = vrot.slane %v11507_v8, 4  ;;  %v6534_v8 = vld [vmem:[#allocation3 + $0x74] sm:$0x1]  ;;  %v11511_v37 = vcombine.low %v10175_v3, %v10156_v38  ;;  %v7739_v43 = vrot.slane %v4669_v60, 9  ;;  %v10319_v55 = vsel %vm9290_vm10, %v4797_v49, %v4798_v40  ;;  %v6537_v25 = vld [vmem:[#allocation3 + $0x80] sm:$0x1]  ;;  %v10358_v53 = vpop.f32.mrf.mxu0 }
 0x262   : > { %8676 = vmatmul.mubr.bf16.gmra.mxu1 %v11508_v47  ;;  %v10300_v6 = vsel %vm9290_vm10, %v7873_v59, %v11509_v45  ;;  %v7740_v59 = vrot.slane %v4672_v26, 9  ;;  %v9014_v28 = vld [vmem:[%s11425_s3 + $0x1d8] sm:$0xff]   ;;  %v4809_v42 = vrot.slane %v10282_v20, 5  ;;  %v6660_v3 = vrot.slane %v6658_v18, 4  ;;  %v4677_v40 = vld [vmem:[#allocation3 + $0x80] sm:$0x1] }
 0x263   : > { %8679 = vmatprep.mubr.bf16.mxu1 %v11511_v37  ;;  %8756 = vmatpush3.bf16.msra.mxu1 %v9012_v63  ;;  %v10329_v38 = vsel %vm9290_vm10, %v4804_v61, %v4805_v27  ;;  %v4675_v63 = vld [vmem:[#allocation3 + $0x78] sm:$0xe]  ;;  %v4816_v49 = vrot.slane %v10291_v41, 5  ;;  %v10332_v60 = vld [vmem:[#allocation3 + $0x88] sm:$0xf]  ;;  %v11512_v20 = vrot.slane %v10193_v4, 5 }
 0x264   : > { %8757 = vmatprep.subr.bf16.mxu1 %v9013_v46  ;;  %v11513_v45 = vrot.slane %v10198_v52, 5  ;;  %v11514_v27 = vrot.slane %v10260_v16, 5  ;;  %v4678_v37 = vld [vmem:[#allocation3 + $0x84] sm:$0xe]  ;;  %v4680_v33 = vld [vmem:[#allocation3 + $0x8c] sm:$0x1]  ;;  %v10356_v52 = vpop.f32.mrf.mxu1 }
 0x265   : > { %v10340_v47 = vsel %vm9290_vm10, %v7739_v43, %v11512_v20  ;;  %v10350_v17 = vld [vmem:[#allocation3 + $0x94] sm:$0xf]  ;;  %v7875_v26 = vrot.slane %v6532_v9, 9  ;;  %v6661_v23 = vrot.slane %v6534_v8, 5  ;;  %v7876_v43 = vrot.slane %v6535_v19, 9  ;;  %11515 = vst [vmem:[#allocation62_spill] sm:$0xff] %v10358_v53 }
 0x266   : > { %v10346_v61 = vsel %vm9290_vm10, %v7740_v59, %v11513_v45  ;;  %v6667_v41 = vrot.slane %v11514_v27, 4  ;;  %v10354_v20 = vld [vmem:[#allocation3 + $0x94] sm:$0xf]  ;;  %v11516_v59 = vcombine.low %v10215_v7, %v10207_v29  ;;  %v6668_v27 = vrot.slane %v6537_v25, 5  ;;  %v10366_v8 = vld [vmem:[#allocation3 + $0xa0] sm:$0xf] }
 0x267   : > { %8758 = vmatpush3.bf16.msra.mxu1 %v9013_v46  ;;  %v4811_v56 = vrot.slane %v4809_v42, 4  ;;  %v6672_v9 = vrot.slane %v10332_v60, 5  ;;  %v11517_v19 = vcombine.low %v10238_v44, %v10219_v13  ;;  %v10373_v4 = vsel %vm9290_vm10, %v7875_v26, %v6658_v18  ;;  %v6538_v46 = vld [vmem:[#allocation3 + $0x84] sm:$0xe]  ;;  %v6540_v26 = vld [vmem:[#allocation3 + $0x8c] sm:$0x1] }
 0x268   : > { %8820 = vmatmul.mubr.bf16.gmra.mxu0 %v11516_v59  ;;  %v10377_v7 = vsel %vm9290_vm10, %v6660_v3, %v6661_v23  ;;  %8759 = vmatprep.subr.bf16.mxu1 %v9014_v28  ;;  %v4818_v29 = vrot.slane %v4816_v49, 4  ;;  %v6679_v25 = vrot.slane %v10350_v17, 5  ;;  %v9015_v60 = vld [vmem:[%s11425_s3 + $0x1d0] sm:$0xff]   ;;  %v10385_v13 = vsel %vm9290_vm10, %v6667_v41, %v6668_v27  ;;  %v6541_v53 = vld [vmem:[#allocation3 + $0x90] sm:$0xe]  ;;  %v10402_v27 = vpop.f32.mrf.mxu0 }
 0x269   : > { %8823 = vmatprep.mubr.bf16.mxu0 %v11517_v19  ;;  %v7741_v44 = vrot.slane %v4675_v63, 9  ;;  %v4812_v18 = vrot.slane %v4677_v40, 5  ;;  %v11428_v59 = vrot.slane %v10354_v20, 5  ;;  %v11518_v23 = vcombine.low %v10244_v48, %v10229_v35  ;;  %v10398_v63 = vld [vmem:[#allocation3 + $0xa0] sm:$0xf]  ;;  %v10400_v40 = vpop.f32.mrf.mxu1  ;;  %11520 = vst [vmem:[#allocation63_spill] sm:$0xff] %v10402_v27 }
 0x26a   : > { %v11519_v3 = vrot.slane %v10260_v16, 5  ;;  %v7742_v19 = vrot.slane %v4678_v37, 9  ;;  %v4819_v45 = vrot.slane %v4680_v33, 5  ;;  %v11429_v41 = vrot.slane %v10366_v8, 5  ;;  %v4686_v48 = vld [vmem:[#allocation3 + $0xa4] sm:$0x1] }
 0x26b   : > { %8680 = vmatmul.mubr.bf16.gmra.mxu1 %v11518_v23  ;;  %v11521_v35 = vcombine.low %v10254_v34, %v10258_v51  ;;  %v10411_v16 = vsel %vm9290_vm10, %v7741_v44, %v4809_v42  ;;  %v10415_v33 = vsel %vm9290_vm10, %v4811_v56, %v4812_v18  ;;  %v6674_v37 = vrot.slane %v6672_v9, 4  ;;  %v10417_v23 = vld [vmem:[#allocation3 + $0xac] sm:$0xf]  ;;  %v4681_v56 = vld [vmem:[#allocation3 + $0x90] sm:$0xe]  ;;  %v10440_v31 = vpop.f32.mrf.mxu1 }
 0x26c   : > { %v10395_v17 = vsel %vm9290_vm10, %v7876_v43, %v11519_v3  ;;  %8760 = vmatpush3.bf16.msra.mxu1 %v9014_v28  ;;  %v6543_v43 = vld [vmem:[#allocation3 + $0x98] sm:$0x1]  ;;  %v10423_v51 = vsel %vm9290_vm10, %v7742_v19, %v4816_v49  ;;  %v10427_v42 = vsel %vm9290_vm10, %v4818_v29, %v4819_v45  ;;  %v6681_v44 = vrot.slane %v6679_v25, 4  ;;  %v4684_v19 = vld [vmem:[#allocation3 + $0x9c] sm:$0xe]  ;;  %11522 = vst [vmem:[#allocation64_spill] sm:$0xff] %v10440_v31 }
 0x26d   : > { %8683 = vmatprep.mubr.bf16.mxu1 %v11521_v35  ;;  %8761 = vmatprep.subr.bf16.mxu1 %v9015_v60  ;;  %v4683_v18 = vld [vmem:[#allocation3 + $0x98] sm:$0x1]  ;;  %v7877_v3 = vrot.slane %v6538_v46, 9  ;;  %v6675_v35 = vrot.slane %v6540_v26, 5  ;;  %v4825_v34 = vrot.slane %v11428_v59, 4  ;;  %v6686_v49 = vrot.slane %v10398_v63, 5  ;;  %v10442_v46 = vpop.f32.mrf.mxu0 }
 0x26e   : > { %v9016_v28 = vld [vmem:[%s11425_s3 + $0x1c8] sm:$0xff]   ;;  %v6682_v29 = vrot.slane %v6543_v43, 5  ;;  %v4832_v27 = vrot.slane %v11429_v41, 4  ;;  %v6693_v0 = vrot.slane %v10417_v23, 5  ;;  %11523 = vst [vmem:[#allocation65_spill] sm:$0xff] %v10442_v46  ;;  %v11524_v26 = vcombine.low %v10300_v6, %v10288_v2 }
 0x26f   : > { %v10451_v43 = vsel %vm9290_vm10, %v6674_v37, %v6675_v35  ;;  %v7878_v45 = vrot.slane %v6541_v53, 9  ;;  %v4826_v59 = vrot.slane %v4683_v18, 5  ;;  %v6544_v41 = vld [vmem:[#allocation3 + $0x9c] sm:$0xe]  ;;  %v6546_v23 = vld [vmem:[#allocation3 + $0xa4] sm:$0x1]  ;;  %v11525_v31 = vcombine.low %v10304_v30, %v10308_v1 }
 0x270   : > { %8824 = vmatmul.mubr.bf16.gmra.mxu0 %v11524_v26  ;;  %8762 = vmatpush3.bf16.msra.mxu1 %v9015_v60  ;;  %v10458_v2 = vsel %vm9290_vm10, %v7877_v3, %v6672_v9  ;;  %v10462_v6 = vsel %vm9290_vm10, %v6681_v44, %v6682_v29  ;;  %v7743_v26 = vrot.slane %v4681_v56, 9  ;;  %v4833_v37 = vrot.slane %v4686_v48, 5  ;;  %v4688_v53 = vld [vmem:[#allocation3 + $0xac] sm:$0xf]  ;;  %v9017_v60 = vld [vmem:[%s11425_s3 + $0x1c0] sm:$0xff]   ;;  %v10490_v29 = vpop.f32.mrf.mxu1 }
 0x271   : > { %8827 = vmatprep.mubr.bf16.mxu0 %v11525_v31  ;;  %8763 = vmatprep.subr.bf16.mxu1 %v9016_v28  ;;  %v10469_v30 = vsel %vm9290_vm10, %v7878_v45, %v6679_v25  ;;  %v10473_v31 = vsel %vm9290_vm10, %v4825_v34, %v4826_v59  ;;  %v7744_v1 = vrot.slane %v4684_v19, 9  ;;  %v6688_v9 = vrot.slane %v6686_v49, 4  ;;  %v6547_v44 = vld [vmem:[#allocation3 + $0xa8] sm:$0xe]  ;;  %v6549_v18 = vld [vmem:[#allocation3 + $0xb0] sm:$0x1] }
 0x272   : > { %v11526_v48 = vcombine.low %v10340_v47, %v10319_v55  ;;  %v11527_v3 = vrot.slane %v10354_v20, 5  ;;  %v10488_v59 = vsel %vm9290_vm10, %v4832_v27, %v4833_v37  ;;  %v6695_v34 = vrot.slane %v6693_v0, 4  ;;  %v4687_v35 = vld [vmem:[#allocation3 + $0xa8] sm:$0xe]  ;;  %v4691_v45 = vld [vmem:[#allocation3 + $0xb8] sm:$0xf]  ;;  %v10492_v55 = vpop.f32.mrf.mxu0  ;;  %v10527_v27 = vpop.f32.mrf.mxu1 }
 0x273   : > { %11528 = vst [vmem:[#allocation66_spill] sm:$0xff] %v10492_v55  ;;  %v11529_v47 = vcombine.low %v10346_v61, %v10329_v38  ;;  %v7879_v19 = vrot.slane %v6544_v41, 9  ;;  %v11530_v37 = vrot.slane %v10366_v8, 5  ;;  %v7880_v63 = vrot.slane %v6547_v44, 9  ;;  %v4690_v61 = vld [vmem:[#allocation3 + $0xb4] sm:$0xe] }
 0x274   : > { %8684 = vmatmul.mubr.bf16.gmra.mxu1 %v11526_v48  ;;  %v10484_v25 = vsel %vm9290_vm10, %v7743_v26, %v11527_v3  ;;  %v6689_v26 = vrot.slane %v6546_v23, 5  ;;  %v4689_v48 = vld [vmem:[#allocation3 + $0xb0] sm:$0x1]  ;;  %v4837_v3 = vrot.slane %v4688_v53, 5  ;;  %v6696_v38 = vrot.slane %v6549_v18, 5  ;;  %v10557_v24 = vpop.f32.mrf.mxu1 }
 0x275   : > { %8687 = vmatprep.mubr.bf16.mxu1 %v11529_v47  ;;  %8764 = vmatpush3.bf16.msra.mxu1 %v9016_v28  ;;  %v10505_v56 = vsel %vm9290_vm10, %v7744_v1, %v11530_v37  ;;  %v5694_v47 = vld [vmem:[#allocation3 + $0x1c] sm:$0xf]  ;;  %v10511_v28 = vsel %vm9290_vm10, %v7879_v19, %v6686_v49  ;;  %v4844_v8 = vrot.slane %v4691_v45, 5  ;;  %v10517_v53 = vld [vmem:[#allocation3 + $0xb8] sm:$0xf]  ;;  %v10521_v44 = vsel %vm9290_vm10, %v7880_v63, %v6693_v0 }
 0x276   : > { %8765 = vmatprep.subr.bf16.mxu1 %v9017_v60  ;;  %v10515_v23 = vsel %vm9290_vm10, %v6688_v9, %v6689_v26  ;;  %v5693_v1 = vld [vmem:[#allocation3 + $0x18] sm:$0xf]  ;;  %v10525_v18 = vsel %vm9290_vm10, %v6695_v34, %v6696_v38  ;;  %v7745_v37 = vrot.slane %v4687_v35, 9  ;;  %v4840_v41 = vrot.slane %v4689_v48, 5  ;;  %v4692_v49 = vld [vmem:[#allocation3 + $0xbc] sm:$0x1]  ;;  %v10529_v9 = vpop.f32.mrf.mxu0 }
 0x277   : > { %v6554_v19 = vld [vmem:[#allocation3 + $0xc4] sm:$0xf]  ;;  %11531 = vst [vmem:[#allocation67_spill] sm:$0xff] %v10529_v9  ;;  %v11532_v45 = vcombine.low %v10373_v4, %v10377_v7  ;;  %v4839_v26 = vrot.slane %v4837_v3, 4  ;;  %v7746_v20 = vrot.slane %v4690_v61, 9  ;;  %v5751_v63 = vshll.u32 %v5694_v47, 16 }
 0x278   : > { %v10534_v0 = vld [vmem:[#allocation3 + $0xb4] sm:$0xe]  ;;  %v5755_v34 = vshrl.u32 %v5694_v47, 16  ;;  %v5696_v38 = vld [vmem:[#allocation3 + $0x24] sm:$0xf]  ;;  %v11533_v35 = vcombine.low %v10395_v17, %v10385_v13  ;;  %v5742_v4 = vshrl.u32 %v5693_v1, 16  ;;  %v2718_v22 = vadd.f32 %v10356_v52, %v9878_v57 }
 0x279   : > { %8828 = vmatmul.mubr.bf16.gmra.mxu0 %v11532_v45  ;;  %8766 = vmatpush3.bf16.msra.mxu1 %v9017_v60  ;;  %v6553_v55 = vld [vmem:[#allocation3 + $0xc0] sm:$0xe]  ;;  %v5745_v7 = vshll.u32 %v5693_v1, 16  ;;  %v10546_v60 = vsel %vm9290_vm10, %v7745_v37, %v4837_v3  ;;  %v10550_v47 = vsel %vm9290_vm10, %v7746_v20, %v4844_v8  ;;  %v6555_v13 = vld [vmem:[#allocation3 + $0xc8] sm:$0x1]  ;;  %v6707_v17 = vrot.slane %v6554_v19, 5  ;;  %v10559_v3 = vpop.f32.mrf.mxu0 }
 0x27a   : > { %8831 = vmatprep.mubr.bf16.mxu0 %v11533_v35  ;;  %v10552_v45 = vld [vmem:[#allocation3 + $0xc4] sm:$0xf]  ;;  %v11534_v35 = vcombine.low %v10411_v16, %v10415_v33  ;;  %v4846_v1 = vrot.slane %v4844_v8, 4  ;;  %v4847_v48 = vrot.slane %v4692_v49, 5  ;;  %v5697_v9 = vld [vmem:[#allocation3 + $0x28] sm:$0xf]  ;;  %v11537_v20 = vcombine.low %v10423_v51, %v10427_v42 }
 0x27b   : > { %v5766_v61 = vshrl.u32 %v5696_v38, 16  ;;  %v5769_v46 = vshll.u32 %v5696_v38, 16  ;;  %11535 = vst [vmem:[#allocation68_spill] sm:$0xff] %v10557_v24  ;;  %11536 = vst [vmem:[#allocation69_spill] sm:$0xff] %v10559_v3  ;;  %v10566_v37 = vsel %vm9290_vm10, %v4839_v26, %v4840_v41  ;;  %v6552_v19 = vld [vmem:[#allocation3 + $0xbc] sm:$0x1]  ;;  %v2724_v57 = vadd.f32 %v10490_v29, %v9892_v21 }
 0x27c   : > { %8688 = vmatmul.mubr.bf16.gmra.mxu1 %v11534_v35  ;;  %v7882_v16 = vrot.slane %v6553_v55, 9  ;;  %v10568_v33 = vrot.slane %v5751_v63, 5  ;;  %v5757_v8 = vrot.slane %v5755_v34, 4  ;;  %v7881_v49 = vrot.slane %v10534_v0, 9  ;;  %v4695_v42 = vld [vmem:[#allocation3 + $0xc8] sm:$0x1]  ;;  %v10574_v34 = vpop.f32.mrf.mxu1  ;;  %v10576_v0 = vpop.f32.mrf.mxu0 }
 0x27d   : > { %8691 = vmatprep.mubr.bf16.mxu1 %v11537_v20  ;;  %v11538_v38 = vrot.slane %v10517_v53, 5  ;;  %v5744_v3 = vrot.slane %v5742_v4, 4  ;;  %v5747_v15 = vrot.slane %v5745_v7, 5  ;;  %v6709_v10 = vrot.slane %v6707_v17, 4  ;;  %11539 = vst [vmem:[#allocation70_spill] sm:$0xff] %v10574_v34  ;;  %11540 = vst [vmem:[#allocation71_spill] sm:$0xff] %v10576_v0 }
 0x27e   : > { %v6710_v51 = vrot.slane %v6555_v13, 5  ;;  %v4851_v20 = vrot.slane %v10552_v45, 5  ;;  %v5775_v41 = vshll.u32 %v5697_v9, 16  ;;  %v6703_v26 = vrot.slane %v6552_v19, 5  ;;  %v11571_v29 = vld [vmem:[#allocation19_spill] sm:$0xff] }
 0x27f   : > { %v6702_v35 = vrot.slane %v11538_v38, 4  ;;  %v5768_v55 = vrot.slane %v5766_v61, 4  ;;  %v5771_v63 = vrot.slane %v5769_v46, 5  ;;  %v5779_v24 = vshrl.u32 %v5697_v9, 16  ;;  %v5699_v9 = vld [vmem:[#allocation3 + $0x30] sm:$0xf] }
 0x280   : > { %v11541_v38 = vcombine.low %v10458_v2, %v10451_v43  ;;  %v7777_v4 = vcombine.low %v10546_v60, %v10566_v37  ;;  %v10585_v7 = vsel %vm9290_vm10, %v4846_v1, %v4847_v48  ;;  %v10589_v61 = vsel %vm9290_vm10, %v7882_v16, %v6707_v17  ;;  %v5700_v48 = vld [vmem:[#allocation3 + $0x34] sm:$0xf] }
 0x281   : > { %v5758_v46 = vor.u32 %v5757_v8, %v10568_v33  ;;  %v11542_v13 = vcombine.low %v10469_v30, %v10462_v6  ;;  %v10597_v43 = vsel %vm9290_vm10, %v6702_v35, %v6703_v26  ;;  %v7747_v2 = vrot.slane %v4693_v62, 9  ;;  %v5698_v30 = vld [vmem:[#allocation3 + $0x2c] sm:$0x1] }
 0x282   : > { %8832 = vmatmul.mubr.bf16.gmra.mxu0 %v11541_v38  ;;  %v4854_v60 = vrot.slane %v4695_v42, 5  ;;  %v5748_v45 = vor.u32 %v5747_v15, %v5744_v3  ;;  %v10601_v1 = vsel %vm9290_vm10, %v6709_v10, %v6710_v51  ;;  %v4853_v17 = vrot.slane %v4851_v20, 4  ;;  %v10608_v42 = vpop.f32.mrf.mxu1  ;;  %v10610_v15 = vpop.f32.mrf.mxu0  ;;  %v5701_v38 = vld [vmem:[#allocation3 + $0x38] sm:$0x1] }
 0x283   : > { %8835 = vmatprep.mubr.bf16.mxu0 %v11542_v13  ;;  %v5761_v37 = vshll.u32 %v5695_v54, 16  ;;  %v10603_v19 = vrot.slane %v5775_v41, 5  ;;  %v11543_v6 = vcombine.low %v10484_v25, %v10473_v31  ;;  %v5772_v16 = vor.u32 %v5771_v63, %v5768_v55  ;;  %11544 = vst [vmem:[#allocation72_spill] sm:$0xff] %v10610_v15  ;;  %v5703_v13 = vld [vmem:[#allocation3 + $0x40] sm:$0xf] }
 0x284   : > { %v5781_v8 = vrot.slane %v5779_v24, 4  ;;  %v5790_v35 = vshrl.u32 %v5699_v9, 16  ;;  %v5793_v62 = vshll.u32 %v5699_v9, 16  ;;  %v11545_v10 = vcombine.low %v10505_v56, %v10488_v59  ;;  %v5702_v59 = vld [vmem:[#allocation3 + $0x3c] sm:$0xf] }
 0x285   : > { %8692 = vmatmul.mubr.bf16.gmra.mxu1 %v11543_v6  ;;  %v11546_v54 = vrot.slane %v10517_v53, 5  ;;  %v5759_v31 = vrot.slane %v5758_v46, 4  ;;  %v5799_v25 = vshll.u32 %v5700_v48, 16  ;;  %v5803_v51 = vshrl.u32 %v5700_v48, 16  ;;  %v5707_v53 = vld [vmem:[#allocation3 + $0x50] sm:$0x1] }
 0x286   : > { %8695 = vmatprep.mubr.bf16.mxu1 %v11545_v10  ;;  %v7778_v24 = vcombine.low %v10550_v47, %v10585_v7  ;;  %v10627_v26 = vsel %vm9290_vm10, %v7747_v2, %v4851_v20  ;;  %v5749_v56 = vrot.slane %v5748_v45, 4  ;;  %v5763_v55 = vrot.slane %v5761_v37, 5  ;;  %v10635_v47 = vld [vmem:[#allocation3 + $0xd0] sm:$0xf]  ;;  %v10640_v2 = vpop.f32.mrf.mxu1  ;;  %v10642_v45 = vpop.f32.mrf.mxu0 }
 0x287   : > { %v10619_v3 = vsel %vm9290_vm10, %v7881_v49, %v11546_v54  ;;  %v10633_v49 = vsel %vm9290_vm10, %v4853_v17, %v4854_v60  ;;  %v5785_v63 = vshll.u32 %v5698_v30, 16  ;;  %v10637_v7 = vrot.slane %v5772_v16, 4  ;;  %11547 = vst [vmem:[#allocation73_spill] sm:$0xff] %v10642_v45  ;;  %v5706_v30 = vld [vmem:[#allocation3 + $0x4c] sm:$0xf] }
 0x288   : > { %v5782_v46 = vor.u32 %v5781_v8, %v10603_v19  ;;  %v5792_v20 = vrot.slane %v5790_v35, 4  ;;  %v5795_v9 = vrot.slane %v5793_v62, 5  ;;  %v11548_v60 = vcombine.low %v10511_v28, %v10515_v23  ;;  %v6556_v35 = vld [vmem:[#allocation3 + $0xcc] sm:$0xe] }
 0x289   : > { %v5764_v48 = vsel %vm9322_vm13, %v5759_v31, %v5763_v55  ;;  %v10649_v17 = vrot.slane %v5799_v25, 5  ;;  %v5805_v37 = vrot.slane %v5803_v51, 4  ;;  %v5814_v6 = vshrl.u32 %v5702_v59, 16  ;;  %v6558_v51 = vld [vmem:[#allocation3 + $0xd4] sm:$0x1] }
 0x28a   : > { %8836 = vmatmul.mubr.bf16.gmra.mxu0 %v11548_v60  ;;  %v11549_v16 = vcombine.low %v10521_v44, %v10525_v18  ;;  %v7779_v8 = vcombine.low %v10627_v26, %v10633_v49  ;;  %v5754_v28 = vsel %vm9322_vm13, %v5749_v56, %v10568_v33  ;;  %v5817_v23 = vshll.u32 %v5702_v59, 16  ;;  %v5705_v55 = vld [vmem:[#allocation3 + $0x48] sm:$0xf]  ;;  %v10662_v49 = vpop.f32.mrf.mxu1 }
 0x28b   : > { %v6714_v62 = vrot.slane %v10635_v47, 5  ;;  %v10660_v10 = vrot.slane %v5785_v63, 5  ;;  %v5809_v54 = vshll.u32 %v5701_v38, 16  ;;  %v5823_v31 = vshll.u32 %v5703_v13, 16  ;;  %v5704_v38 = vld [vmem:[#allocation3 + $0x44] sm:$0x1] }
 0x28c   : > { %8839 = vmatprep.mubr.bf16.mxu0 %v11549_v16  ;;  %v5827_v25 = vshrl.u32 %v5703_v13, 16  ;;  %v7844_v44 = vcombine.low %v5754_v28, %v5764_v48  ;;  %v5796_v18 = vor.u32 %v5795_v9, %v5792_v20  ;;  %v5847_v60 = vshll.u32 %v5706_v30, 16  ;;  %v10664_v16 = vpop.f32.mrf.mxu0 }
 0x28d   : > { %8696 = vmatmul.mubr.bf16.gmra.mxu1 %v7777_v4  ;;  %v5851_v26 = vshrl.u32 %v5706_v30, 16  ;;  %11550 = vst [vmem:[#allocation74_spill] sm:$0xff] %v10664_v16  ;;  %v5778_v33 = vsel %vm9322_vm13, %v10637_v7, %v10603_v19  ;;  %v5783_v56 = vrot.slane %v5782_v46, 4  ;;  %v5806_v59 = vor.u32 %v5805_v37, %v10649_v17  ;;  %v5708_v4 = vld [vmem:[#allocation3 + $0x54] sm:$0xf]  ;;  %v10675_v46 = vpop.f32.mrf.mxu1 }
 0x28e   : > { %8699 = vmatprep.mubr.bf16.mxu1 %v7778_v24  ;;  %v5816_v63 = vrot.slane %v5814_v6, 4  ;;  %v5819_v47 = vrot.slane %v5817_v23, 5  ;;  %v7883_v20 = vrot.slane %v6556_v35, 9  ;;  %v6716_v9 = vrot.slane %v6714_v62, 4  ;;  %11551 = vst [vmem:[#allocation75_spill] sm:$0xff] %v10675_v46  ;;  %v10677_v37 = vpop.f32.mrf.mxu0 }
 0x28f   : > { %v6717_v13 = vrot.slane %v6558_v51, 5  ;;  %v10671_v48 = vrot.slane %v5823_v31, 5  ;;  %v5829_v30 = vrot.slane %v5827_v25, 4  ;;  %v5838_v28 = vshrl.u32 %v5705_v55, 16  ;;  %11552 = vst [vmem:[#allocation76_spill] sm:$0xff] %v10677_v37 }
 0x290   : > { %v5841_v24 = vshll.u32 %v5705_v55, 16  ;;  %v10673_v41 = vrot.slane %v5847_v60, 5  ;;  %v5853_v45 = vrot.slane %v5851_v26, 4  ;;  %v5862_v19 = vshrl.u32 %v5708_v4, 16  ;;  %v5709_v51 = vld [vmem:[#allocation3 + $0x58] sm:$0xf] }
 0x291   : > { %v5865_v7 = vshll.u32 %v5708_v4, 16  ;;  %v11553_v6 = vcombine.low %v10619_v3, %v10597_v43  ;;  %v5788_v23 = vsel %vm9322_vm13, %v5783_v56, %v10660_v10  ;;  %v5797_v35 = vrot.slane %v5796_v18, 4  ;;  %v5712_v4 = vld [vmem:[#allocation3 + $0x64] sm:$0xf] }
 0x292   : > { %v5811_v31 = vrot.slane %v5809_v54, 5  ;;  %v5833_v25 = vshll.u32 %v5704_v38, 16  ;;  %v11554_v55 = vcombine.low %v10589_v61, %v10601_v1  ;;  %v5807_v60 = vrot.slane %v5806_v59, 4  ;;  %v10694_v59 = vpop.f32.mrf.mxu1 }
 0x293   : > { %8840 = vmatmul.mubr.bf16.gmra.mxu0 %v11553_v6  ;;  %v5820_v26 = vor.u32 %v5819_v47, %v5816_v63  ;;  %v6715_v15 = vsel %vm9290_vm10, %v7883_v20, %v6714_v62  ;;  %v6718_v43 = vsel %vm9290_vm10, %v6716_v9, %v6717_v13  ;;  %v5830_v3 = vor.u32 %v5829_v30, %v10671_v48  ;;  %v10696_v63 = vpop.f32.mrf.mxu0  ;;  %v5711_v47 = vld [vmem:[#allocation3 + $0x60] sm:$0xf]  ;;  %v5714_v30 = vld [vmem:[#allocation3 + $0x6c] sm:$0xf] }
 0x294   : > { %8843 = vmatprep.mubr.bf16.mxu0 %v11554_v55  ;;  %v5840_v10 = vrot.slane %v5838_v28, 4  ;;  %v5843_v18 = vrot.slane %v5841_v24, 5  ;;  %v5857_v54 = vshll.u32 %v5707_v53, 16  ;;  %v5854_v56 = vor.u32 %v5853_v45, %v10673_v41  ;;  %11555 = vst [vmem:[#allocation77_spill] sm:$0xff] %v10696_v63 }
 0x295   : > { %8700 = vmatmul.mubr.bf16.gmra.mxu1 %v7779_v8  ;;  %v5864_v38 = vrot.slane %v5862_v19, 4  ;;  %v5867_v61 = vrot.slane %v5865_v7, 5  ;;  %v5871_v1 = vshll.u32 %v5709_v51, 16  ;;  %v5875_v62 = vshrl.u32 %v5709_v51, 16 }
 0x296   : > { %8767 = vmatprep.mubr.bf16.mxu1 %v7844_v44  ;;  %v5895_v32 = vshll.u32 %v5712_v4, 16  ;;  %v5899_v20 = vshrl.u32 %v5712_v4, 16  ;;  %v7915_v9 = vcombine.low %v6715_v15, %v6718_v43  ;;  %v7845_v13 = vcombine.low %v5778_v33, %v5788_v23  ;;  %v5715_v44 = vld [vmem:[#allocation3 + $0x70] sm:$0xf]  ;;  %v10705_v33 = vpop.f32.mrf.mxu1  ;;  %v10707_v23 = vpop.f32.mrf.mxu0 }
 0x297   : > { %v5802_v53 = vsel %vm9322_vm13, %v5797_v35, %v10649_v17  ;;  %v5812_v45 = vsel %vm9322_vm13, %v5807_v60, %v5811_v31  ;;  %v5835_v8 = vrot.slane %v5833_v25, 5  ;;  %v5821_v28 = vrot.slane %v5820_v26, 4  ;;  %11556 = vst [vmem:[#allocation78_spill] sm:$0xff] %v10707_v23  ;;  %v5710_v17 = vld [vmem:[#allocation3 + $0x5c] sm:$0x1] }
 0x298   : > { %v5831_v24 = vrot.slane %v5830_v3, 4  ;;  %v5844_v19 = vor.u32 %v5843_v18, %v5840_v10  ;;  %v5859_v7 = vrot.slane %v5857_v54, 5  ;;  %v5855_v6 = vrot.slane %v5854_v56, 4  ;;  %v5713_v60 = vld [vmem:[#allocation3 + $0x68] sm:$0x1] }
 0x299   : > { %v5868_v51 = vor.u32 %v5867_v61, %v5864_v38  ;;  %v10703_v55 = vrot.slane %v5871_v1, 5  ;;  %v5886_v15 = vshrl.u32 %v5711_v47, 16  ;;  %v5877_v35 = vrot.slane %v5875_v62, 4  ;;  %v5717_v61 = vld [vmem:[#allocation3 + $0x78] sm:$0xf] }
 0x29a   : > { %v5889_v4 = vshll.u32 %v5711_v47, 16  ;;  %v10709_v31 = vrot.slane %v5895_v32, 5  ;;  %v5901_v25 = vrot.slane %v5899_v20, 4  ;;  %v5910_v26 = vshrl.u32 %v5714_v30, 16  ;;  %v5718_v20 = vld [vmem:[#allocation3 + $0x7c] sm:$0xf] }
 0x29b   : > { %8844 = vmatmul.mubr.bf16.gmra.mxu0 %v7915_v9  ;;  %v5913_v43 = vshll.u32 %v5714_v30, 16  ;;  %v5919_v3 = vshll.u32 %v5715_v44, 16  ;;  %v5923_v10 = vshrl.u32 %v5715_v44, 16  ;;  %v7846_v18 = vcombine.low %v5802_v53, %v5812_v45  ;;  %v10720_v9 = vpop.f32.mrf.mxu1  ;;  %v10722_v53 = vpop.f32.mrf.mxu0  ;;  %v5716_v44 = vld [vmem:[#allocation3 + $0x74] sm:$0x1] }
 0x29c   : > { %v5826_v54 = vsel %vm9322_vm13, %v5821_v28, %v10671_v48  ;;  %v5836_v56 = vsel %vm9322_vm13, %v5831_v24, %v5835_v8  ;;  %v5845_v38 = vrot.slane %v5844_v19, 4  ;;  %v5860_v1 = vsel %vm9322_vm13, %v5855_v6, %v5859_v7  ;;  %11557 = vst [vmem:[#allocation79_spill] sm:$0xff] %v10722_v53 }
 0x29d   : > { %8768 = vmatmul.mubr.bf16.vlgmr.msra.gmra.mxu1 %v7845_v13  ;;  %v10718_v62 = vrot.slane %v5868_v51, 4  ;;  %v5881_v47 = vshll.u32 %v5710_v17, 16  ;;  %v5888_v32 = vrot.slane %v5886_v15, 4  ;;  %v5878_v48 = vor.u32 %v5877_v35, %v10703_v55  ;;  %v10731_v23 = vpop.f32.mrf.mxu1 }
 0x29e   : > { %8771 = vmatprep.mubr.bf16.mxu1 %v7846_v18  ;;  %v5891_v45 = vrot.slane %v5889_v4, 5  ;;  %v5902_v8 = vor.u32 %v5901_v25, %v10709_v31  ;;  %v5905_v30 = vshll.u32 %v5713_v60, 16  ;;  %v5912_v13 = vrot.slane %v5910_v26, 4  ;;  %v10733_v25 = vpop.f32.mrf.mxu0  ;;  %v5720_v60 = vld [vmem:[#allocation3 + $0x84] sm:$0xf] }
 0x29f   : > { %v5915_v28 = vrot.slane %v5913_v43, 5  ;;  %v10726_v24 = vrot.slane %v5919_v3, 5  ;;  %v5925_v19 = vrot.slane %v5923_v10, 4  ;;  %v5850_v7 = vsel %vm9322_vm13, %v5845_v38, %v10673_v41  ;;  %11558 = vst [vmem:[#allocation80_spill] sm:$0xff] %v10733_v25  ;;  %v5721_v10 = vld [vmem:[#allocation3 + $0x88] sm:$0xf]  ;;  %v10742_v25 = vpop.f32.mrf.mxu1 }
 0x2a0   : > { %v5934_v6 = vshrl.u32 %v5717_v61, 16  ;;  %v5937_v51 = vshll.u32 %v5717_v61, 16  ;;  %v5943_v15 = vshll.u32 %v5718_v20, 16  ;;  %v7847_v17 = vcombine.low %v5826_v54, %v5836_v56 }
 0x2a1   : > { %v7848_v18 = vcombine.low %v5850_v7, %v5860_v1  ;;  %v5883_v35 = vrot.slane %v5881_v47, 5  ;;  %v5947_v4 = vshrl.u32 %v5718_v20, 16  ;;  %v5874_v26 = vsel %vm9322_vm13, %v10718_v62, %v10703_v55  ;;  %v5723_v1 = vld [vmem:[#allocation3 + $0x90] sm:$0xf]  ;;  %v5724_v47 = vld [vmem:[#allocation3 + $0x94] sm:$0xf] }
 0x2a2   : > { %v5879_v43 = vrot.slane %v5878_v48, 4  ;;  %v5892_v41 = vor.u32 %v5891_v45, %v5888_v32  ;;  %v5907_v3 = vrot.slane %v5905_v30, 5  ;;  %v5903_v38 = vrot.slane %v5902_v8, 4  ;;  %v10744_v48 = vpop.f32.mrf.mxu0 }
 0x2a3   : > { %v5916_v61 = vor.u32 %v5915_v28, %v5912_v13  ;;  %v5926_v54 = vor.u32 %v5925_v19, %v10726_v24  ;;  %v5929_v56 = vshll.u32 %v5716_v44, 16  ;;  %v5936_v20 = vrot.slane %v5934_v6, 4  ;;  %11559 = vst [vmem:[#allocation81_spill] sm:$0xff] %v10744_v48 }
 0x2a4   : > { %v5939_v7 = vrot.slane %v5937_v51, 5  ;;  %v10740_v63 = vrot.slane %v5943_v15, 5  ;;  %v5958_v46 = vshrl.u32 %v5720_v60, 16  ;;  %v5949_v34 = vrot.slane %v5947_v4, 4  ;;  %v10755_v53 = vpop.f32.mrf.mxu0 }
 0x2a5   : > { %8772 = vmatmul.mubr.bf16.gmra.mxu1 %v7847_v17  ;;  %v5961_v55 = vshll.u32 %v5720_v60, 16  ;;  %v5967_v62 = vshll.u32 %v5721_v10, 16  ;;  %v5971_v32 = vshrl.u32 %v5721_v10, 16  ;;  %v5982_v45 = vshrl.u32 %v5723_v1, 16  ;;  %v5719_v17 = vld [vmem:[#allocation3 + $0x80] sm:$0x1] }
 0x2a6   : > { %8775 = vmatprep.mubr.bf16.mxu1 %v7848_v18  ;;  %v5985_v8 = vshll.u32 %v5723_v1, 16  ;;  %v5991_v30 = vshll.u32 %v5724_v47, 16  ;;  %v5995_v13 = vshrl.u32 %v5724_v47, 16  ;;  %v5884_v28 = vsel %vm9322_vm13, %v5879_v43, %v5883_v35  ;;  %v10753_v47 = vpop.f32.mrf.mxu1  ;;  %11560 = vst [vmem:[#allocation82_spill] sm:$0xff] %v10755_v53  ;;  %v5722_v35 = vld [vmem:[#allocation3 + $0x8c] sm:$0x1] }
 0x2a7   : > { %v5893_v19 = vrot.slane %v5892_v41, 4  ;;  %v5908_v44 = vsel %vm9322_vm13, %v5903_v38, %v5907_v3  ;;  %v5931_v6 = vrot.slane %v5929_v56, 5  ;;  %v5917_v51 = vrot.slane %v5916_v61, 4 }
 0x2a8   : > { %v5927_v15 = vrot.slane %v5926_v54, 4  ;;  %v5940_v4 = vor.u32 %v5939_v7, %v5936_v20  ;;  %v5960_v60 = vrot.slane %v5958_v46, 4  ;;  %v5950_v10 = vor.u32 %v5949_v34, %v10740_v63  ;;  %v5726_v54 = vld [vmem:[#allocation3 + $0x9c] sm:$0xf] }
 0x2a9   : > { %v5963_v18 = vrot.slane %v5961_v55, 5  ;;  %v10751_v48 = vrot.slane %v5967_v62, 5  ;;  %v5973_v1 = vrot.slane %v5971_v32, 4  ;;  %v5984_v43 = vrot.slane %v5982_v45, 4  ;;  %v5727_v62 = vld [vmem:[#allocation3 + $0xa0] sm:$0xf] }
 0x2aa   : > { %v5987_v41 = vrot.slane %v5985_v8, 5  ;;  %v10757_v3 = vrot.slane %v5991_v30, 5  ;;  %v5997_v38 = vrot.slane %v5995_v13, 4  ;;  %v7849_v61 = vcombine.low %v5874_v26, %v5884_v28  ;;  %v5725_v30 = vld [vmem:[#allocation3 + $0x98] sm:$0x1]  ;;  %v10770_v13 = vpop.f32.mrf.mxu0 }
 0x2ab   : > { %v5898_v46 = vsel %vm9322_vm13, %v5893_v19, %v10709_v31  ;;  %v5953_v34 = vshll.u32 %v5719_v17, 16  ;;  %v5922_v20 = vsel %vm9322_vm13, %v5917_v51, %v10726_v24  ;;  %v5932_v7 = vsel %vm9322_vm13, %v5927_v15, %v5931_v6  ;;  %v10768_v31 = vpop.f32.mrf.mxu1  ;;  %11561 = vst [vmem:[#allocation83_spill] sm:$0xff] %v10770_v13  ;;  %v5730_v28 = vld [vmem:[#allocation3 + $0xac] sm:$0xf] }
 0x2ac   : > { %v7850_v56 = vcombine.low %v5898_v46, %v5908_v44  ;;  %v5941_v55 = vrot.slane %v5940_v4, 4  ;;  %v5951_v32 = vrot.slane %v5950_v10, 4  ;;  %v5964_v45 = vor.u32 %v5963_v18, %v5960_v60  ;;  %v5729_v18 = vld [vmem:[#allocation3 + $0xa8] sm:$0xf] }
 0x2ad   : > { %8776 = vmatmul.mubr.bf16.gmra.mxu1 %v7849_v61  ;;  %v5974_v26 = vor.u32 %v5973_v1, %v10751_v48  ;;  %v5977_v8 = vshll.u32 %v5722_v35, 16  ;;  %v5988_v19 = vor.u32 %v5987_v41, %v5984_v43  ;;  %v5998_v24 = vor.u32 %v5997_v38, %v10757_v3  ;;  %v10778_v46 = vpop.f32.mrf.mxu1 }
 0x2ae   : > { %8779 = vmatprep.mubr.bf16.mxu1 %v7850_v56  ;;  %v6006_v44 = vshrl.u32 %v5726_v54, 16  ;;  %v6009_v6 = vshll.u32 %v5726_v54, 16  ;;  %v7851_v51 = vcombine.low %v5922_v20, %v5932_v7  ;;  %v5955_v15 = vrot.slane %v5953_v34, 5  ;;  %v10780_v54 = vpop.f32.mrf.mxu0 }
 0x2af   : > { %v6015_v17 = vshll.u32 %v5727_v62, 16  ;;  %v6019_v4 = vshrl.u32 %v5727_v62, 16  ;;  %v5946_v60 = vsel %vm9322_vm13, %v5941_v55, %v10740_v63  ;;  %v6001_v10 = vshll.u32 %v5725_v30, 16  ;;  %11562 = vst [vmem:[#allocation84_spill] sm:$0xff] %v10780_v54  ;;  %v5728_v62 = vld [vmem:[#allocation3 + $0xa4] sm:$0x1] }
 0x2b0   : > { %v6039_v1 = vshll.u32 %v5730_v28, 16  ;;  %v6043_v35 = vshrl.u32 %v5730_v28, 16  ;;  %v5956_v61 = vsel %vm9322_vm13, %v5951_v32, %v5955_v15  ;;  %v5965_v43 = vrot.slane %v5964_v45, 4 }
 0x2b1   : > { %v5975_v41 = vrot.slane %v5974_v26, 4  ;;  %v5979_v38 = vrot.slane %v5977_v8, 5  ;;  %v5989_v34 = vrot.slane %v5988_v19, 4  ;;  %v5999_v56 = vrot.slane %v5998_v24, 4  ;;  %v5732_v26 = vld [vmem:[#allocation3 + $0xb4] sm:$0xf]  ;;  %v10791_v24 = vpop.f32.mrf.mxu1 }
 0x2b2   : > { %v6008_v20 = vrot.slane %v6006_v44, 4  ;;  %v6011_v7 = vrot.slane %v6009_v6, 5  ;;  %v10782_v63 = vrot.slane %v6015_v17, 5  ;;  %v6021_v55 = vrot.slane %v6019_v4, 4  ;;  %11563 = vst [vmem:[#allocation85_spill] sm:$0xff] %v10791_v24  ;;  %v10793_v44 = vpop.f32.mrf.mxu0 }
 0x2b3   : > { %v6030_v30 = vshrl.u32 %v5729_v18, 16  ;;  %v6033_v28 = vshll.u32 %v5729_v18, 16  ;;  %v7852_v53 = vcombine.low %v5946_v60, %v5956_v61  ;;  %v6003_v13 = vrot.slane %v6001_v10, 5  ;;  %11564 = vst [vmem:[#allocation86_spill] sm:$0xff] %v10793_v44  ;;  %v5733_v6 = vld [vmem:[#allocation3 + $0xb8] sm:$0xf]  ;;  %v10802_v44 = vpop.f32.mrf.mxu1 }
 0x2b4   : > { %v10784_v32 = vrot.slane %v6039_v1, 5  ;;  %v6045_v45 = vrot.slane %v6043_v35, 4  ;;  %v5970_v8 = vsel %vm9322_vm13, %v5965_v43, %v10751_v48  ;;  %v5980_v19 = vsel %vm9322_vm13, %v5975_v41, %v5979_v38  ;;  %v5735_v60 = vld [vmem:[#allocation3 + $0xc0] sm:$0xf]  ;;  %v5736_v48 = vld [vmem:[#allocation3 + $0xc4] sm:$0xf] }
 0x2b5   : > { %8780 = vmatmul.mubr.bf16.gmra.mxu1 %v7851_v51  ;;  %v5994_v15 = vsel %vm9322_vm13, %v5989_v34, %v10757_v3  ;;  %v6004_v51 = vsel %vm9322_vm13, %v5999_v56, %v6003_v13  ;;  %v6012_v17 = vor.u32 %v6011_v7, %v6008_v20  ;;  %v6025_v4 = vshll.u32 %v5728_v62, 16  ;;  %v5731_v61 = vld [vmem:[#allocation3 + $0xb0] sm:$0x1]  ;;  %11565 = vst [vmem:[#allocation87_spill] sm:$0xff] %v10802_v44  ;;  %v10804_v3 = vpop.f32.mrf.mxu0 }
 0x2b6   : > { %8783 = vmatprep.mubr.bf16.mxu1 %v7852_v53  ;;  %v6022_v10 = vor.u32 %v6021_v55, %v10782_v63  ;;  %v6032_v18 = vrot.slane %v6030_v30, 4  ;;  %v6035_v1 = vrot.slane %v6033_v28, 5  ;;  %v6054_v35 = vshrl.u32 %v5732_v26, 16  ;;  %11566 = vst [vmem:[#allocation88_spill] sm:$0xff] %v10804_v3  ;;  %v5738_v28 = vld [vmem:[#allocation3 + $0xcc] sm:$0xf]  ;;  %v10806_v3 = vpop.f32.mrf.mxu1 }
 0x2b7   : > { %v6046_v43 = vor.u32 %v6045_v45, %v10784_v32  ;;  %v6057_v53 = vshll.u32 %v5732_v26, 16  ;;  %v6063_v41 = vshll.u32 %v5733_v6, 16  ;;  %v6067_v38 = vshrl.u32 %v5733_v6, 16  ;;  %v5739_v26 = vld [vmem:[#allocation3 + $0xd0] sm:$0xf] }
 0x2b8   : > { %v6078_v13 = vshrl.u32 %v5735_v60, 16  ;;  %v6081_v34 = vshll.u32 %v5735_v60, 16  ;;  %v6087_v56 = vshll.u32 %v5736_v48, 16  ;;  %v6091_v20 = vshrl.u32 %v5736_v48, 16  ;;  %v5734_v48 = vld [vmem:[#allocation3 + $0xbc] sm:$0x1] }
 0x2b9   : > { %v7853_v7 = vcombine.low %v5970_v8, %v5980_v19  ;;  %v7854_v62 = vcombine.low %v5994_v15, %v6004_v51  ;;  %v6013_v55 = vrot.slane %v6012_v17, 4  ;;  %v6027_v30 = vrot.slane %v6025_v4, 5  ;;  %v10808_v60 = vpop.f32.mrf.mxu0  ;;  %v5737_v17 = vld [vmem:[#allocation3 + $0xc8] sm:$0x1] }
 0x2ba   : > { %v6023_v54 = vrot.slane %v6022_v10, 4  ;;  %v6036_v37 = vor.u32 %v6035_v1, %v6032_v18  ;;  %v6049_v16 = vshll.u32 %v5731_v61, 16  ;;  %v6056_v45 = vrot.slane %v6054_v35, 4 }
 0x2bb   : > { %v6047_v0 = vrot.slane %v6046_v43, 4  ;;  %v6059_v6 = vrot.slane %v6057_v53, 5  ;;  %v6065_v24 = vrot.slane %v6063_v41, 5  ;;  %v6069_v44 = vrot.slane %v6067_v38, 4 }
 0x2bc   : > { %v6080_v8 = vrot.slane %v6078_v13, 4  ;;  %v6083_v19 = vrot.slane %v6081_v34, 5  ;;  %v6089_v15 = vrot.slane %v6087_v56, 5  ;;  %v6093_v51 = vrot.slane %v6091_v20, 4  ;;  %v10817_v56 = vpop.f32.mrf.mxu1  ;;  %v10819_v20 = vpop.f32.mrf.mxu0 }
 0x2bd   : > { %8784 = vmatmul.mubr.bf16.gmra.mxu1 %v7853_v7  ;;  %v6102_v4 = vshrl.u32 %v5738_v28, 16  ;;  %v6105_v10 = vshll.u32 %v5738_v28, 16  ;;  %v6111_v18 = vshll.u32 %v5739_v26, 16  ;;  %v6115_v1 = vshrl.u32 %v5739_v26, 16 }
 0x2be   : > { %8787 = vmatprep.mubr.bf16.mxu1 %v7854_v62  ;;  %v6018_v35 = vsel %vm9322_vm13, %v6013_v55, %v10782_v63  ;;  %v6037_v61 = vrot.slane %v6036_v37, 4  ;;  %v6051_v43 = vrot.slane %v6049_v16, 5  ;;  %v6028_v53 = vsel %vm9322_vm13, %v6023_v54, %v6027_v30 }
 0x2bf   : > { %v6060_v41 = vor.u32 %v6059_v6, %v6056_v45  ;;  %v6070_v38 = vor.u32 %v6069_v44, %v6065_v24  ;;  %v6073_v13 = vshll.u32 %v5734_v48, 16  ;;  %v6084_v7 = vor.u32 %v6083_v19, %v6080_v8  ;;  %v5740_v44 = vld [vmem:[#allocation3 + $0xd4] sm:$0x1]  ;;  %v10826_v48 = vpop.f32.mrf.mxu0 }
 0x2c0   : > { %v6052_v34 = vsel %vm9322_vm13, %v6047_v0, %v6051_v43  ;;  %v6094_v62 = vor.u32 %v6093_v51, %v6089_v15  ;;  %v6097_v28 = vshll.u32 %v5737_v17, 16  ;;  %v6104_v26 = vrot.slane %v6102_v4, 4  ;;  %11567 = vst [vmem:[#allocation89_spill] sm:$0xff] %v10826_v48 }
 0x2c1   : > { %v6107_v63 = vrot.slane %v6105_v10, 5  ;;  %v6113_v37 = vrot.slane %v6111_v18, 5  ;;  %v6117_v16 = vrot.slane %v6115_v1, 4  ;;  %v7855_v55 = vcombine.low %v6018_v35, %v6028_v53  ;;  %v10824_v0 = vpop.f32.mrf.mxu1  ;;  %v10836_v43 = vpop.f32.mrf.mxu0 }
 0x2c2   : > { %v6042_v54 = vsel %vm9322_vm13, %v6037_v61, %v10784_v32  ;;  %v6071_v45 = vrot.slane %v6070_v38, 4  ;;  %v6061_v6 = vrot.slane %v6060_v41, 4  ;;  %v6085_v8 = vrot.slane %v6084_v7, 4  ;;  %11568 = vst [vmem:[#allocation90_spill] sm:$0xff] %v10836_v43 }
 0x2c3   : > { %v7856_v30 = vcombine.low %v6042_v54, %v6052_v34  ;;  %v6095_v19 = vrot.slane %v6094_v62, 4  ;;  %v6099_v51 = vrot.slane %v6097_v28, 5  ;;  %v6075_v17 = vrot.slane %v6073_v13, 5  ;;  %v10834_v61 = vpop.f32.mrf.mxu1 }
 0x2c4   : > { %v6108_v4 = vor.u32 %v6107_v63, %v6104_v26  ;;  %v6118_v10 = vor.u32 %v6117_v16, %v6113_v37  ;;  %v6121_v18 = vshll.u32 %v5740_v44, 16  ;;  %v6090_v1 = vsel %vm9322_vm13, %v6085_v8, %v6089_v15 }
 0x2c5   : > { %8788 = vmatmul.mubr.bf16.gmra.mxu1 %v7855_v55  ;;  %v6076_v32 = vsel %vm9322_vm13, %v6071_v45, %v6075_v17  ;;  %v6100_v35 = vsel %vm9322_vm13, %v6095_v19, %v6099_v51  ;;  %v6066_v53 = vsel %vm9322_vm13, %v6061_v6, %v6065_v24  ;;  %v10840_v62 = vpop.f32.mrf.mxu1  ;;  %v2721_v19 = vadd.f32 %v10400_v40, %v9882_v50 }
 0x2c6   : > { %8791 = vmatprep.mubr.bf16.mxu1 %v7856_v30  ;;  %v6109_v41 = vrot.slane %v6108_v4, 4  ;;  %v6119_v38 = vrot.slane %v6118_v10, 4  ;;  %v6123_v13 = vrot.slane %v6121_v18, 5  ;;  %v7857_v34 = vcombine.low %v6066_v53, %v6076_v32 }
 0x2c7   : > { %v7858_v7 = vcombine.low %v6090_v1, %v6100_v35  ;;  %v10850_v24 = vpop.f32.mrf.mxu1  ;;  %v3318_v50 = vadd.f32 %v9935_v11, %v2721_v19 }
 0x2c8   : > { %v6114_v15 = vsel %vm9322_vm13, %v6109_v41, %v6113_v37  ;;  %v6124_v26 = vsel %vm9322_vm13, %v6119_v38, %v6123_v13  ;;  %v2720_v37 = vadd.f32 %v10310_v5, %v9874_v14  ;;  %v3315_v5 = vadd.f32 %v9926_v39, %v2718_v22  ;;  %v11570_v39 = vld [vmem:[#allocation68_spill] sm:$0xff] }
 0x2c9   : > { %v10842_v28 = vpop.f32.mrf.mxu0  ;;  %v7859_v16 = vcombine.low %v6114_v15, %v6124_v26  ;;  %v2725_v41 = vadd.f32 %v11570_v39, %v9900_v12  ;;  %v3321_v38 = vadd.f32 %v11571_v29, %v2724_v57  ;;  %v11573_v15 = vld [vmem:[#allocation10_spill] sm:$0xff] }
 0x2ca   : > { %v3317_v17 = vadd.f32 %v9918_v58, %v2720_v37  ;;  %v2722_v58 = vadd.f32 %v10527_v27, %v9896_v36  ;;  %v2728_v26 = vadd.f32 %v10608_v42, %v11573_v15  ;;  %v11574_v12 = vld [vmem:[#allocation22_spill] sm:$0xff] }
 0x2cb   : > { %v10848_v63 = vpop.f32.mrf.mxu0  ;;  %v3322_v22 = vadd.f32 %v11574_v12, %v2725_v41 }
 0x2cd   : > { %8792 = vmatmul.mubr.bf16.gmra.mxu1 %v7857_v34  ;;  %v10852_v55 = vpop.f32.mrf.mxu0 }
 0x2ce   : > { %8795 = vmatprep.mubr.bf16.mxu1 %v7858_v7  ;;  %11569 = vst [vmem:[#allocation91_spill] sm:$0xff] %v10852_v55  ;;  %v11572_v7 = vld [vmem:[#allocation20_spill] sm:$0xff]  ;;  %v11591_v55 = vld [vmem:[#allocation21_spill] sm:$0xff] }
 0x2cf   : > { %v10856_v44 = vpop.f32.mrf.mxu0  ;;  %v3319_v36 = vadd.f32 %v11572_v7, %v2722_v58  ;;  %v11577_v58 = vld [vmem:[#allocation26_spill] sm:$0xff]  ;;  %v2736_v43 = vadd.f32 %v10742_v25, %v11591_v55 }
 0x2d0   : > { %v3325_v39 = vadd.f32 %v11577_v58, %v2728_v26 }
 0x2d2   : > { %v10854_v54 = vpop.f32.mrf.mxu1 }
 0x2d4   : > { %v10858_v30 = vpop.f32.mrf.mxu1 }
 0x2d5   : > { %8796 = vmatmul.mubr.bf16.gmra.mxu1 %v7859_v16 }
 0x2d6   : > { %v10862_v45 = vpop.f32.mrf.mxu1  ;;  %v10866_v6 = vpop.f32.mrf.mxu0 }
 0x2d8   : > { %v10868_v8 = vpop.f32.mrf.mxu1  ;;  %v10872_v51 = vpop.f32.mrf.mxu0 }
 0x2da   : > { %v8577_v4 = vpop.f32.mrf.mxu1  ;;  %v10877_v14 = vpop.f32.mrf.mxu0 }
 0x2db   : > { %v10875_v10 = vadd.f32 %v8577_v4, %v3317_v17  ;;  %v11575_v17 = vld [vmem:[#allocation11_spill] sm:$0xff] }
 0x2dc   : > { %v3607_v18 = vpop.f32.mrf.mxu1  ;;  %v10884_v32 = vpop.f32.mrf.mxu0  ;;  %v2726_v4 = vadd.f32 %v10640_v2, %v11575_v17  ;;  %v11583_v17 = vld [vmem:[#allocation15_spill] sm:$0xff] }
 0x2dd   : > { %v10882_v52 = vadd.f32 %v3607_v18, %v3315_v5  ;;  %v2730_v26 = vadd.f32 %v10705_v33, %v11583_v17 }
 0x2de   : > { %v8578_v40 = vpop.f32.mrf.mxu1  ;;  %v10891_v35 = vpop.f32.mrf.mxu0 }
 0x2df   : > { %v10889_v1 = vadd.f32 %v8578_v40, %v3318_v50  ;;  %v11576_v50 = vld [vmem:[#allocation12_spill] sm:$0xff] }
 0x2e0   : > { %v10893_v53 = vpop.f32.mrf.mxu1  ;;  %v10897_v21 = vpop.f32.mrf.mxu0  ;;  %v2729_v40 = vadd.f32 %v10662_v49, %v11576_v50  ;;  %v11582_v49 = vld [vmem:[#allocation30_spill] sm:$0xff] }
 0x2e2   : > { %v8581_v13 = vpop.f32.mrf.mxu1  ;;  %v10902_v11 = vpop.f32.mrf.mxu0 }
 0x2e3   : > { %v10900_v34 = vadd.f32 %v8581_v13, %v3321_v38  ;;  %v11579_v13 = vld [vmem:[#allocation28_spill] sm:$0xff] }
 0x2e4   : > { %v3623_v27 = vpop.f32.mrf.mxu1  ;;  %v10909_v37 = vpop.f32.mrf.mxu0  ;;  %v3323_v2 = vadd.f32 %v11579_v13, %v2726_v4  ;;  %v11586_v4 = vld [vmem:[#allocation16_spill] sm:$0xff]  ;;  %v11587_v13 = vld [vmem:[#allocation34_spill] sm:$0xff] }
 0x2e5   : > { %v10907_v16 = vadd.f32 %v3623_v27, %v3319_v36  ;;  %v11580_v36 = vld [vmem:[#allocation14_spill] sm:$0xff] }
 0x2e6   : > { %v8582_v19 = vpop.f32.mrf.mxu1  ;;  %v10916_v18 = vpop.f32.mrf.mxu0  ;;  %v2732_v27 = vadd.f32 %v10694_v59, %v11580_v36  ;;  %v11588_v36 = vld [vmem:[#allocation18_spill] sm:$0xff] }
 0x2e7   : > { %v10914_v5 = vadd.f32 %v8582_v19, %v3322_v22  ;;  %v3326_v22 = vadd.f32 %v11582_v49, %v2729_v40  ;;  %v2731_v40 = vadd.f32 %v10731_v23, %v11588_v36  ;;  %v11596_v36 = vld [vmem:[#allocation38_spill] sm:$0xff] }
 0x2e8   : > { %v10918_v57 = vpop.f32.mrf.mxu1  ;;  %v10922_v42 = vpop.f32.mrf.mxu0 }
 0x2ea   : > { %v8585_v29 = vpop.f32.mrf.mxu1  ;;  %v10927_v41 = vpop.f32.mrf.mxu0 }
 0x2eb   : > { %v10925_v38 = vadd.f32 %v8585_v29, %v3325_v39  ;;  %11578 = vst [vmem:[#allocation68_spill] sm:$0xff] %v10927_v41  ;;  %v2733_v29 = vadd.f32 %v10720_v9, %v11586_v4  ;;  %v11593_v4 = vld [vmem:[#allocation37_spill] sm:$0xff] }
 0x2ec   : > { %v3639_v7 = vpop.f32.mrf.mxu1  ;;  %v10934_v12 = vpop.f32.mrf.mxu0  ;;  %v11604_v41 = vld [vmem:[#allocation85_spill] sm:$0xff] }
 0x2ed   : > { %v10932_v15 = vadd.f32 %v3639_v7, %v3323_v2  ;;  %11581 = vst [vmem:[#allocation19_spill] sm:$0xff] %v10934_v12  ;;  %v3329_v2 = vadd.f32 %v11587_v13, %v2732_v27  ;;  %v3330_v27 = vadd.f32 %v11593_v4, %v2733_v29  ;;  %v11594_v12 = vld [vmem:[#allocation23_spill] sm:$0xff] }
 0x2ee   : > { %v8586_v19 = vpop.f32.mrf.mxu1  ;;  %v10941_v58 = vpop.f32.mrf.mxu0  ;;  %v2734_v23 = vadd.f32 %v10753_v47, %v11594_v12 }
 0x2ef   : > { %v10939_v50 = vadd.f32 %v8586_v19, %v3326_v22  ;;  %v11590_v22 = vld [vmem:[#allocation35_spill] sm:$0xff] }
 0x2f0   : > { %v10943_v39 = vpop.f32.mrf.mxu1  ;;  %v10947_v59 = vpop.f32.mrf.mxu0  ;;  %v3327_v19 = vadd.f32 %v11590_v22, %v2730_v26  ;;  %v3328_v26 = vadd.f32 %v11596_v36, %v2731_v40 }
 0x2f1   : > { %11584 = vst [vmem:[#allocation20_spill] sm:$0xff] %v10939_v50  ;;  %11585 = vst [vmem:[#allocation10_spill] sm:$0xff] %v10943_v39  ;;  %v11608_v50 = vld [vmem:[#allocation87_spill] sm:$0xff] }
 0x2f2   : > { %v8589_v7 = vpop.f32.mrf.mxu1  ;;  %v10954_v33 = vpop.f32.mrf.mxu0 }
 0x2f3   : > { %v10952_v49 = vadd.f32 %v8589_v7, %v3329_v2  ;;  %11589 = vst [vmem:[#allocation22_spill] sm:$0xff] %v10954_v33  ;;  %v11597_v33 = vld [vmem:[#allocation25_spill] sm:$0xff] }
 0x2f4   : > { %v3655_v17 = vpop.f32.mrf.mxu1  ;;  %v10961_v9 = vpop.f32.mrf.mxu0  ;;  %v2737_v25 = vadd.f32 %v10768_v31, %v11597_v33 }
 0x2f5   : > { %v10959_v48 = vadd.f32 %v3655_v17, %v3327_v19  ;;  %11592 = vst [vmem:[#allocation11_spill] sm:$0xff] %v10961_v9  ;;  %v11599_v17 = vld [vmem:[#allocation40_spill] sm:$0xff]  ;;  %v11600_v9 = vld [vmem:[#allocation27_spill] sm:$0xff] }
 0x2f6   : > { %v8590_v13 = vpop.f32.mrf.mxu1  ;;  %v10968_v7 = vpop.f32.mrf.mxu0  ;;  %v3333_v29 = vadd.f32 %v11599_v17, %v2736_v43  ;;  %v2735_v47 = vadd.f32 %v10778_v46, %v11600_v9 }
 0x2f7   : > { %v10966_v2 = vadd.f32 %v8590_v13, %v3330_v27  ;;  %v11602_v13 = vld [vmem:[#allocation41_spill] sm:$0xff] }
 0x2f8   : > { %v3658_v22 = vpop.f32.mrf.mxu1  ;;  %v10975_v19 = vpop.f32.mrf.mxu0  ;;  %v3331_v40 = vadd.f32 %v11602_v13, %v2734_v23 }
 0x2f9   : > { %11595 = vst [vmem:[#allocation12_spill] sm:$0xff] %v10966_v2  ;;  %v10973_v55 = vadd.f32 %v3658_v22, %v3328_v26  ;;  %v11603_v2 = vld [vmem:[#allocation29_spill] sm:$0xff]  ;;  %v11606_v22 = vld [vmem:[#allocation43_spill] sm:$0xff] }
 0x2fa   : > { %v8593_v4 = vpop.f32.mrf.mxu1  ;;  %v10982_v27 = vpop.f32.mrf.mxu0  ;;  %v2740_v31 = vadd.f32 %v11604_v41, %v11603_v2  ;;  %v3334_v43 = vadd.f32 %v11606_v22, %v2737_v25 }
 0x2fb   : > { %11598 = vst [vmem:[#allocation26_spill] sm:$0xff] %v10973_v55  ;;  %v10980_v12 = vadd.f32 %v8593_v4, %v3333_v29  ;;  %11601 = vst [vmem:[#allocation28_spill] sm:$0xff] %v10982_v27  ;;  %v11607_v55 = vld [vmem:[#allocation31_spill] sm:$0xff]  ;;  %v11610_v4 = vld [vmem:[#allocation44_spill] sm:$0xff] }
 0x2fc   : > { %v3671_v36 = vpop.f32.mrf.mxu1  ;;  %v10989_v26 = vpop.f32.mrf.mxu0  ;;  %v2738_v46 = vadd.f32 %v11608_v50, %v11607_v55  ;;  %v3332_v23 = vadd.f32 %v11610_v4, %v2735_v47  ;;  %v11611_v27 = vld [vmem:[#allocation33_spill] sm:$0xff] }
 0x2fd   : > { %v10987_v33 = vadd.f32 %v3671_v36, %v3331_v40  ;;  %11605 = vst [vmem:[#allocation14_spill] sm:$0xff] %v10989_v26  ;;  %v2741_v41 = vadd.f32 %v10806_v3, %v11611_v27  ;;  %v11613_v36 = vld [vmem:[#allocation46_spill] sm:$0xff]  ;;  %v11614_v26 = vld [vmem:[#allocation36_spill] sm:$0xff] }
 0x2fe   : > { %v8594_v17 = vpop.f32.mrf.mxu1  ;;  %v10996_v29 = vpop.f32.mrf.mxu0  ;;  %v3337_v25 = vadd.f32 %v11613_v36, %v2740_v31  ;;  %v2739_v50 = vadd.f32 %v10817_v56, %v11614_v26 }
 0x2ff   : > { %v10994_v9 = vadd.f32 %v8594_v17, %v3334_v43  ;;  %v11616_v17 = vld [vmem:[#allocation47_spill] sm:$0xff] }
 0x300   : > { %v3674_v13 = vpop.f32.mrf.mxu1  ;;  %v11003_v40 = vpop.f32.mrf.mxu0  ;;  %v3335_v47 = vadd.f32 %v11616_v17, %v2738_v46 }
 0x301   : > { %11609 = vst [vmem:[#allocation30_spill] sm:$0xff] %v10994_v9  ;;  %v11001_v2 = vadd.f32 %v3674_v13, %v3332_v23  ;;  %v11617_v9 = vld [vmem:[#allocation39_spill] sm:$0xff]  ;;  %v11619_v13 = vld [vmem:[#allocation49_spill] sm:$0xff] }
 0x302   : > { %v8597_v22 = vpop.f32.mrf.mxu1  ;;  %v11010_v43 = vpop.f32.mrf.mxu0  ;;  %v2744_v3 = vadd.f32 %v10824_v0, %v11617_v9  ;;  %v3338_v31 = vadd.f32 %v11619_v13, %v2741_v41 }
 0x303   : > { %11612 = vst [vmem:[#allocation15_spill] sm:$0xff] %v11001_v2  ;;  %v11008_v55 = vadd.f32 %v8597_v22, %v3337_v25  ;;  %11615 = vst [vmem:[#allocation16_spill] sm:$0xff] %v11010_v43  ;;  %v11620_v2 = vld [vmem:[#allocation42_spill] sm:$0xff]  ;;  %v11623_v43 = vld [vmem:[#allocation45_spill] sm:$0xff] }
 0x304   : > { %v3687_v4 = vpop.f32.mrf.mxu1  ;;  %v11017_v23 = vpop.f32.mrf.mxu0  ;;  %v2742_v56 = vadd.f32 %v10834_v61, %v11620_v2  ;;  %v11622_v22 = vld [vmem:[#allocation50_spill] sm:$0xff]  ;;  %v2745_v0 = vadd.f32 %v10840_v62, %v11623_v43 }
 0x305   : > { %v11015_v27 = vadd.f32 %v3687_v4, %v3335_v47  ;;  %11618 = vst [vmem:[#allocation34_spill] sm:$0xff] %v11017_v23  ;;  %v3336_v46 = vadd.f32 %v11622_v22, %v2739_v50  ;;  %v11625_v4 = vld [vmem:[#allocation52_spill] sm:$0xff] }
 0x306   : > { %v8598_v36 = vpop.f32.mrf.mxu1  ;;  %v11024_v25 = vpop.f32.mrf.mxu0  ;;  %v3341_v41 = vadd.f32 %v11625_v4, %v2744_v3  ;;  %v11626_v23 = vld [vmem:[#allocation48_spill] sm:$0xff] }
 0x307   : > { %v11022_v26 = vadd.f32 %v8598_v36, %v3338_v31  ;;  %v2743_v61 = vadd.f32 %v10850_v24, %v11626_v23  ;;  %v11628_v36 = vld [vmem:[#allocation53_spill] sm:$0xff] }
 0x308   : > { %v3690_v17 = vpop.f32.mrf.mxu1  ;;  %v11031_v47 = vpop.f32.mrf.mxu0  ;;  %v3339_v50 = vadd.f32 %v11628_v36, %v2742_v56 }
 0x309   : > { %11621 = vst [vmem:[#allocation18_spill] sm:$0xff] %v11022_v26  ;;  %v11029_v9 = vadd.f32 %v3690_v17, %v3336_v46  ;;  %v11629_v26 = vld [vmem:[#allocation51_spill] sm:$0xff] }
 0x30a   : > { %v8601_v13 = vpop.f32.mrf.mxu1  ;;  %v11038_v31 = vpop.f32.mrf.mxu0  ;;  %v2748_v62 = vadd.f32 %v10854_v54, %v11629_v26  ;;  %v11631_v17 = vld [vmem:[#allocation55_spill] sm:$0xff] }
 0x30b   : > { %11624 = vst [vmem:[#allocation35_spill] sm:$0xff] %v11029_v9  ;;  %v11036_v2 = vadd.f32 %v8601_v13, %v3341_v41  ;;  %11627 = vst [vmem:[#allocation21_spill] sm:$0xff] %v11038_v31  ;;  %v3342_v3 = vadd.f32 %v11631_v17, %v2745_v0  ;;  %v11632_v9 = vld [vmem:[#allocation54_spill] sm:$0xff]  ;;  %v11634_v13 = vld [vmem:[#allocation56_spill] sm:$0xff] }
 0x30c   : > { %v3703_v22 = vpop.f32.mrf.mxu1  ;;  %v11045_v46 = vpop.f32.mrf.mxu0  ;;  %v2746_v24 = vadd.f32 %v10858_v30, %v11632_v9  ;;  %v3340_v56 = vadd.f32 %v11634_v13, %v2743_v61  ;;  %v11635_v31 = vld [vmem:[#allocation57_spill] sm:$0xff]  ;;  %v11637_v17 = vld [vmem:[#allocation59_spill] sm:$0xff] }
 0x30d   : > { %v11043_v43 = vadd.f32 %v3703_v22, %v3339_v50  ;;  %11630 = vst [vmem:[#allocation37_spill] sm:$0xff] %v11045_v46  ;;  %v2749_v54 = vadd.f32 %v10862_v45, %v11635_v31  ;;  %v11636_v22 = vld [vmem:[#allocation58_spill] sm:$0xff]  ;;  %v2747_v39 = vadd.f32 %v10868_v8, %v11637_v17  ;;  %v11642_v31 = vld [vmem:[#allocation61_spill] sm:$0xff] }
 0x30e   : > { %v8602_v4 = vpop.f32.mrf.mxu1  ;;  %v11052_v41 = vpop.f32.mrf.mxu0  ;;  %v3345_v46 = vadd.f32 %v11636_v22, %v2748_v62 }
 0x30f   : > { %v11050_v23 = vadd.f32 %v8602_v4, %v3342_v3  ;;  %v11639_v3 = vld [vmem:[#allocation60_spill] sm:$0xff] }
 0x310   : > { %v3706_v36 = vpop.f32.mrf.mxu1  ;;  %v11057_v50 = vpop.f32.mrf.mxu0  ;;  %v3343_v4 = vadd.f32 %v11639_v3, %v2746_v24  ;;  %v11644_v3 = vld [vmem:[#allocation63_spill] sm:$0xff] }
 0x311   : > { %11633 = vst [vmem:[#allocation23_spill] sm:$0xff] %v11050_v23  ;;  %v3791_v26 = vadd.f32 %v3706_v36, %v3340_v56  ;;  %v3346_v56 = vadd.f32 %v11642_v31, %v2749_v54  ;;  %v11647_v31 = vld [vmem:[#allocation65_spill] sm:$0xff] }
 0x312   : > { %v8605_v0 = vpop.f32.mrf.mxu1  ;;  %v11062_v9 = vpop.f32.mrf.mxu0 }
 0x313   : > { %v3796_v30 = vadd.f32 %v8605_v0, %v3345_v46  ;;  %11638 = vst [vmem:[#allocation38_spill] sm:$0xff] %v11062_v9  ;;  %v11066_v61 = vadd.f32 %v10856_v44, %v3791_v26  ;;  %v11643_v46 = vld [vmem:[#allocation62_spill] sm:$0xff] }
 0x314   : > { %v3719_v13 = vpop.f32.mrf.mxu1  ;;  %v11068_v45 = vpop.f32.mrf.mxu0  ;;  %v3344_v0 = vadd.f32 %v11643_v46, %v2747_v39  ;;  %v4584_v39 = vadd.f32 %v11647_v31, %v10882_v52  ;;  %v11650_v52 = vld [vmem:[#allocation69_spill] sm:$0xff] }
 0x315   : > { %11640 = vst [vmem:[#allocation25_spill] sm:$0xff] %v11066_v61  ;;  %v3794_v23 = vadd.f32 %v3719_v13, %v3343_v4  ;;  %11641 = vst [vmem:[#allocation40_spill] sm:$0xff] %v11068_v45  ;;  %v11072_v62 = vadd.f32 %v10866_v6, %v3796_v30  ;;  %v4586_v4 = vadd.f32 %v11644_v3, %v10875_v10  ;;  %v11651_v3 = vld [vmem:[#allocation71_spill] sm:$0xff] }
 0x316   : > { %v8606_v36 = vpop.f32.mrf.mxu1  ;;  %v11074_v8 = vpop.f32.mrf.mxu0 }
 0x317   : > { %v3797_v22 = vadd.f32 %v8606_v36, %v3346_v56  ;;  %v11078_v24 = vadd.f32 %v10872_v51, %v3794_v23 }
 0x318   : > { %v3722_v44 = vpop.f32.mrf.mxu1  ;;  %v11080_v17 = vpop.f32.mrf.mxu0 }
 0x319   : > { %v3795_v26 = vadd.f32 %v3722_v44, %v3344_v0  ;;  %v11085_v54 = vadd.f32 %v10877_v14, %v3797_v22 }
 0x31a   : > { %v8673_v6 = vpop.f32.mrf.mxu1  ;;  %v11087_v13 = vpop.f32.mrf.mxu0 }
 0x31b   : > { %11645 = vst [vmem:[#allocation27_spill] sm:$0xff] %v11085_v54  ;;  %v5180_v30 = vadd.f32 %v8673_v6, %v4586_v4  ;;  %11646 = vst [vmem:[#allocation41_spill] sm:$0xff] %v11087_v13  ;;  %v11092_v51 = vadd.f32 %v10884_v32, %v3795_v26  ;;  %v4590_v32 = vadd.f32 %v11650_v52, %v10900_v34 }
 0x31c   : > { %v5019_v23 = vpop.f32.mrf.mxu1  ;;  %v11094_v36 = vpop.f32.mrf.mxu0  ;;  %v4588_v4 = vadd.f32 %v11651_v3, %v10907_v16 }
 0x31d   : > { %11648 = vst [vmem:[#allocation29_spill] sm:$0xff] %v11092_v51  ;;  %v5178_v56 = vadd.f32 %v5019_v23, %v4584_v39  ;;  %11649 = vst [vmem:[#allocation85_spill] sm:$0xff] %v11094_v36  ;;  %v11097_v46 = vadd.f32 %v10891_v35, %v5180_v30 }
 0x31e   : > { %v11099_v10 = vpop.f32.mrf.mxu1  ;;  %v11104_v22 = vpop.f32.mrf.mxu0 }
 0x31f   : > { %v11102_v14 = vadd.f32 %v10897_v21, %v5178_v56  ;;  %v11652_v56 = vld [vmem:[#allocation74_spill] sm:$0xff] }
 0x320   : > { %v11106_v0 = vpop.f32.mrf.mxu1  ;;  %v11112_v6 = vpop.f32.mrf.mxu0  ;;  %v4594_v52 = vadd.f32 %v11652_v56, %v10925_v38  ;;  %v11654_v56 = vld [vmem:[#allocation79_spill] sm:$0xff] }
 0x322   : > { %v8677_v44 = vpop.f32.mrf.mxu1  ;;  %v11122_v23 = vpop.f32.mrf.mxu0 }
 0x323   : > { %v5184_v26 = vadd.f32 %v8677_v44, %v4590_v32  ;;  %v11653_v44 = vld [vmem:[#allocation76_spill] sm:$0xff] }
 0x324   : > { %v5035_v35 = vpop.f32.mrf.mxu1  ;;  %v4592_v3 = vadd.f32 %v11653_v44, %v10932_v15  ;;  %v11655_v44 = vld [vmem:[#allocation80_spill] sm:$0xff] }
 0x325   : > { %v5182_v30 = vadd.f32 %v5035_v35, %v4588_v4  ;;  %v11115_v31 = vadd.f32 %v10916_v18, %v5184_v26  ;;  %v11130_v4 = vpop.f32.mrf.mxu0 }
 0x326   : > { %v11117_v21 = vpop.f32.mrf.mxu1 }
 0x327   : > { %v11120_v39 = vadd.f32 %v10922_v42, %v5182_v30 }
 0x328   : > { %v11124_v34 = vpop.f32.mrf.mxu1  ;;  %v11140_v36 = vpop.f32.mrf.mxu0 }
 0x32b   : > { %v8681_v16 = vpop.f32.mrf.mxu1 }
 0x32c   : > { %v5188_v32 = vadd.f32 %v8681_v16, %v4594_v52  ;;  %v4598_v52 = vadd.f32 %v11654_v56, %v10952_v49  ;;  %v11656_v56 = vld [vmem:[#allocation83_spill] sm:$0xff] }
 0x32d   : > { %v5051_v18 = vpop.f32.mrf.mxu1 }
 0x32e   : > { %v5186_v26 = vadd.f32 %v5051_v18, %v4592_v3  ;;  %v11133_v35 = vadd.f32 %v10941_v58, %v5188_v32  ;;  %v4596_v3 = vadd.f32 %v11655_v44, %v10959_v48  ;;  %v11148_v18 = vpop.f32.mrf.mxu0  ;;  %v11657_v44 = vld [vmem:[#allocation84_spill] sm:$0xff] }
 0x32f   : > { %v11135_v42 = vpop.f32.mrf.mxu1 }
 0x330   : > { %v11138_v30 = vadd.f32 %v10947_v59, %v5186_v26  ;;  %v11158_v51 = vpop.f32.mrf.mxu0 }
 0x331   : > { %v11142_v38 = vpop.f32.mrf.mxu1 }
 0x334   : > { %v8685_v15 = vpop.f32.mrf.mxu1 }
 0x335   : > { %v5192_v16 = vadd.f32 %v8685_v15, %v4598_v52  ;;  %v4602_v52 = vadd.f32 %v11656_v56, %v10980_v12  ;;  %v4606_v56 = vadd.f32 %v10808_v60, %v11008_v55  ;;  %v4610_v55 = vadd.f32 %v10842_v28, %v11036_v2 }
 0x336   : > { %v5067_v58 = vpop.f32.mrf.mxu1 }
 0x337   : > { %v5190_v32 = vadd.f32 %v5067_v58, %v4596_v3  ;;  %v11151_v13 = vadd.f32 %v10968_v7, %v5192_v16  ;;  %v4600_v3 = vadd.f32 %v11657_v44, %v10987_v33  ;;  %v11166_v58 = vpop.f32.mrf.mxu0 }
 0x338   : > { %v11153_v59 = vpop.f32.mrf.mxu1 }
 0x339   : > { %v11156_v26 = vadd.f32 %v10975_v19, %v5190_v32  ;;  %v11176_v45 = vpop.f32.mrf.mxu0 }
 0x33a   : > { %v11160_v49 = vpop.f32.mrf.mxu1 }
 0x33b   : > { %v11184_v44 = vpop.f32.mrf.mxu0 }
 0x33c   : > { %v8689_v48 = vpop.f32.mrf.mxu1 }
 0x33d   : > { %v5196_v15 = vadd.f32 %v8689_v48, %v4602_v52  ;;  %v4604_v48 = vadd.f32 %v10819_v20, %v11015_v27 }
 0x33e   : > { %v5083_v7 = vpop.f32.mrf.mxu1 }
 0x33f   : > { %v5194_v16 = vadd.f32 %v5083_v7, %v4600_v3  ;;  %v11169_v54 = vadd.f32 %v10996_v29, %v5196_v15 }
 0x340   : > { %v11171_v19 = vpop.f32.mrf.mxu1 }
 0x341   : > { %v11174_v32 = vadd.f32 %v11003_v40, %v5194_v16  ;;  %v11194_v16 = vpop.f32.mrf.mxu0 }
 0x342   : > { %v11178_v12 = vpop.f32.mrf.mxu1 }
 0x345   : > { %v8693_v33 = vpop.f32.mrf.mxu1 }
 0x346   : > { %v5200_v52 = vadd.f32 %v8693_v33, %v4606_v56  ;;  %v4608_v56 = vadd.f32 %v10848_v63, %v11043_v43  ;;  %v11202_v33 = vpop.f32.mrf.mxu0  ;;  %v11662_v43 = vld [vmem:[#allocation17_spill] sm:$0xff] }
 0x347   : > { %v5099_v29 = vpop.f32.mrf.mxu1 }
 0x348   : > { %v5198_v15 = vadd.f32 %v5099_v29, %v4604_v48  ;;  %v11187_v3 = vadd.f32 %v11024_v25, %v5200_v52  ;;  %v11659_v29 = vld [vmem:[#allocation8_spill] sm:$0xff]  ;;  %v11214_v28 = vpop.f32.mrf.mxu0 }
 0x349   : > { %v11189_v40 = vpop.f32.mrf.mxu1 }
 0x34a   : > { %v11192_v7 = vadd.f32 %v11031_v47, %v5198_v15  ;;  %v11660_v15 = vld [vmem:[#allocation64_spill] sm:$0xff] }
 0x34b   : > { %v11196_v60 = vpop.f32.mrf.mxu1  ;;  %v2719_v9 = vadd.f32 %v11660_v15, %v11659_v29 }
 0x34d   : > { %v8697_v20 = vpop.f32.mrf.mxu1 }
 0x34e   : > { %v5204_v27 = vadd.f32 %v8697_v20, %v4610_v55  ;;  %v3316_v55 = vadd.f32 %v11662_v43, %v2719_v9 }
 0x34f   : > { %v5115_v25 = vpop.f32.mrf.mxu1 }
 0x350   : > { %v5202_v52 = vadd.f32 %v5115_v25, %v4608_v56  ;;  %v11205_v48 = vadd.f32 %v11052_v41, %v5204_v27  ;;  %v11220_v56 = vpop.f32.mrf.mxu0  ;;  %v3767_v27 = vadd.f32 %v10893_v53, %v3316_v55  ;;  %v11668_v55 = vld [vmem:[#allocation24_spill] sm:$0xff] }
 0x351   : > { %v11207_v47 = vpop.f32.mrf.mxu1 }
 0x352   : > { %11658 = vst [vmem:[#allocation43_spill] sm:$0xff] %v11205_v48  ;;  %v11212_v61 = vadd.f32 %v11057_v50, %v5202_v52  ;;  %v11663_v50 = vld [vmem:[#allocation9_spill] sm:$0xff]  ;;  %v11664_v52 = vld [vmem:[#allocation70_spill] sm:$0xff] }
 0x353   : > { %v11216_v2 = vpop.f32.mrf.mxu1  ;;  %v2723_v15 = vadd.f32 %v11664_v52, %v11663_v50  ;;  %v11665_v48 = vld [vmem:[#allocation66_spill] sm:$0xff] }
 0x354   : > { %11661 = vst [vmem:[#allocation31_spill] sm:$0xff] %v11212_v61  ;;  %v4587_v9 = vadd.f32 %v11665_v48, %v10889_v1 }
 0x355   : > { %v8701_v63 = vpop.f32.mrf.mxu1 }
 0x356   : > { %v5208_v20 = vadd.f32 %v8701_v63, %v11072_v62  ;;  %v11236_v63 = vpop.f32.mrf.mxu0  ;;  %v5181_v53 = vadd.f32 %v11099_v10, %v4587_v9  ;;  %v11669_v9 = vld [vmem:[#allocation13_spill] sm:$0xff] }
 0x357   : > { %v5131_v41 = vpop.f32.mrf.mxu1 }
 0x358   : > { %v5206_v25 = vadd.f32 %v5131_v41, %v11078_v24  ;;  %v11225_v29 = vadd.f32 %v11074_v8, %v5208_v20  ;;  %v11667_v24 = vld [vmem:[#allocation67_spill] sm:$0xff]  ;;  %v3320_v20 = vadd.f32 %v11668_v55, %v2723_v15  ;;  %v11246_v48 = vpop.f32.mrf.mxu0  ;;  %v5632_v10 = vadd.f32 %v10902_v11, %v5181_v53 }
 0x359   : > { %v11229_v61 = vpop.f32.mrf.mxu1  ;;  %v4585_v8 = vadd.f32 %v11667_v24, %v3767_v27  ;;  %v11670_v27 = vld [vmem:[#allocation75_spill] sm:$0xff] }
 0x35a   : > { %v11234_v62 = vadd.f32 %v11080_v17, %v5206_v25  ;;  %v3771_v1 = vadd.f32 %v10918_v57, %v3320_v20  ;;  %v2727_v24 = vadd.f32 %v11670_v27, %v11669_v9  ;;  %v11263_v11 = vpop.f32.mrf.mxu0  ;;  %v11673_v9 = vld [vmem:[#allocation32_spill] sm:$0xff] }
 0x35b   : > { %v11238_v43 = vpop.f32.mrf.mxu1  ;;  %v5179_v50 = vadd.f32 %v11106_v0, %v4585_v8  ;;  %v11256_v0 = vld [vmem:[%s11426_s4] ss:$0 sm:$0xff] }
 0x35c   : > { %11666 = vst [vmem:[#allocation87_spill] sm:$0xff] %v11234_v62  ;;  %v3324_v27 = vadd.f32 %v11673_v9, %v2727_v24 }
 0x35d   : > { %v8769_v41 = vpop.f32.mrf.mxu1  ;;  %v5630_v8 = vadd.f32 %v10909_v37, %v5179_v50 }
 0x35e   : > { %v6449_v52 = vadd.f32 %v8769_v41, %v11097_v46 }
 0x35f   : > { %v6288_v17 = vpop.f32.mrf.mxu1 }
 0x360   : > { %v7043_v25 = vadd.f32 %v11104_v22, %v6449_v52  ;;  %v6447_v62 = vadd.f32 %v6288_v17, %v11102_v14  ;;  %v11671_v22 = vld [vmem:[#allocation72_spill] sm:$0xff]  ;;  %v11672_v14 = vld [vmem:[#allocation73_spill] sm:$0xff] }
 0x361   : > { %v8770_v46 = vpop.f32.mrf.mxu1  ;;  %v4591_v55 = vadd.f32 %v11671_v22, %v10914_v5  ;;  %v4589_v20 = vadd.f32 %v11672_v14, %v3771_v1  ;;  %v11275_v22 = vpop.f32.mrf.mxu0 }
 0x362   : > { %v7041_v57 = vadd.f32 %v11112_v6, %v6447_v62  ;;  %v6450_v15 = vadd.f32 %v8770_v46, %v5632_v10  ;;  %v7146_v41 = vadd.f32 %v11256_v0, %v7043_v25  ;;  %v11674_v46 = vld [vmem:[#allocation10_spill] sm:$0xff] }
 0x363   : > { %v6291_v53 = vpop.f32.mrf.mxu1  ;;  %v5185_v6 = vadd.f32 %v11117_v21, %v4591_v55  ;;  %v5183_v62 = vadd.f32 %v11124_v34, %v4589_v20  ;;  %v3775_v25 = vadd.f32 %v11674_v46, %v3324_v27 }
 0x364   : > { %v7044_v52 = vadd.f32 %v11122_v23, %v6450_v15  ;;  %v6448_v17 = vadd.f32 %v6291_v53, %v5630_v8  ;;  %v7144_v50 = vadd.f32 %v11256_v0, %v7041_v57  ;;  %v7178_v15 = vmax.f32 %v7146_v41, 0.0  ;;  %v11675_v8 = vld [vmem:[#allocation20_spill] sm:$0xff]  ;;  %v11676_v57 = vld [vmem:[#allocation77_spill] sm:$0xff]  ;;  %v11678_v53 = vld [vmem:[#allocation19_spill] sm:$0xff] }
 0x365   : > { %v8773_v37 = vpop.f32.mrf.mxu1  ;;  %v4595_v55 = vadd.f32 %v11676_v57, %v11675_v8 }
 0x366   : > { %v7147_v5 = vadd.f32 %v11256_v0, %v7044_v52  ;;  %v7042_v1 = vadd.f32 %v11130_v4, %v6448_v17  ;;  %v6453_v10 = vadd.f32 %v8773_v37, %v11115_v31  ;;  %v11677_v4 = vld [vmem:[#allocation68_spill] sm:$0xff]  ;;  %v5634_v52 = vadd.f32 %v11678_v53, %v5183_v62  ;;  %v11285_v37 = vpop.f32.mrf.mxu0 }
 0x367   : > { %v6304_v23 = vpop.f32.mrf.mxu1  ;;  %v5636_v20 = vadd.f32 %v11677_v4, %v5185_v6  ;;  %v7176_v17 = vmax.f32 %v7144_v50, 0.0  ;;  %v11681_v4 = vld [vmem:[#allocation12_spill] sm:$0xff] }
 0x368   : > { %v7179_v24 = vmax.f32 %v7147_v5, 0.0  ;;  %v7145_v21 = vadd.f32 %v11256_v0, %v7042_v1  ;;  %v6451_v34 = vadd.f32 %v6304_v23, %v11120_v39  ;;  %v7047_v14 = vadd.f32 %v11140_v36, %v6453_v10  ;;  %v11679_v10 = vld [vmem:[#allocation78_spill] sm:$0xff] }
 0x369   : > { %v8774_v31 = vpop.f32.mrf.mxu1  ;;  %v5189_v1 = vadd.f32 %v11135_v42, %v4595_v55  ;;  %v4593_v6 = vadd.f32 %v11679_v10, %v3775_v25  ;;  %v11297_v42 = vpop.f32.mrf.mxu0  ;;  %v11680_v55 = vld [vmem:[#allocation22_spill] sm:$0xff] }
 0x36a   : > { %v8034_v9 = vpack.c.bf16 %v7179_v24, %v7178_v15  ;;  %v7177_v41 = vmax.f32 %v7145_v21, 0.0  ;;  %v7045_v27 = vadd.f32 %v11148_v18, %v6451_v34  ;;  %v6454_v5 = vadd.f32 %v8774_v31, %v5636_v20  ;;  %v11682_v20 = vld [vmem:[#allocation81_spill] sm:$0xff] }
 0x36b   : > { %v6307_v39 = vpop.f32.mrf.mxu1  ;;  %v7150_v23 = vadd.f32 %v11256_v0, %v7047_v14  ;;  %v5187_v21 = vadd.f32 %v11142_v38, %v4593_v6  ;;  %v5640_v14 = vadd.f32 %v11680_v55, %v5189_v1  ;;  %v11684_v1 = vld [vmem:[#allocation26_spill] sm:$0xff] }
 0x36c   : > { %8106 = vst [vmem:[%s9107_s29 + $0x8] sm:$0xff] %v8034_v9   ;;  %v8029_v46 = vpack.c.bf16 %v7177_v41, %v7176_v17  ;;  %v6452_v36 = vadd.f32 %v6307_v39, %v5634_v52  ;;  %v7048_v62 = vadd.f32 %v11158_v51, %v6454_v5  ;;  %v7148_v15 = vadd.f32 %v11256_v0, %v7045_v27  ;;  %v11307_v41 = vpop.f32.mrf.mxu0  ;;  %v11683_v27 = vld [vmem:[#allocation11_spill] sm:$0xff] }
 0x36d   : > { %v8777_v50 = vpop.f32.mrf.mxu1  ;;  %v7182_v31 = vmax.f32 %v7150_v23, 0.0  ;;  %v5638_v5 = vadd.f32 %v11683_v27, %v5187_v21 }
 0x36e   : > { %8030 = vst [vmem:[%s9107_s29] sm:$0xff] %v8029_v46   ;;  %v7046_v18 = vadd.f32 %v11166_v58, %v6452_v36  ;;  %v6457_v24 = vadd.f32 %v8777_v50, %v11133_v35  ;;  %v7151_v34 = vadd.f32 %v11256_v0, %v7048_v62  ;;  %v4599_v58 = vadd.f32 %v11682_v20, %v11681_v4  ;;  %v11685_v46 = vld [vmem:[#allocation82_spill] sm:$0xff] }
 0x36f   : > { %v6320_v8 = vpop.f32.mrf.mxu1  ;;  %v7180_v53 = vmax.f32 %v7148_v15, 0.0  ;;  %v4597_v36 = vadd.f32 %v11685_v46, %v11684_v1 }
 0x370   : > { %v7149_v25 = vadd.f32 %v11256_v0, %v7046_v18  ;;  %v7051_v57 = vadd.f32 %v11176_v45, %v6457_v24  ;;  %v6455_v51 = vadd.f32 %v6320_v8, %v11138_v30  ;;  %v7183_v35 = vmax.f32 %v7151_v34, 0.0  ;;  %v11320_v18 = vpop.f32.mrf.mxu0  ;;  %v11686_v8 = vld [vmem:[#allocation28_spill] sm:$0xff] }
 0x371   : > { %v8778_v38 = vpop.f32.mrf.mxu1  ;;  %v5193_v9 = vadd.f32 %v11153_v59, %v4599_v58  ;;  %v5191_v59 = vadd.f32 %v11160_v49, %v4597_v36  ;;  %v11687_v58 = vld [vmem:[#allocation14_spill] sm:$0xff] }
 0x372   : > { %v7181_v52 = vmax.f32 %v7149_v25, 0.0  ;;  %v6458_v17 = vadd.f32 %v8778_v38, %v5640_v14  ;;  %v8044_v45 = vpack.c.bf16 %v7183_v35, %v7182_v31  ;;  %v7049_v30 = vadd.f32 %v11184_v44, %v6455_v51  ;;  %v11689_v35 = vld [vmem:[#allocation86_spill] sm:$0xff] }
 0x373   : > { %v6323_v39 = vpop.f32.mrf.mxu1  ;;  %v7154_v6 = vadd.f32 %v11256_v0, %v7051_v57  ;;  %v5644_v25 = vadd.f32 %v11686_v8, %v5193_v9  ;;  %v5642_v31 = vadd.f32 %v11687_v58, %v5191_v59  ;;  %v11334_v9 = vpop.f32.mrf.mxu0  ;;  %v11697_v58 = vld [vmem:[#allocation90_spill] sm:$0xff] }
 0x374   : > { %v8039_v10 = vpack.c.bf16 %v7181_v52, %v7180_v53  ;;  %v7052_v23 = vadd.f32 %v11194_v16, %v6458_v17  ;;  %8108 = vst [vmem:[%s9107_s29 + $0x18] sm:$0xff] %v8044_v45   ;;  %v6456_v62 = vadd.f32 %v6323_v39, %v5638_v5  ;;  %v7152_v24 = vadd.f32 %v11256_v0, %v7049_v30  ;;  %v11690_v53 = vld [vmem:[#allocation15_spill] sm:$0xff]  ;;  %v11691_v52 = vld [vmem:[#allocation88_spill] sm:$0xff] }
 0x375   : > { %v8781_v50 = vpop.f32.mrf.mxu1  ;;  %v7186_v16 = vmax.f32 %v7154_v6, 0.0  ;;  %v4601_v17 = vadd.f32 %v11691_v52, %v11690_v53 }
 0x376   : > { %8107 = vst [vmem:[%s9107_s29 + $0x10] sm:$0xff] %v8039_v10   ;;  %v7155_v15 = vadd.f32 %v11256_v0, %v7052_v23  ;;  %v6461_v44 = vadd.f32 %v8781_v50, %v11151_v13  ;;  %v7050_v21 = vadd.f32 %v11202_v33, %v6456_v62  ;;  %v11688_v33 = vld [vmem:[#allocation30_spill] sm:$0xff]  ;;  %v11345_v62 = vpop.f32.mrf.mxu0 }
 0x377   : > { %v6336_v34 = vpop.f32.mrf.mxu1  ;;  %v4603_v38 = vadd.f32 %v11689_v35, %v11688_v33  ;;  %v5195_v39 = vadd.f32 %v11178_v12, %v4601_v17 }
 0x378   : > { %v7187_v57 = vmax.f32 %v7155_v15, 0.0  ;;  %v7055_v51 = vadd.f32 %v11214_v28, %v6461_v44  ;;  %v6459_v49 = vadd.f32 %v6336_v34, %v11156_v26  ;;  %v7153_v55 = vadd.f32 %v11256_v0, %v7050_v21  ;;  %v11692_v15 = vld [vmem:[#allocation18_spill] sm:$0xff]  ;;  %v11693_v44 = vld [vmem:[#allocation89_spill] sm:$0xff]  ;;  %v11694_v34 = vld [vmem:[#allocation16_spill] sm:$0xff] }
 0x379   : > { %v8782_v14 = vpop.f32.mrf.mxu1  ;;  %v7184_v28 = vmax.f32 %v7152_v24, 0.0  ;;  %v5197_v5 = vadd.f32 %v11171_v19, %v4603_v38  ;;  %v4607_v24 = vadd.f32 %v11693_v44, %v11692_v15 }
 0x37a   : > { %v8054_v13 = vpack.c.bf16 %v7187_v57, %v7186_v16  ;;  %v7053_v4 = vadd.f32 %v11220_v56, %v6459_v49  ;;  %v6462_v20 = vadd.f32 %v8782_v14, %v5644_v25  ;;  %v7185_v26 = vmax.f32 %v7153_v55, 0.0  ;;  %v8841_v55 = vpop.f32.mrf.mxu0 }
 0x37b   : > { %v6339_v45 = vpop.f32.mrf.mxu1  ;;  %v7158_v30 = vadd.f32 %v11256_v0, %v7055_v51 }
 0x37c   : > { %8110 = vst [vmem:[%s9107_s29 + $0x28] sm:$0xff] %v8054_v13   ;;  %v7056_v56 = vadd.f32 %v11236_v63, %v6462_v20  ;;  %v6460_v27 = vadd.f32 %v6339_v45, %v5642_v31  ;;  %v8049_v1 = vpack.c.bf16 %v7185_v26, %v7184_v28  ;;  %v7156_v36 = vadd.f32 %v11256_v0, %v7053_v4  ;;  %v6978_v17 = vpop.f32.mrf.mxu0 }
 0x37d   : > { %v8785_v46 = vpop.f32.mrf.mxu1  ;;  %v7190_v63 = vmax.f32 %v7158_v30, 0.0 }
 0x37e   : > { %v7159_v10 = vadd.f32 %v11256_v0, %v7056_v56  ;;  %v7054_v6 = vadd.f32 %v11246_v48, %v6460_v27  ;;  %v6465_v23 = vadd.f32 %v8785_v46, %v11169_v54  ;;  %8109 = vst [vmem:[%s9107_s29 + $0x20] sm:$0xff] %v8049_v1   ;;  %v5648_v48 = vadd.f32 %v11694_v34, %v5197_v5  ;;  %v11695_v54 = vld [vmem:[#allocation34_spill] sm:$0xff]  ;;  %v11698_v56 = vld [vmem:[#allocation21_spill] sm:$0xff]  ;;  %v11699_v5 = vld [vmem:[#allocation23_spill] sm:$0xff] }
 0x37f   : > { %v6352_v50 = vpop.f32.mrf.mxu1  ;;  %v5646_v25 = vadd.f32 %v11695_v54, %v5195_v39  ;;  %v7188_v16 = vmax.f32 %v7156_v36, 0.0  ;;  %v11700_v39 = vld [vmem:[#allocation91_spill] sm:$0xff] }
 0x380   : > { %v7191_v59 = vmax.f32 %v7159_v10, 0.0  ;;  %v7157_v19 = vadd.f32 %v11256_v0, %v7054_v6  ;;  %v6463_v12 = vadd.f32 %v6352_v50, %v11174_v32  ;;  %v7059_v21 = vadd.f32 %v11263_v11, %v6465_v23  ;;  %v11696_v11 = vld [vmem:[#allocation35_spill] sm:$0xff]  ;;  %v8842_v23 = vpop.f32.mrf.mxu0 }
 0x381   : > { %v8786_v8 = vpop.f32.mrf.mxu1  ;;  %v5201_v32 = vadd.f32 %v11189_v40, %v4607_v24  ;;  %v4605_v31 = vadd.f32 %v11697_v58, %v11696_v11  ;;  %v4611_v1 = vadd.f32 %v11700_v39, %v11699_v5 }
 0x382   : > { %v8064_v57 = vpack.c.bf16 %v7191_v59, %v7190_v63  ;;  %v7189_v51 = vmax.f32 %v7157_v19, 0.0  ;;  %v7057_v49 = vadd.f32 %v11275_v22, %v6463_v12  ;;  %v6466_v14 = vadd.f32 %v8786_v8, %v5648_v48  ;;  %v11703_v48 = vld [vmem:[#allocation43_spill] sm:$0xff] }
 0x383   : > { %v6355_v13 = vpop.f32.mrf.mxu1  ;;  %v7162_v33 = vadd.f32 %v11256_v0, %v7059_v21  ;;  %v5199_v40 = vadd.f32 %v11196_v60, %v4605_v31  ;;  %v5652_v27 = vadd.f32 %v11698_v56, %v5201_v32  ;;  %v5205_v6 = vadd.f32 %v11207_v47, %v4611_v1  ;;  %v11702_v21 = vld [vmem:[#allocation25_spill] sm:$0xff] }
 0x384   : > { %8112 = vst [vmem:[%s9107_s29 + $0x38] sm:$0xff] %v8064_v57   ;;  %v8059_v4 = vpack.c.bf16 %v7189_v51, %v7188_v16  ;;  %v6464_v20 = vadd.f32 %v6355_v13, %v5646_v25  ;;  %v7060_v35 = vadd.f32 %v11285_v37, %v6466_v14  ;;  %v7160_v53 = vadd.f32 %v11256_v0, %v7057_v49  ;;  %v11704_v57 = vld [vmem:[#allocation38_spill] sm:$0xff]  ;;  %v11705_v13 = vld [vmem:[#allocation31_spill] sm:$0xff] }
 0x385   : > { %v8789_v38 = vpop.f32.mrf.mxu1  ;;  %v5203_v34 = vadd.f32 %v11216_v2, %v11702_v21 }
 0x386   : > { %8111 = vst [vmem:[%s9107_s29 + $0x30] sm:$0xff] %v8059_v4   ;;  %v7058_v22 = vadd.f32 %v11297_v42, %v6464_v20  ;;  %v6469_v52 = vadd.f32 %v8789_v38, %v11187_v3  ;;  %v7163_v28 = vadd.f32 %v11256_v0, %v7060_v35  ;;  %v7194_v42 = vmax.f32 %v7162_v33, 0.0  ;;  %v11706_v33 = vld [vmem:[#allocation40_spill] sm:$0xff] }
 0x387   : > { %v6368_v26 = vpop.f32.mrf.mxu1  ;;  %v7192_v60 = vmax.f32 %v7160_v53, 0.0  ;;  %v5654_v35 = vadd.f32 %v11706_v33, %v5203_v34 }
 0x388   : > { %v7161_v45 = vadd.f32 %v11256_v0, %v7058_v22  ;;  %v7063_v30 = vadd.f32 %v11307_v41, %v6469_v52  ;;  %v6467_v37 = vadd.f32 %v6368_v26, %v11192_v7  ;;  %v7195_v3 = vmax.f32 %v7163_v28, 0.0  ;;  %v11701_v7 = vld [vmem:[#allocation37_spill] sm:$0xff] }
 0x389   : > { %v8790_v46 = vpop.f32.mrf.mxu1  ;;  %v5650_v63 = vadd.f32 %v11701_v7, %v5199_v40  ;;  %v11707_v40 = vld [vmem:[#allocation27_spill] sm:$0xff]  ;;  %v11708_v26 = vld [vmem:[#allocation29_spill] sm:$0xff] }
 0x38a   : > { %v7193_v36 = vmax.f32 %v7161_v45, 0.0  ;;  %v6470_v10 = vadd.f32 %v8790_v46, %v5652_v27  ;;  %v8074_v50 = vpack.c.bf16 %v7195_v3, %v7194_v42  ;;  %v7061_v41 = vadd.f32 %v11320_v18, %v6467_v37  ;;  %v6981_v18 = vpop.f32.mrf.mxu0  ;;  %v11709_v46 = vld [vmem:[#allocation87_spill] sm:$0xff] }
 0x38b   : > { %v6371_v59 = vpop.f32.mrf.mxu1  ;;  %v7166_v12 = vadd.f32 %v11256_v0, %v7063_v30  ;;  %v5209_v28 = vadd.f32 %v11229_v61, %v11707_v40  ;;  %v5207_v45 = vadd.f32 %v11238_v43, %v11708_v26 }
 0x38c   : > { %v8069_v19 = vpack.c.bf16 %v7193_v36, %v7192_v60  ;;  %v7064_v15 = vadd.f32 %v11334_v9, %v6470_v10  ;;  %8114 = vst [vmem:[%s9107_s29 + $0x48] sm:$0xff] %v8074_v50   ;;  %v6468_v44 = vadd.f32 %v6371_v59, %v5650_v63  ;;  %v7164_v54 = vadd.f32 %v11256_v0, %v7061_v41  ;;  %v8845_v20 = vpop.f32.mrf.mxu0  ;;  %v11710_v10 = vld [vmem:[#allocation41_spill] sm:$0xff] }
 0x38d   : > { %v8793_v24 = vpop.f32.mrf.mxu1  ;;  %v5656_v9 = vadd.f32 %v11704_v57, %v5205_v6  ;;  %v7198_v51 = vmax.f32 %v7166_v12, 0.0  ;;  %v5660_v6 = vadd.f32 %v11710_v10, %v5209_v28  ;;  %v11711_v50 = vld [vmem:[#allocation85_spill] sm:$0xff] }
 0x38e   : > { %8113 = vst [vmem:[%s9107_s29 + $0x40] sm:$0xff] %v8069_v19   ;;  %v7167_v47 = vadd.f32 %v11256_v0, %v7064_v15  ;;  %v6473_v8 = vadd.f32 %v8793_v24, %v11703_v48  ;;  %v7062_v25 = vadd.f32 %v11345_v62, %v6468_v44  ;;  %v7196_v38 = vmax.f32 %v7164_v54, 0.0 }
 0x38f   : > { %v6384_v16 = vpop.f32.mrf.mxu1  ;;  %v5658_v41 = vadd.f32 %v11711_v50, %v5207_v45 }
 0x390   : > { %v7199_v49 = vmax.f32 %v7167_v47, 0.0  ;;  %v7067_v14 = vadd.f32 %v8841_v55, %v6473_v8  ;;  %v6471_v32 = vadd.f32 %v6384_v16, %v11705_v13  ;;  %v7165_v2 = vadd.f32 %v11256_v0, %v7062_v25 }
 0x391   : > { %v8794_v4 = vpop.f32.mrf.mxu1 }
 0x392   : > { %v8084_v11 = vpack.c.bf16 %v7199_v49, %v7198_v51  ;;  %v7065_v58 = vadd.f32 %v6978_v17, %v6471_v32  ;;  %v6474_v31 = vadd.f32 %v8794_v4, %v5656_v9  ;;  %v7197_v62 = vmax.f32 %v7165_v2, 0.0  ;;  %v6994_v17 = vpop.f32.mrf.mxu0 }
 0x393   : > { %v6387_v53 = vpop.f32.mrf.mxu1  ;;  %v7170_v22 = vadd.f32 %v11256_v0, %v7067_v14 }
 0x394   : > { %8116 = vst [vmem:[%s9107_s29 + $0x58] sm:$0xff] %v8084_v11   ;;  %v7068_v52 = vadd.f32 %v8842_v23, %v6474_v31  ;;  %v6472_v55 = vadd.f32 %v6387_v53, %v5654_v35  ;;  %v8079_v30 = vpack.c.bf16 %v7197_v62, %v7196_v38  ;;  %v7168_v56 = vadd.f32 %v11256_v0, %v7065_v58  ;;  %v8846_v36 = vpop.f32.mrf.mxu0 }
 0x395   : > { %v8797_v37 = vpop.f32.mrf.mxu1  ;;  %v7202_v42 = vmax.f32 %v7170_v22, 0.0 }
 0x396   : > { %v7171_v27 = vadd.f32 %v11256_v0, %v7068_v52  ;;  %v7066_v5 = vadd.f32 %v6981_v18, %v6472_v55  ;;  %v6477_v39 = vadd.f32 %v8797_v37, %v11225_v29  ;;  %8115 = vst [vmem:[%s9107_s29 + $0x50] sm:$0xff] %v8079_v30   ;;  %v7200_v7 = vmax.f32 %v7168_v56, 0.0  ;;  %v6997_v21 = vpop.f32.mrf.mxu0 }
 0x397   : > { %v6400_v1 = vpop.f32.mrf.mxu1 }
 0x398   : > { %v7203_v3 = vmax.f32 %v7171_v27, 0.0  ;;  %v7169_v61 = vadd.f32 %v11256_v0, %v7066_v5  ;;  %v6475_v60 = vadd.f32 %v6400_v1, %v11709_v46  ;;  %v7071_v43 = vadd.f32 %v8845_v20, %v6477_v39 }
 0x399   : > { %v8798_v23 = vpop.f32.mrf.mxu1 }
 0x39a   : > { %v8094_v63 = vpack.c.bf16 %v7203_v3, %v7202_v42  ;;  %v7201_v29 = vmax.f32 %v7169_v61, 0.0  ;;  %v7069_v59 = vadd.f32 %v6994_v17, %v6475_v60  ;;  %v6478_v19 = vadd.f32 %v8798_v23, %v5660_v6 }
 0x39b   : > { %v6403_v12 = vpop.f32.mrf.mxu1  ;;  %v7174_v24 = vadd.f32 %v11256_v0, %v7071_v43 }
 0x39c   : > { %8118 = vst [vmem:[%s9107_s29 + $0x68] sm:$0xff] %v8094_v63   ;;  %v8089_v15 = vpack.c.bf16 %v7201_v29, %v7200_v7  ;;  %v6476_v44 = vadd.f32 %v6403_v12, %v5658_v41  ;;  %v7072_v34 = vadd.f32 %v8846_v36, %v6478_v19  ;;  %v7172_v47 = vadd.f32 %v11256_v0, %v7069_v59 }
 0x39d   : > { %v7206_v54 = vmax.f32 %v7174_v24, 0.0 }
 0x39e   : > { %8117 = vst [vmem:[%s9107_s29 + $0x60] sm:$0xff] %v8089_v15   ;;  %v7070_v48 = vadd.f32 %v6997_v21, %v6476_v44  ;;  %v7175_v8 = vadd.f32 %v11256_v0, %v7072_v34  ;;  %v7204_v16 = vmax.f32 %v7172_v47, 0.0 }
 0x3a0   : > { %v7173_v18 = vadd.f32 %v11256_v0, %v7070_v48  ;;  %v7207_v25 = vmax.f32 %v7175_v8, 0.0 }
 0x3a2   : > { %v7205_v57 = vmax.f32 %v7173_v18, 0.0  ;;  %v8104_v9 = vpack.c.bf16 %v7207_v25, %v7206_v54 }
 0x3a4   : > { %v8099_v51 = vpack.c.bf16 %v7205_v57, %v7204_v16  ;;  %8120 = vst [vmem:[%s9107_s29 + $0x78] sm:$0xff] %v8104_v9  }
 0x3a6   : > { %8119 = vst [vmem:[%s9107_s29 + $0x70] sm:$0xff] %v8099_v51  }
 0x3a7 PF: > { %s15_s20 = sadd.s32 1, %s9045_s20   ;;  %s11712_s18 = smov %s9041_s19 }
 0x3a8   : > { %p12_p5 = scmp.ge.s32.totalorder %s15_s20, 4   ;;  %s11713_s19 = smov %s11715_s21 }
 0x3aa   :  { %14 = sbr.rel (!%p12_p5) target bundleno = 2 (0x2), region = 116 }
 0x3af   :  { %7400 = vsyncmov [#allocation5] }
 0x3b2   :  { %s7401_s7 = vpop.sfrf %7400 }
 0x3b3   :  { %p7959_p6 = scmp.ne.s32.totalorder %s7401_s7, 0 }
 0x3b5   :  { %7405 = shalt.err (%p7959_p6)  }

</bundles_post_ra>
